<compile_context>
chip_gen: v5e
topology: v5e:2x2
jax: 0.10.0
libtpu: 0.0.40
codegen_flags: <defaults>
</compile_context>

<pallas_src>
import numpy as np
import jax
import jax.numpy as jnp
from jax.experimental import pallas as pl
from jax.experimental.pallas import tpu as pltpu


# ----------------------------- configuration -----------------------------
IMG = 28                      # get_mask() hard-codes a 28x28 checkerboard
C_IN = IMG * IMG              # 784 features
HALF = C_IN // 2              # 392 features per checkerboard parity
HALF_PAD = 512                # 4 * 128 — lane-aligned padded half width
N_HIDDEN = 256                # small hidden size for the test (module default: 1024)
N_FLOWS = 4
N_LAYERS = 2 * N_FLOWS        # 8 coupling layers
N_PAIRS = N_FLOWS             # 2 layers fused per grid step
BATCH = 16                    # fills a full (16,128) bf16 sublane tile


def get_mask_np():
    """Checkerboard mask identical to the PyTorch get_mask(): shape (1, 784)."""
    m = np.zeros((IMG, IMG), dtype=np.float32)
    for i in range(IMG):
        for j in range(IMG):
            if (i + j) % 2 == 0:
                m[i, j] = 1.0
    return m.reshape(1, C_IN)


_MASK_FLAT = get_mask_np().reshape(-1)
IDX_A = np.nonzero(_MASK_FLAT == 1.0)[0]   # 392 checkerboard "mask==1" positions
IDX_B = np.nonzero(_MASK_FLAT == 0.0)[0]   # 392 checkerboard "mask==0" positions


# ------------------------------ Pallas kernel -----------------------------
def flow_pair_kernel(zA_in_ref, zB_in_ref, ldj_in_ref,
                     w1_ref, b1_ref, w2_ref, b2_ref, w3_ref, b3_ref,
                     zA_ref, zB_ref, ldj_ref):
    """Two coupling layers (even mask, then odd mask) per grid step.

    zA / zB / ldj are carried in the output blocks (constant block index across
    the layer-pair grid axis -> resident in VMEM, written to HBM once).
    """
    step = pl.program_id(0)

    @pl.when(step == 0)
    def _():
        zA_ref[...] = zA_in_ref[...]
        zB_ref[...] = zB_in_ref[...]
        ldj_ref[...] = ldj_in_ref[...]

    def coupling(sub, x_active, z_update):
        # MLP: Linear -> ReLU -> Linear -> ReLU -> Linear (scale | translate fused)
        h1 = jnp.maximum(
            jnp.dot(x_active.astype(jnp.bfloat16), w1_ref[sub],
                    preferred_element_type=jnp.float32) + b1_ref[sub], 0.0)
        h2 = jnp.maximum(
            jnp.dot(h1.astype(jnp.bfloat16), w2_ref[sub],
                    preferred_element_type=jnp.float32) + b2_ref[sub], 0.0)
        out = jnp.dot(h2.astype(jnp.bfloat16), w3_ref[sub],
                      preferred_element_type=jnp.float32) + b3_ref[sub]  # (B, 2*HALF_PAD)
        log_scale = jnp.tanh(out[:, :HALF_PAD])      # aligned 128-lane split
        translate = out[:, HALF_PAD:]
        # forward (reverse=False) coupling: only the update-parity half changes;
        # pad lanes stay exactly 0 (0*exp(0) + 0).
        z_new = z_update * jnp.exp(log_scale) + translate
        return z_new, jnp.sum(log_scale, axis=-1, keepdims=True)

    zA = zA_ref[...]
    zB = zB_ref[...]

    # even layer of the pair: NN reads parity-A features, updates parity-B
    zB, d0 = coupling(0, zA, zB)
    # odd layer of the pair: NN reads (updated) parity-B features, updates parity-A
    zA, d1 = coupling(1, zB, zA)

    zA_ref[...] = zA
    zB_ref[...] = zB
    ldj_ref[...] = ldj_ref[...] + d0 + d1


# ------------------------------- Flow forward -----------------------------
@jax.jit
def flow_forward(packed, z, logdet):
    """Flow.forward with reverse=False; z: (B, 784), logdet: (B,)."""
    w1, b1, w2, b2, w3, b3 = packed
    B = z.shape[0]
    zA = jnp.pad(z[:, IDX_A], ((0, 0), (0, HALF_PAD - HALF)))
    zB = jnp.pad(z[:, IDX_B], ((0, 0), (0, HALF_PAD - HALF)))
    ldj = logdet.reshape(-1, 1)

    resident = lambda l: (0, 0)        # zA / zB / ldj resident across the layer grid
    per_pair = lambda l: (l, 0, 0)     # stream the 2-layer slice of stacked params

    zA_out, zB_out, ldj_out = pl.pallas_call(
        flow_pair_kernel,
        out_shape=(jax.ShapeDtypeStruct((B, HALF_PAD), jnp.float32),
                   jax.ShapeDtypeStruct((B, HALF_PAD), jnp.float32),
                   jax.ShapeDtypeStruct((B, 1), jnp.float32)),
        grid_spec=pltpu.PrefetchScalarGridSpec(
            num_scalar_prefetch=0,
            grid=(N_PAIRS,),
            in_specs=[
                pl.BlockSpec((B, HALF_PAD), resident),                   # zA_in
                pl.BlockSpec((B, HALF_PAD), resident),                   # zB_in
                pl.BlockSpec((B, 1), resident),                          # ldj_in
                pl.BlockSpec((2, HALF_PAD, N_HIDDEN), per_pair),         # w1 (bf16)
                pl.BlockSpec((2, 1, N_HIDDEN), per_pair),                # b1
                pl.BlockSpec((2, N_HIDDEN, N_HIDDEN), per_pair),         # w2 (bf16)
                pl.BlockSpec((2, 1, N_HIDDEN), per_pair),                # b2
                pl.BlockSpec((2, N_HIDDEN, 2 * HALF_PAD), per_pair),     # w3 (bf16)
                pl.BlockSpec((2, 1, 2 * HALF_PAD), per_pair),            # b3
            ],
            out_specs=(pl.BlockSpec((B, HALF_PAD), resident),
                       pl.BlockSpec((B, HALF_PAD), resident),
                       pl.BlockSpec((B, 1), resident)),
        ),
        compiler_params=pltpu.CompilerParams(
            dimension_semantics=("arbitrary",),   # layer-pair axis carries z/ldj
            vmem_limit_bytes=32 << 20,            # working set < 5 MiB; safe on v7x
        ),
    )(zA, zB, ldj, w1, b1, w2, b2, w3, b3)

    # Un-permute the two compact halves back into the original 784 feature order.
    z_out = jnp.zeros((B, C_IN), jnp.float32)
    z_out = z_out.at[:, IDX_A].set(zA_out[:, :HALF])
    z_out = z_out.at[:, IDX_B].set(zB_out[:, :HALF])
    return z_out, ldj_out.reshape(-1)


# --------------------------- parameter construction -----------------------
def init_linear(key, fan_in, fan_out, scale=1.0):
    """Deterministic PyTorch-style nn.Linear init: U(-1/sqrt(fan_in), ...)."""
    kw, kb = jax.random.split(key)
    bound = scale / np.sqrt(float(fan_in))
    w = jax.random.uniform(kw, (fan_in, fan_out), jnp.float32, -bound, bound)
    b = jax.random.uniform(kb, (1, fan_out), jnp.float32, -bound, bound)
    return w, b


def build_flow_params(key):
    """Parity-packed, lane-padded, bf16-weight stacked params + f32 reference copies."""
    keys = jax.random.split(key, N_LAYERS)
    packed = {k: [] for k in ("w1", "b1", "w2", "b2", "w3", "b3")}
    ref_layers = []
    pad_cols = HALF_PAD - HALF

    for l in range(N_LAYERS):
        k1, k2, k3 = jax.random.split(keys[l], 3)
        w1, b1 = init_linear(k1, C_IN, N_HIDDEN)
        w2, b2 = init_linear(k2, N_HIDDEN, N_HIDDEN)
        # NOTE: PyTorch zero-inits the last Linear (identity flow at init); small
        # random weights are used instead so the compute path is exercised.
        w3, b3 = init_linear(k3, N_HIDDEN, 2 * C_IN, scale=0.1)

        # Round weights through bf16 once so kernel and f32 reference share them.
        w1 = w1.astype(jnp.bfloat16).astype(jnp.float32)
        w2 = w2.astype(jnp.bfloat16).astype(jnp.float32)
        w3 = w3.astype(jnp.bfloat16).astype(jnp.float32)

        active_idx = IDX_A if l % 2 == 0 else IDX_B   # NN input positions (mask==1)
        update_idx = IDX_B if l % 2 == 0 else IDX_A   # positions being updated

        # pack: drop w1 rows that multiply mask-zeroed inputs; drop w3/b3 columns
        # whose outputs feed pass-through positions.  Zero pads keep math exact.
        w1_p = jnp.pad(w1[active_idx, :], ((0, pad_cols), (0, 0)))           # (512, 256)
        w3_s = jnp.pad(w3[:, update_idx], ((0, 0), (0, pad_cols)))           # (256, 512)
        w3_t = jnp.pad(w3[:, C_IN + update_idx], ((0, 0), (0, pad_cols)))    # (256, 512)
        b3_s = jnp.pad(b3[:, update_idx], ((0, 0), (0, pad_cols)))           # (1, 512)
        b3_t = jnp.pad(b3[:, C_IN + update_idx], ((0, 0), (0, pad_cols)))    # (1, 512)

        packed["w1"].append(w1_p)
        packed["b1"].append(b1)
        packed["w2"].append(w2)
        packed["b2"].append(b2)
        packed["w3"].append(jnp.concatenate([w3_s, w3_t], axis=1))           # (256, 1024)
        packed["b3"].append(jnp.concatenate([b3_s, b3_t], axis=1))           # (1, 1024)

        mask = jnp.asarray(_MASK_FLAT if l % 2 == 0 else 1.0 - _MASK_FLAT).reshape(1, C_IN)
        ref_layers.append((mask, w1, b1, w2, b2, w3, b3))

    stack = lambda name: jnp.stack(packed[name], axis=0)
    packed_params = (stack("w1").astype(jnp.bfloat16),    # (8, 512, 256)  bf16
                     stack("b1"),                         # (8, 1, 256)    f32
                     stack("w2").astype(jnp.bfloat16),    # (8, 256, 256)  bf16
                     stack("b2"),                         # (8, 1, 256)    f32
                     stack("w3").astype(jnp.bfloat16),    # (8, 256, 1024) bf16
                     stack("b3"))                         # (8, 1, 1024)   f32
    return packed_params, ref_layers


# --------------------------- pure-JAX references ----------------------------
def flow_ref_packed(packed, z, logdet):
    """Mirror of the kernel math (parity-packed, bf16 dots, f32 accumulation)."""
    w1, b1, w2, b2, w3, b3 = packed
    zA = jnp.pad(z[:, IDX_A], ((0, 0), (0, HALF_PAD - HALF)))
    zB = jnp.pad(z[:, IDX_B], ((0, 0), (0, HALF_PAD - HALF)))
    ldj = logdet.reshape(-1, 1)
    for l in range(N_LAYERS):
        x = (zA if l % 2 == 0 else zB).astype(jnp.bfloat16)
        h1 = jnp.maximum(jnp.dot(x, w1[l], preferred_element_type=jnp.float32) + b1[l], 0.0)
        h2 = jnp.maximum(jnp.dot(h1.astype(jnp.bfloat16), w2[l],
                                 preferred_element_type=jnp.float32) + b2[l], 0.0)
        out = jnp.dot(h2.astype(jnp.bfloat16), w3[l],
                      preferred_element_type=jnp.float32) + b3[l]
        ls = jnp.tanh(out[:, :HALF_PAD])
        tr = out[:, HALF_PAD:]
        if l % 2 == 0:
            zB = zB * jnp.exp(ls) + tr
        else:
            zA = zA * jnp.exp(ls) + tr
        ldj = ldj + jnp.sum(ls, axis=-1, keepdims=True)
    z_out = jnp.zeros((z.shape[0], C_IN), jnp.float32)
    z_out = z_out.at[:, IDX_A].set(zA[:, :HALF]).at[:, IDX_B].set(zB[:, :HALF])
    return z_out, ldj.reshape(-1)


def flow_ref_full_f32(ref_layers, z, logdet):
    """Module-semantics reference: full 784-wide masked coupling, pure f32 math."""
    ldj = logdet.reshape(-1, 1)
    for mask, w1, b1, w2, b2, w3, b3 in ref_layers:
        h1 = jnp.maximum((mask * z) @ w1 + b1, 0.0)
        h2 = jnp.maximum(h1 @ w2 + b2, 0.0)
        out = h2 @ w3 + b3
        log_scale = jnp.tanh(out[:, :C_IN])
        translate = out[:, C_IN:]
        z = mask * z + (1.0 - mask) * (z * jnp.exp(log_scale) + translate)
        ldj = ldj + jnp.sum((1.0 - mask) * log_scale, axis=-1, keepdims=True)
    return z, ldj.reshape(-1)


# ----------------------------------- main ----------------------------------
if __name__ == "__main__":
    key = jax.random.PRNGKey(0)
    k_params, k_z = jax.random.split(key)

    packed, ref_layers = build_flow_params(k_params)
    z = jax.random.normal(k_z, (BATCH, C_IN), jnp.float32)
    logdet = jnp.zeros((BATCH,), jnp.float32)

    # TODO(synk): only the forward (reverse=False) path is implemented; the
    # reverse coupling path of the PyTorch module is not needed here.
    z_out, ldj_out = flow_forward(packed, z, logdet)
    z_out = jax.block_until_ready(z_out)
    ldj_out = jax.block_until_ready(ldj_out)

    # Exact-math mirror reference (same packing, same bf16 dots).
    z_ref, ldj_ref = flow_ref_packed(packed, z, logdet)
    assert jnp.allclose(z_out, z_ref, atol=1e-2, rtol=1e-2), "z mismatch vs packed mirror ref"
    assert jnp.allclose(ldj_out, ldj_ref, atol=1e-2, rtol=1e-2), "ldj mismatch vs packed mirror ref"

    # Module-semantics reference: unpadded, unpacked, full f32 masked coupling
    # (checks the parity packing + padding exactness; looser tolerance covers
    # bf16 activation rounding in the kernel).
    z_r32, ldj_r32 = flow_ref_full_f32(ref_layers, z, logdet)
    assert jnp.allclose(z_out, z_r32, atol=5e-2, rtol=5e-2), "z mismatch vs full f32 ref"
    assert jnp.allclose(ldj_out, ldj_r32, atol=5e-2, rtol=5e-2), "ldj mismatch vs full f32 ref"

    print("KERNEL_OK")
</pallas_src>

<mosaic_0001>
module attributes {stable_mosaic.version = 11 : i64} {
  func.func @flow_pair_kernel(%arg0: i32, %arg1: memref<16x512xf32, #tpu.memory_space<vmem>>, %arg2: memref<16x512xf32, #tpu.memory_space<vmem>>, %arg3: memref<16x1xf32, #tpu.memory_space<vmem>>, %arg4: memref<2x512x256xbf16, #tpu.memory_space<vmem>>, %arg5: memref<2x1x256xf32, #tpu.memory_space<vmem>>, %arg6: memref<2x256x256xbf16, #tpu.memory_space<vmem>>, %arg7: memref<2x1x256xf32, #tpu.memory_space<vmem>>, %arg8: memref<2x256x1024xbf16, #tpu.memory_space<vmem>>, %arg9: memref<2x1x1024xf32, #tpu.memory_space<vmem>>, %arg10: memref<16x512xf32, #tpu.memory_space<vmem>>, %arg11: memref<16x512xf32, #tpu.memory_space<vmem>>, %arg12: memref<16x1xf32, #tpu.memory_space<vmem>>) attributes {dimension_semantics = [#tpu.dimension_semantics<arbitrary>], iteration_bounds = array<i64: 4>, scalar_prefetch = 0 : i64, scratch_operands = 0 : i64, tpu.core_type = #tpu.core_type<tc>, window_params = [{pipeline_mode = #tpu.pipeline_mode<synchronous>, transform_indices = @transform_0, window_bounds = array<i64: 16, 512>}, {pipeline_mode = #tpu.pipeline_mode<synchronous>, transform_indices = @transform_1, window_bounds = array<i64: 16, 512>}, {pipeline_mode = #tpu.pipeline_mode<synchronous>, transform_indices = @transform_2, window_bounds = array<i64: 16, 1>}, {transform_indices = @transform_3, window_bounds = array<i64: 2, 512, 256>}, {transform_indices = @transform_4, window_bounds = array<i64: 2, 1, 256>}, {transform_indices = @transform_5, window_bounds = array<i64: 2, 256, 256>}, {transform_indices = @transform_6, window_bounds = array<i64: 2, 1, 256>}, {transform_indices = @transform_7, window_bounds = array<i64: 2, 256, 1024>}, {transform_indices = @transform_8, window_bounds = array<i64: 2, 1, 1024>}, {pipeline_mode = #tpu.pipeline_mode<synchronous>, transform_indices = @transform_9, window_bounds = array<i64: 16, 512>}, {pipeline_mode = #tpu.pipeline_mode<synchronous>, transform_indices = @transform_10, window_bounds = array<i64: 16, 512>}, {pipeline_mode = #tpu.pipeline_mode<synchronous>, transform_indices = @transform_11, window_bounds = array<i64: 16, 1>}]} {
    %c0_i32 = arith.constant 0 : i32
    %0 = arith.cmpi eq, %arg0, %c0_i32 : i32
    %1 = arith.extui %0 : i1 to i32
    %c0_i32_0 = arith.constant 0 : i32
    %2 = arith.cmpi ne, %1, %c0_i32_0 : i32
    scf.if %2 {
      %c0_58 = arith.constant 0 : index
      %c0_59 = arith.constant 0 : index
      %83 = vector.load %arg1[%c0_58, %c0_59] : memref<16x512xf32, #tpu.memory_space<vmem>>, vector<16x512xf32>
      %c0_60 = arith.constant 0 : index
      %c0_61 = arith.constant 0 : index
      %84 = vector.load %arg10[%c0_60, %c0_61] : memref<16x512xf32, #tpu.memory_space<vmem>>, vector<16x512xf32>
      tpu.vector_store %arg10[%c0_60, %c0_61], %83 {strides = array<i32>} : memref<16x512xf32, #tpu.memory_space<vmem>>, vector<16x512xf32>,
      %c0_62 = arith.constant 0 : index
      %c0_63 = arith.constant 0 : index
      %85 = vector.load %arg2[%c0_62, %c0_63] : memref<16x512xf32, #tpu.memory_space<vmem>>, vector<16x512xf32>
      %c0_64 = arith.constant 0 : index
      %c0_65 = arith.constant 0 : index
      %86 = vector.load %arg11[%c0_64, %c0_65] : memref<16x512xf32, #tpu.memory_space<vmem>>, vector<16x512xf32>
      tpu.vector_store %arg11[%c0_64, %c0_65], %85 {strides = array<i32>} : memref<16x512xf32, #tpu.memory_space<vmem>>, vector<16x512xf32>,
      %c0_66 = arith.constant 0 : index
      %c0_67 = arith.constant 0 : index
      %87 = vector.load %arg3[%c0_66, %c0_67] : memref<16x1xf32, #tpu.memory_space<vmem>>, vector<16x1xf32>
      %c0_68 = arith.constant 0 : index
      %c0_69 = arith.constant 0 : index
      %88 = vector.load %arg12[%c0_68, %c0_69] : memref<16x1xf32, #tpu.memory_space<vmem>>, vector<16x1xf32>
      tpu.vector_store %arg12[%c0_68, %c0_69], %87 {strides = array<i32>} : memref<16x1xf32, #tpu.memory_space<vmem>>, vector<16x1xf32>,
    } else {
    }
    %c0 = arith.constant 0 : index
    %c0_1 = arith.constant 0 : index
    %3 = vector.load %arg10[%c0, %c0_1] : memref<16x512xf32, #tpu.memory_space<vmem>>, vector<16x512xf32>
    %c0_2 = arith.constant 0 : index
    %c0_3 = arith.constant 0 : index
    %4 = vector.load %arg11[%c0_2, %c0_3] : memref<16x512xf32, #tpu.memory_space<vmem>>, vector<16x512xf32>
    %5 = arith.truncf %3 : vector<16x512xf32> to vector<16x512xbf16>
    %c0_4 = arith.constant 0 : index
    %c0_5 = arith.constant 0 : index
    %c0_6 = arith.constant 0 : index
    %6 = vector.load %arg4[%c0_4, %c0_5, %c0_6] : memref<2x512x256xbf16, #tpu.memory_space<vmem>>, vector<1x512x256xbf16>
    %7 = vector.shape_cast %6 : vector<1x512x256xbf16> to vector<512x256xbf16>
    %cst = arith.constant dense<0.000000e+00> : vector<16x256xf32>
    %8 = tpu.matmul %5, %7, %cst {dimension_numbers = #tpu.dot_dimension_numbers<[1], [0], [0], [1], [0, 0, 1, 1], [], []>} : vector<16x512xbf16>, vector<512x256xbf16>, vector<16x256xf32> -> vector<16x256xf32>
    %c0_7 = arith.constant 0 : index
    %c0_8 = arith.constant 0 : index
    %c0_9 = arith.constant 0 : index
    %9 = vector.load %arg5[%c0_7, %c0_8, %c0_9] : memref<2x1x256xf32, #tpu.memory_space<vmem>>, vector<1x1x256xf32>
    %10 = vector.shape_cast %9 : vector<1x1x256xf32> to vector<1x256xf32>
    %11 = vector.broadcast %10 : vector<1x256xf32> to vector<16x256xf32>
    %12 = arith.addf %8, %11 : vector<16x256xf32>
    %cst_10 = arith.constant 0.000000e+00 : f32
    %13 = vector.broadcast %cst_10 : f32 to vector<16x256xf32>
    %14 = arith.maximumf %12, %13 : vector<16x256xf32>
    %15 = arith.truncf %14 : vector<16x256xf32> to vector<16x256xbf16>
    %c0_11 = arith.constant 0 : index
    %c0_12 = arith.constant 0 : index
    %c0_13 = arith.constant 0 : index
    %16 = vector.load %arg6[%c0_11, %c0_12, %c0_13] : memref<2x256x256xbf16, #tpu.memory_space<vmem>>, vector<1x256x256xbf16>
    %17 = vector.shape_cast %16 : vector<1x256x256xbf16> to vector<256x256xbf16>
    %cst_14 = arith.constant dense<0.000000e+00> : vector<16x256xf32>
    %18 = tpu.matmul %15, %17, %cst_14 {dimension_numbers = #tpu.dot_dimension_numbers<[1], [0], [0], [1], [0, 0, 1, 1], [], []>} : vector<16x256xbf16>, vector<256x256xbf16>, vector<16x256xf32> -> vector<16x256xf32>
    %c0_15 = arith.constant 0 : index
    %c0_16 = arith.constant 0 : index
    %c0_17 = arith.constant 0 : index
    %19 = vector.load %arg7[%c0_15, %c0_16, %c0_17] : memref<2x1x256xf32, #tpu.memory_space<vmem>>, vector<1x1x256xf32>
    %20 = vector.shape_cast %19 : vector<1x1x256xf32> to vector<1x256xf32>
    %21 = vector.broadcast %20 : vector<1x256xf32> to vector<16x256xf32>
    %22 = arith.addf %18, %21 : vector<16x256xf32>
    %cst_18 = arith.constant 0.000000e+00 : f32
    %23 = vector.broadcast %cst_18 : f32 to vector<16x256xf32>
    %24 = arith.maximumf %22, %23 : vector<16x256xf32>
    %25 = arith.truncf %24 : vector<16x256xf32> to vector<16x256xbf16>
    %c0_19 = arith.constant 0 : index
    %c0_20 = arith.constant 0 : index
    %c0_21 = arith.constant 0 : index
    %26 = vector.load %arg8[%c0_19, %c0_20, %c0_21] : memref<2x256x1024xbf16, #tpu.memory_space<vmem>>, vector<1x256x1024xbf16>
    %27 = vector.shape_cast %26 : vector<1x256x1024xbf16> to vector<256x1024xbf16>
    %cst_22 = arith.constant dense<0.000000e+00> : vector<16x1024xf32>
    %28 = tpu.matmul %25, %27, %cst_22 {dimension_numbers = #tpu.dot_dimension_numbers<[1], [0], [0], [1], [0, 0, 1, 1], [], []>} : vector<16x256xbf16>, vector<256x1024xbf16>, vector<16x1024xf32> -> vector<16x1024xf32>
    %c0_23 = arith.constant 0 : index
    %c0_24 = arith.constant 0 : index
    %c0_25 = arith.constant 0 : index
    %29 = vector.load %arg9[%c0_23, %c0_24, %c0_25] : memref<2x1x1024xf32, #tpu.memory_space<vmem>>, vector<1x1x1024xf32>
    %30 = vector.shape_cast %29 : vector<1x1x1024xf32> to vector<1x1024xf32>
    %31 = vector.broadcast %30 : vector<1x1024xf32> to vector<16x1024xf32>
    %32 = arith.addf %28, %31 : vector<16x1024xf32>
    %33 = vector.extract_strided_slice %32 {offsets = [0, 0], sizes = [16, 512], strides = [1, 1]} : vector<16x1024xf32> to vector<16x512xf32>
    %34 = math.tanh %33 : vector<16x512xf32>
    %35 = vector.extract_strided_slice %32 {offsets = [0, 512], sizes = [16, 512], strides = [1, 1]} : vector<16x1024xf32> to vector<16x512xf32>
    %36 = math.exp %34 : vector<16x512xf32>
    %37 = arith.mulf %4, %36 : vector<16x512xf32>
    %38 = arith.addf %37, %35 : vector<16x512xf32>
    %cst_26 = arith.constant dense<0.000000e+00> : vector<16xf32>
    %39 = vector.multi_reduction <add>, %34, %cst_26 [1] : vector<16x512xf32> to vector<16xf32>
    %40 = vector.shape_cast %39 : vector<16xf32> to vector<16x1xf32>
    %41 = arith.truncf %38 : vector<16x512xf32> to vector<16x512xbf16>
    %c1 = arith.constant 1 : index
    %c0_27 = arith.constant 0 : index
    %c0_28 = arith.constant 0 : index
    %42 = vector.load %arg4[%c1, %c0_27, %c0_28] : memref<2x512x256xbf16, #tpu.memory_space<vmem>>, vector<1x512x256xbf16>
    %43 = vector.shape_cast %42 : vector<1x512x256xbf16> to vector<512x256xbf16>
    %cst_29 = arith.constant dense<0.000000e+00> : vector<16x256xf32>
    %44 = tpu.matmul %41, %43, %cst_29 {dimension_numbers = #tpu.dot_dimension_numbers<[1], [0], [0], [1], [0, 0, 1, 1], [], []>} : vector<16x512xbf16>, vector<512x256xbf16>, vector<16x256xf32> -> vector<16x256xf32>
    %c1_30 = arith.constant 1 : index
    %c0_31 = arith.constant 0 : index
    %c0_32 = arith.constant 0 : index
    %45 = vector.load %arg5[%c1_30, %c0_31, %c0_32] : memref<2x1x256xf32, #tpu.memory_space<vmem>>, vector<1x1x256xf32>
    %46 = vector.shape_cast %45 : vector<1x1x256xf32> to vector<1x256xf32>
    %47 = vector.broadcast %46 : vector<1x256xf32> to vector<16x256xf32>
    %48 = arith.addf %44, %47 : vector<16x256xf32>
    %cst_33 = arith.constant 0.000000e+00 : f32
    %49 = vector.broadcast %cst_33 : f32 to vector<16x256xf32>
    %50 = arith.maximumf %48, %49 : vector<16x256xf32>
    %51 = arith.truncf %50 : vector<16x256xf32> to vector<16x256xbf16>
    %c1_34 = arith.constant 1 : index
    %c0_35 = arith.constant 0 : index
    %c0_36 = arith.constant 0 : index
    %52 = vector.load %arg6[%c1_34, %c0_35, %c0_36] : memref<2x256x256xbf16, #tpu.memory_space<vmem>>, vector<1x256x256xbf16>
    %53 = vector.shape_cast %52 : vector<1x256x256xbf16> to vector<256x256xbf16>
    %cst_37 = arith.constant dense<0.000000e+00> : vector<16x256xf32>
    %54 = tpu.matmul %51, %53, %cst_37 {dimension_numbers = #tpu.dot_dimension_numbers<[1], [0], [0], [1], [0, 0, 1, 1], [], []>} : vector<16x256xbf16>, vector<256x256xbf16>, vector<16x256xf32> -> vector<16x256xf32>
    %c1_38 = arith.constant 1 : index
    %c0_39 = arith.constant 0 : index
    %c0_40 = arith.constant 0 : index
    %55 = vector.load %arg7[%c1_38, %c0_39, %c0_40] : memref<2x1x256xf32, #tpu.memory_space<vmem>>, vector<1x1x256xf32>
    %56 = vector.shape_cast %55 : vector<1x1x256xf32> to vector<1x256xf32>
    %57 = vector.broadcast %56 : vector<1x256xf32> to vector<16x256xf32>
    %58 = arith.addf %54, %57 : vector<16x256xf32>
    %cst_41 = arith.constant 0.000000e+00 : f32
    %59 = vector.broadcast %cst_41 : f32 to vector<16x256xf32>
    %60 = arith.maximumf %58, %59 : vector<16x256xf32>
    %61 = arith.truncf %60 : vector<16x256xf32> to vector<16x256xbf16>
    %c1_42 = arith.constant 1 : index
    %c0_43 = arith.constant 0 : index
    %c0_44 = arith.constant 0 : index
    %62 = vector.load %arg8[%c1_42, %c0_43, %c0_44] : memref<2x256x1024xbf16, #tpu.memory_space<vmem>>, vector<1x256x1024xbf16>
    %63 = vector.shape_cast %62 : vector<1x256x1024xbf16> to vector<256x1024xbf16>
    %cst_45 = arith.constant dense<0.000000e+00> : vector<16x1024xf32>
    %64 = tpu.matmul %61, %63, %cst_45 {dimension_numbers = #tpu.dot_dimension_numbers<[1], [0], [0], [1], [0, 0, 1, 1], [], []>} : vector<16x256xbf16>, vector<256x1024xbf16>, vector<16x1024xf32> -> vector<16x1024xf32>
    %c1_46 = arith.constant 1 : index
    %c0_47 = arith.constant 0 : index
    %c0_48 = arith.constant 0 : index
    %65 = vector.load %arg9[%c1_46, %c0_47, %c0_48] : memref<2x1x1024xf32, #tpu.memory_space<vmem>>, vector<1x1x1024xf32>
    %66 = vector.shape_cast %65 : vector<1x1x1024xf32> to vector<1x1024xf32>
    %67 = vector.broadcast %66 : vector<1x1024xf32> to vector<16x1024xf32>
    %68 = arith.addf %64, %67 : vector<16x1024xf32>
    %69 = vector.extract_strided_slice %68 {offsets = [0, 0], sizes = [16, 512], strides = [1, 1]} : vector<16x1024xf32> to vector<16x512xf32>
    %70 = math.tanh %69 : vector<16x512xf32>
    %71 = vector.extract_strided_slice %68 {offsets = [0, 512], sizes = [16, 512], strides = [1, 1]} : vector<16x1024xf32> to vector<16x512xf32>
    %72 = math.exp %70 : vector<16x512xf32>
    %73 = arith.mulf %3, %72 : vector<16x512xf32>
    %74 = arith.addf %73, %71 : vector<16x512xf32>
    %cst_49 = arith.constant dense<0.000000e+00> : vector<16xf32>
    %75 = vector.multi_reduction <add>, %70, %cst_49 [1] : vector<16x512xf32> to vector<16xf32>
    %76 = vector.shape_cast %75 : vector<16xf32> to vector<16x1xf32>
    %c0_50 = arith.constant 0 : index
    %c0_51 = arith.constant 0 : index
    %77 = vector.load %arg10[%c0_50, %c0_51] : memref<16x512xf32, #tpu.memory_space<vmem>>, vector<16x512xf32>
    tpu.vector_store %arg10[%c0_50, %c0_51], %74 {strides = array<i32>} : memref<16x512xf32, #tpu.memory_space<vmem>>, vector<16x512xf32>,
    %c0_52 = arith.constant 0 : index
    %c0_53 = arith.constant 0 : index
    %78 = vector.load %arg11[%c0_52, %c0_53] : memref<16x512xf32, #tpu.memory_space<vmem>>, vector<16x512xf32>
    tpu.vector_store %arg11[%c0_52, %c0_53], %38 {strides = array<i32>} : memref<16x512xf32, #tpu.memory_space<vmem>>, vector<16x512xf32>,
    %c0_54 = arith.constant 0 : index
    %c0_55 = arith.constant 0 : index
    %79 = vector.load %arg12[%c0_54, %c0_55] : memref<16x1xf32, #tpu.memory_space<vmem>>, vector<16x1xf32>
    %80 = arith.addf %79, %40 : vector<16x1xf32>
    %81 = arith.addf %80, %76 : vector<16x1xf32>
    %c0_56 = arith.constant 0 : index
    %c0_57 = arith.constant 0 : index
    %82 = vector.load %arg12[%c0_56, %c0_57] : memref<16x1xf32, #tpu.memory_space<vmem>>, vector<16x1xf32>
    tpu.vector_store %arg12[%c0_56, %c0_57], %81 {strides = array<i32>} : memref<16x1xf32, #tpu.memory_space<vmem>>, vector<16x1xf32>,
    return
  }
  func.func @transform_0(%arg0: i32) -> (i32, i32) {
    %c0_i32 = arith.constant 0 : i32
    %c0_i32_0 = arith.constant 0 : i32
    %c0_i32_1 = arith.constant 0 : i32
    return %c0_i32, %c0_i32_0 : i32, i32
  }
  func.func @transform_1(%arg0: i32) -> (i32, i32) {
    %c0_i32 = arith.constant 0 : i32
    %c0_i32_0 = arith.constant 0 : i32
    %c0_i32_1 = arith.constant 0 : i32
    return %c0_i32, %c0_i32_0 : i32, i32
  }
  func.func @transform_2(%arg0: i32) -> (i32, i32) {
    %c0_i32 = arith.constant 0 : i32
    %c0_i32_0 = arith.constant 0 : i32
    %c0_i32_1 = arith.constant 0 : i32
    return %c0_i32, %c0_i32_0 : i32, i32
  }
  func.func @transform_3(%arg0: i32) -> (i32, i32, i32) {
    %c0_i32 = arith.constant 0 : i32
    %c0_i32_0 = arith.constant 0 : i32
    %c0_i32_1 = arith.constant 0 : i32
    return %arg0, %c0_i32, %c0_i32_0 : i32, i32, i32
  }
  func.func @transform_4(%arg0: i32) -> (i32, i32, i32) {
    %c0_i32 = arith.constant 0 : i32
    %c0_i32_0 = arith.constant 0 : i32
    %c0_i32_1 = arith.constant 0 : i32
    return %arg0, %c0_i32, %c0_i32_0 : i32, i32, i32
  }
  func.func @transform_5(%arg0: i32) -> (i32, i32, i32) {
    %c0_i32 = arith.constant 0 : i32
    %c0_i32_0 = arith.constant 0 : i32
    %c0_i32_1 = arith.constant 0 : i32
    return %arg0, %c0_i32, %c0_i32_0 : i32, i32, i32
  }
  func.func @transform_6(%arg0: i32) -> (i32, i32, i32) {
    %c0_i32 = arith.constant 0 : i32
    %c0_i32_0 = arith.constant 0 : i32
    %c0_i32_1 = arith.constant 0 : i32
    return %arg0, %c0_i32, %c0_i32_0 : i32, i32, i32
  }
  func.func @transform_7(%arg0: i32) -> (i32, i32, i32) {
    %c0_i32 = arith.constant 0 : i32
    %c0_i32_0 = arith.constant 0 : i32
    %c0_i32_1 = arith.constant 0 : i32
    return %arg0, %c0_i32, %c0_i32_0 : i32, i32, i32
  }
  func.func @transform_8(%arg0: i32) -> (i32, i32, i32) {
    %c0_i32 = arith.constant 0 : i32
    %c0_i32_0 = arith.constant 0 : i32
    %c0_i32_1 = arith.constant 0 : i32
    return %arg0, %c0_i32, %c0_i32_0 : i32, i32, i32
  }
  func.func @transform_9(%arg0: i32) -> (i32, i32) {
    %c0_i32 = arith.constant 0 : i32
    %c0_i32_0 = arith.constant 0 : i32
    %c0_i32_1 = arith.constant 0 : i32
    return %c0_i32, %c0_i32_0 : i32, i32
  }
  func.func @transform_10(%arg0: i32) -> (i32, i32) {
    %c0_i32 = arith.constant 0 : i32
    %c0_i32_0 = arith.constant 0 : i32
    %c0_i32_1 = arith.constant 0 : i32
    return %c0_i32, %c0_i32_0 : i32, i32
  }
  func.func @transform_11(%arg0: i32) -> (i32, i32) {
    %c0_i32 = arith.constant 0 : i32
    %c0_i32_0 = arith.constant 0 : i32
    %c0_i32_1 = arith.constant 0 : i32
    return %c0_i32, %c0_i32_0 : i32, i32
  }
}

</mosaic_0001>

<bundles_post_ra>
// kernel: flow_forward.1
= control target key start
LH: loop header
LB: loop body
LE: loop exit
PB: predicated region body
PF: predicated region fallthrough
CT: control target
= control target key end

     0   :  { %s8959_s0 = inlined_call_operand.vmem [shape: f32[16,512], index: 0, kind: input, shape index: {}]   ;;  %s8960_s1 = inlined_call_operand.vmem [shape: f32[16,512], index: 1, kind: input, shape index: {}]   ;;  %s8961_s2 = inlined_call_operand.vmem [shape: f32[16,1], index: 2, kind: input, shape index: {}]   ;;  %s8962_s3 = inlined_call_operand.hbm [shape: bf16[8,512,256], index: 3, kind: input, shape index: {}]   ;;  %s8963_s4 = inlined_call_operand.hbm [shape: f32[8,1,256], index: 4, kind: input, shape index: {}]   ;;  %s8964_s5 = inlined_call_operand.hbm [shape: bf16[8,256,256], index: 5, kind: input, shape index: {}]   ;;  %s8965_s6 = inlined_call_operand.hbm [shape: f32[8,1,256], index: 6, kind: input, shape index: {}]   ;;  %s8966_s7 = inlined_call_operand.hbm [shape: bf16[8,256,1024], index: 7, kind: input, shape index: {}]   ;;  %s8967_s8 = inlined_call_operand.hbm [shape: f32[8,1,1024], index: 8, kind: input, shape index: {}]   ;;  %s8968_s9 = inlined_call_operand.vmem [shape: f32[16,512], index: 9, kind: output, shape index: {0}]   ;;  %s8969_s10 = inlined_call_operand.vmem [shape: f32[16,512], index: 10, kind: output, shape index: {1}]   ;;  %s8970_s11 = inlined_call_operand.vmem [shape: f32[16,1], index: 11, kind: output, shape index: {2}]  }
   0x1   :  { %8987 = sst [smem:[#allocation19_spill]] %s8959_s0 }
   0x2   :  { %8988 = sst [smem:[#allocation20_spill]] %s8960_s1 }
   0x3   :  { %8989 = sst [smem:[#allocation21_spill]] %s8961_s2 }
   0x4   :  { %8990 = sst [smem:[#allocation22_spill]] %s8962_s3 }
   0x5   :  { %8991 = sst [smem:[#allocation23_spill]] %s8963_s4 }
   0x6   :  { %8992 = sst [smem:[#allocation24_spill]] %s8965_s6 }
   0x7   :  { %8993 = sst [smem:[#allocation25_spill]] %s8968_s9 }
   0x8   :  { %8994 = sst [smem:[#allocation26_spill]] %s8969_s10 }
   0x9   :  { %8995 = sst [smem:[#allocation27_spill]] %s8970_s11 }
   0xa   :  { %17 = vsyncpa [#allocation3], 0 }
   0xb   :  { %19 = vsyncpa [#allocation3 + $0x1], 0 }
   0xc   :  { %20 = vsyncpa [#allocation5], 0 }
   0xd   :  { %22 = vsyncpa [#allocation5 + $0x1], 0 }
   0xe   :  { %23 = vsyncpa [#allocation8], 0 }
   0xf   :  { %25 = vsyncpa [#allocation8 + $0x1], 0 }
  0x10   :  { %26 = vsyncpa [#allocation11], 0 }
  0x11   :  { %28 = vsyncpa [#allocation11 + $0x1], 0  ;;  %s7458_s17 = smov 0   ;;  %s7460_s18 = smov 0  }
  0x12   :  { %s7462_s19 = smov 0   ;;  %s7464_s20 = smov 0  }
  0x13 LB: > { %8996 = sst [smem:[#allocation16_spill]] %s7387_s19  ;;  %s7477_s21 = sadd.s32 4294967295, %s7391_s20   ;;  %s7391_s20 = sphi %s7464_s20, %s9018_s20   ;;  %s7387_s19 = sphi %s7462_s19, %s9020_s19   ;;  %s7383_s18 = sphi %s7460_s18, %s9022_s18   ;;  %s7379_s17 = sphi %s7458_s17, %s9021_s17  }
  0x14   : > { %s7480_s22 = sadd.s32 1, %s7391_s20   ;;  %s104_s24 = sadd.s32 1, %s7387_s19 }
  0x15   : > { %8997 = sst [smem:[#allocation17_spill]] %s7480_s22  ;;  %s101_s23 = ssub.s32 %s7391_s20, %s7480_s22 }
  0x16   : > { %p102_p0 = scmp.eq.s32.totalorder %s101_s23, 0  ;;  %p111_p1 = scmp.ne.s32.totalorder %s7387_s19, %s7383_s18 }
  0x17   : > { %p112_p2 = scmp.eq.s32.totalorder %s7391_s20, 0  ;;  %p117_p3 = scmp.ne.s32.totalorder %s7383_s18, %s7379_s17 }
  0x18   : > { %s7490_s25 = scalar_select %p102_p0, %s7387_s19, %s104_s24  }
  0x19   : > { %p113_p4 = por %p112_p2, %p111_p1  ;;  %p118_p5 = scmp.eq.s32.totalorder %s7477_s21, 0 }
  0x1a   : > { %8998 = sst [smem:[#allocation18_spill]] %s7490_s25  ;;  %p7055_p6 = scmp.lt.s32.totalorder %s7391_s20, 4 }
  0x1b   : > { %p7494_p7 = por %p118_p5, %p117_p3  ;;  %s7499_s27 = sand.u32 1, %s7387_s19  }
  0x1c   : > { %p7501_p8 = pnand %p7055_p6, %p113_p4  ;;  %s8974_s29 = sand.u32 1, %s7391_s20  }
  0x1d   : > { %s8975_s30 = sshll.u32 %s7499_s27, 2  ;;  %s6569_s12 = sshll.u32 %s7391_s20, 2 }
  0x1e   : > { %s370_s13 = scalar_lea.vmem [#allocation4], %s8975_s30  ;;  %s9001_s4 = sld [smem:[#allocation23_spill]] }
  0x1f   : > { %s378_s14 = sshll.u32 %s370_s13, 4  ;;  %s7515_s24 = scalar_lea.sflag [#allocation5], %s8974_s29  ;;  %s379_s14 = int_to_ptr.vmem [resolvable:$true] %s378_s14 }
  0x20   : > { %p7519_p10 = pneg %p7501_p8 }
  0x24   : > { %s375_s17 = scalar_lea.hbm %s9001_s4, %s6569_s12  ;;  %s7172_s16 = scalar_lea.hbm %s9001_s4, 16 }
  0x25   : > { %s376_s23 = sshll.u32 %s375_s17, 4  ;;  %s377_s23 = int_to_ptr.hbm [resolvable:$true] %s376_s23 }
  0x26   : > { %s7165_s25 = sshra.s32 %s377_s23, 4  ;;  %s7166_s25 = int_to_ptr.hbm [resolvable:$true] %s7165_s25 }
  0x27   : > { %s7167_s19 = scalar_lea.hbm %s7166_s25, 4  ;;  %p7173_p13 = scmp.lt.s32.totalorder %s7166_s25, %s9001_s4 }
  0x28   : > { %p7168_p9 = scmp.ne.s32.totalorder %s7166_s25, %s7167_s19  ;;  %p7174_p0 = scmp.lt.s32.totalorder %s7172_s16, %s7167_s19 }
  0x2a   : > { %p7170_p11 = pnand %p7519_p10, %p7168_p9  ;;  %p7175_p1 = por %p7174_p0, %p7173_p13 }
  0x2c   : > { %p7171_p12 = pneg %p7170_p11 }
  0x2e   : > { %p7176_p2 = pnand %p7175_p1, %p7171_p12 }
  0x30   : > { %7179 = shalt.err (!%p7176_p2)
}
  0x31   : > { %s8981_s30 = smov 32   ;;  %s7394_s11 = smov 2  }
  0x32   : > { %7042 = dma.hbm_to_vmem [thread:$0]  (!%p7501_p8), %s377_s23, 64, %s379_s14, %s7515_s24, %s8981_s30, %s8981_s30, %s7394_s11  }
  0x33   : > { %p4538_p3 = scmp.ge.s32.totalorder %s7391_s20, 1  ;;  %p476_p4 = scmp.lt.s32.totalorder %s7391_s20, 5 }
  0x34   : > { %s9004_s6 = sld [smem:[#allocation24_spill]]  ;;  %s9005_s16 = sshll.u32 %s7499_s27, 2 }
  0x35   : > { %p7538_p5 = pnand %p4538_p3, %p476_p4  ;;  %s415_s17 = scalar_lea.vmem [#allocation7], %s9005_s16 }
  0x36   : > { %s423_s4 = sshll.u32 %s415_s17, 4  ;;  %s9006_s2 = sand.u32 1, %s7391_s20   ;;  %s424_s4 = int_to_ptr.vmem [resolvable:$true] %s423_s4 }
  0x37   : > { %s7549_s10 = scalar_lea.sflag [#allocation8], %s9006_s2 }
  0x3a   : > { %s420_s13 = scalar_lea.hbm %s9004_s6, %s6569_s12  ;;  %s7202_s12 = scalar_lea.hbm %s9004_s6, 16 }
  0x3b   : > { %s421_s15 = sshll.u32 %s420_s13, 4  ;;  %s422_s15 = int_to_ptr.hbm [resolvable:$true] %s421_s15 }
  0x3c   : > { %s7195_s14 = sshra.s32 %s422_s15, 4  ;;  %s7196_s14 = int_to_ptr.hbm [resolvable:$true] %s7195_s14 }
  0x3d   : > { %s7197_s23 = scalar_lea.hbm %s7196_s14, 4  ;;  %p7203_p12 = scmp.lt.s32.totalorder %s7196_s14, %s9004_s6 }
  0x3e   : > { %p7198_p6 = scmp.ne.s32.totalorder %s7196_s14, %s7197_s23  ;;  %p7204_p13 = scmp.lt.s32.totalorder %s7202_s12, %s7197_s23 }
  0x40   : > { %p7200_p9 = pnand %p7198_p6, %p7519_p10  ;;  %p7205_p0 = por %p7204_p13, %p7203_p12 }
  0x42   : > { %p7201_p11 = pneg %p7200_p9 }
  0x44   : > { %p7206_p1 = pnand %p7205_p0, %p7201_p11 }
  0x46   : > { %7209 = shalt.err (!%p7206_p1)
}
  0x47   : > { %s9007_s2 = smov 32   ;;  %s4517_s1 = sshll.u32 %s7499_s27, 10 }
  0x48   : > { %7048 = dma.hbm_to_vmem [thread:$0]  (!%p7501_p8), %s422_s15, 64, %s424_s4, %s7549_s10, %s9007_s2, %s9007_s2, %s7394_s11  }
  0x49   : > { %s6568_s30 = sshll.u32 %s7391_s20, 10  ;;  %s9008_s3 = sld [smem:[#allocation22_spill]] }
  0x4a   : > { %s347_s14 = scalar_lea.vmem [#allocation2], %s4517_s1  ;;  %s4524_s25 = sshll.u32 %s7499_s27, 9 }
  0x4b   : > { %s356_s23 = sshll.u32 %s347_s14, 4  ;;  %s344_s29 = scalar_lea.sflag [#allocation3], %s7499_s27  ;;  %s357_s23 = int_to_ptr.vmem [resolvable:$true] %s356_s23 }
  0x4f   : > { %s353_s17 = scalar_lea.hbm %s9008_s3, %s6568_s30  ;;  %s7232_s15 = scalar_lea.hbm %s9008_s3, 4096 }
  0x50   : > { %s354_s12 = sshll.u32 %s353_s17, 4  ;;  %s355_s12 = int_to_ptr.hbm [resolvable:$true] %s354_s12 }
  0x51   : > { %s7225_s6 = sshra.s32 %s355_s12, 4  ;;  %s7226_s6 = int_to_ptr.hbm [resolvable:$true] %s7225_s6 }
  0x52   : > { %s7227_s9 = scalar_lea.hbm %s7226_s6, 1024  ;;  %p7233_p6 = scmp.lt.s32.totalorder %s7226_s6, %s9008_s3 }
  0x53   : > { %p7228_p2 = scmp.ne.s32.totalorder %s7226_s6, %s7227_s9  ;;  %p7234_p9 = scmp.lt.s32.totalorder %s7232_s15, %s7227_s9 }
  0x55   : > { %p7230_p3 = pnand %p7228_p2, %p7519_p10  ;;  %p7235_p11 = por %p7234_p9, %p7233_p6 }
  0x57   : > { %p7231_p4 = pneg %p7230_p3 }
  0x59   : > { %p7236_p12 = pnand %p7235_p11, %p7231_p4 }
  0x5b   : > { %7239 = shalt.err (!%p7236_p12)
}
  0x5c   : > { %s7395_s1 = smov 128   ;;  %s7396_s16 = smov 8  }
  0x5d   : > { %7039 = dma.hbm_to_vmem [thread:$0]  (!%p7501_p8), %s355_s12, 16384, %s357_s23, %s344_s29, %s7395_s1, %s7395_s1, %s7396_s16  }
  0x5e   : > { %s6571_s17 = sshll.u32 %s7391_s20, 9  ;;  %s392_s9 = scalar_lea.vmem [#allocation6], %s4524_s25 }
  0x5f   : > { %s398_s6 = scalar_lea.hbm %s8964_s5, %s6571_s17  ;;  %s401_s11 = sshll.u32 %s392_s9, 4  ;;  %s402_s11 = int_to_ptr.vmem [resolvable:$true] %s401_s11 }
  0x60   : > { %s399_s15 = sshll.u32 %s398_s6, 4  ;;  %s4531_s13 = sshll.u32 %s7499_s27, 11  ;;  %s400_s15 = int_to_ptr.hbm [resolvable:$true] %s399_s15 }
  0x61   : > { %s7255_s30 = sshra.s32 %s400_s15, 4  ;;  %s7262_s12 = scalar_lea.hbm %s8964_s5, 2048  ;;  %s7256_s30 = int_to_ptr.hbm [resolvable:$true] %s7255_s30 }
  0x62   : > { %s7257_s3 = scalar_lea.hbm %s7256_s30, 512  ;;  %p7263_p2 = scmp.lt.s32.totalorder %s7256_s30, %s8964_s5 }
  0x63   : > { %p7258_p13 = scmp.ne.s32.totalorder %s7256_s30, %s7257_s3  ;;  %p7264_p3 = scmp.lt.s32.totalorder %s7262_s12, %s7257_s3 }
  0x65   : > { %p7260_p0 = pnand %p7258_p13, %p7519_p10  ;;  %p7265_p4 = por %p7264_p3, %p7263_p2 }
  0x67   : > { %p7261_p1 = pneg %p7260_p0 }
  0x69   : > { %p7266_p6 = pnand %p7265_p4, %p7261_p1 }
  0x6b   : > { %7269 = shalt.err (!%p7266_p6)
}
  0x6c   : > { %7045 = dma.hbm_to_vmem [thread:$0]  (!%p7501_p8), %s400_s15, 8192, %s402_s11, %s7515_s24, %s7395_s1, %s7395_s1, %s7396_s16  }
  0x6d   : > { %s6574_s25 = sshll.u32 %s7391_s20, 11  ;;  %s437_s6 = scalar_lea.vmem [#allocation9], %s4531_s13 }
  0x6e   : > { %s443_s4 = scalar_lea.hbm %s8966_s7, %s6574_s25  ;;  %s446_s9 = sshll.u32 %s437_s6, 4  ;;  %s447_s9 = int_to_ptr.vmem [resolvable:$true] %s446_s9 }
  0x6f   : > { %s444_s3 = sshll.u32 %s443_s4, 4  ;;  %s7292_s24 = scalar_lea.hbm %s8966_s7, 8192  ;;  %s445_s3 = int_to_ptr.hbm [resolvable:$true] %s444_s3 }
  0x70   : > { %s7285_s30 = sshra.s32 %s445_s3, 4  ;;  %s7286_s30 = int_to_ptr.hbm [resolvable:$true] %s7285_s30 }
  0x71   : > { %s7287_s23 = scalar_lea.hbm %s7286_s30, 2048  ;;  %p7293_p13 = scmp.lt.s32.totalorder %s7286_s30, %s8966_s7 }
  0x72   : > { %p7288_p9 = scmp.ne.s32.totalorder %s7286_s30, %s7287_s23  ;;  %p7294_p0 = scmp.lt.s32.totalorder %s7292_s24, %s7287_s23 }
  0x74   : > { %p7290_p11 = pnand %p7288_p9, %p7519_p10  ;;  %p7295_p1 = por %p7294_p0, %p7293_p13 }
  0x76   : > { %p7291_p12 = pneg %p7290_p11 }
  0x78   : > { %p7296_p2 = pnand %p7295_p1, %p7291_p12 }
  0x7a   : > { %7299 = shalt.err (!%p7296_p2)
}
  0x7b   : > { %s7397_s13 = smov 512   ;;  %s4535_s14 = sshll.u32 %s7499_s27, 4 }
  0x7c   : > { %7051 = dma.hbm_to_vmem [thread:$0]  (!%p7501_p8), %s445_s3, 32768, %s447_s9, %s7549_s10, %s7397_s13, %s7397_s13, %s9007_s2  }
  0x7d   : > { %s6575_s25 = sshll.u32 %s7391_s20, 4  ;;  %s460_s6 = scalar_lea.vmem [#allocation10], %s4535_s14 }
  0x7e   : > { %s465_s4 = scalar_lea.hbm %s8967_s8, %s6575_s25  ;;  %s468_s30 = sshll.u32 %s460_s6, 4  ;;  %s469_s30 = int_to_ptr.vmem [resolvable:$true] %s468_s30 }
  0x7f   : > { %s466_s23 = sshll.u32 %s465_s4, 4  ;;  %s457_s12 = scalar_lea.sflag [#allocation11], %s7499_s27  ;;  %s467_s23 = int_to_ptr.hbm [resolvable:$true] %s466_s23 }
  0x80   : > { %s7315_s29 = sshra.s32 %s467_s23, 4  ;;  %s7322_s20 = scalar_lea.hbm %s8967_s8, 64  ;;  %s7316_s29 = int_to_ptr.hbm [resolvable:$true] %s7315_s29 }
  0x81   : > { %s7317_s24 = scalar_lea.hbm %s7316_s29, 16  ;;  %p7323_p9 = scmp.lt.s32.totalorder %s7316_s29, %s8967_s8 }
  0x82   : > { %p7318_p3 = scmp.ne.s32.totalorder %s7316_s29, %s7317_s24  ;;  %p7324_p11 = scmp.lt.s32.totalorder %s7322_s20, %s7317_s24 }
  0x84   : > { %p7320_p4 = pnand %p7318_p3, %p7519_p10  ;;  %p7325_p12 = por %p7324_p11, %p7323_p9 }
  0x86   : > { %p7321_p6 = pneg %p7320_p4 }
  0x88   : > { %p7326_p13 = pnand %p7325_p12, %p7321_p6 }
  0x8a   : > { %7329 = shalt.err (!%p7326_p13)
}
  0x8b   : > { %7054 = dma.hbm_to_vmem [thread:$0]  (!%p7501_p8), %s467_s23, 256, %s469_s30, %s457_s12, %s7395_s1, %s7395_s1, %s7396_s16  }
  0x8c   : > { %480 = sbr.rel (%p7538_p5) target bundleno = 1348 (0x544), region = 56  ;;  %s482_s22 = sand.u32 (!%p7538_p5), 1, %s7383_s18  }
  0x8d   : > { %s4539_s27 = sshll.u32 (!%p7538_p5), %s482_s22, 10  ;;  %s483_s11 = scalar_lea.sflag (!%p7538_p5), [#allocation3], %s482_s22 }
  0x8e   : > { %s7641_s15 = scalar_lea.vmem (!%p7538_p5), [#allocation2], %s4539_s27 }
  0x91   : > { %7362 = dma.done.wait (%p7494_p7), %s483_s11, 16384  }
  0x92   : > { %7364 = vsyncadd (%p7494_p7), %s483_s11, 4294950912  ;;  %s492_s28 = sand.u32 1, %s7477_s21   ;;  %s4540_s13 = sshll.u32 %s482_s22, 2 }
  0x93   : > { %s493_s1 = scalar_lea.sflag [#allocation5], %s492_s28  ;;  %s7648_s16 = scalar_lea.vmem [#allocation4], %s4540_s13 }
  0x94   : > { %7366 = dma.done.wait (%p7494_p7), %s493_s1, 8256  }
  0x95   : > { %7368 = vsyncadd (%p7494_p7), %s493_s1, 4294959040  ;;  %s4541_s19 = sshll.u32 %s482_s22, 9  ;;  %s513_s25 = scalar_lea.sflag [#allocation8], %s492_s28 }
  0x96   : > { %s7654_s14 = scalar_lea.vmem [#allocation6], %s4541_s19  ;;  %s7656_s0 = scalar_lea.vmem [#allocation7], %s4540_s13 }
  0x97   : > { %7370 = dma.done.wait (%p7494_p7), %s513_s25, 32832  }
  0x98   : > { %7372 = vsyncadd (%p7494_p7), %s513_s25, 4294934464  ;;  %s4543_s17 = sshll.u32 %s482_s22, 11  ;;  %s4544_s4 = sshll.u32 %s482_s22, 4 }
  0x99   : > { %s7662_s6 = scalar_lea.vmem [#allocation9], %s4543_s17  ;;  %s533_s30 = scalar_lea.sflag [#allocation11], %s482_s22 }
  0x9a   : > { %s7664_s23 = scalar_lea.vmem [#allocation10], %s4544_s4 }
  0x9b   : > { %7374 = dma.done.wait (%p7494_p7), %s533_s30, 256  }
  0x9c   : > { %7376 = vsyncadd (%p7494_p7), %s533_s30, 4294967040  ;;  %p4545_p8 = scmp.ne.s32.totalorder %s7477_s21, 0 }
  0x9d   : > { %s9009_s24 = sld [smem:[#allocation19_spill]] (!%p4545_p8) }
  0x9e   : > { %605 = sbr.rel (%p4545_p8) target bundleno = 182 (0xb6), region = 84  ;;  %s9010_s27 = sld [smem:[#allocation25_spill]] (!%p4545_p8) }
  0x9f   : > { %s9011_s28 = sld [smem:[#allocation20_spill]] (!%p4545_p8) }
  0xa0   : > { %s9012_s2 = sld [smem:[#allocation26_spill]] (!%p4545_p8) }
  0xa1   : > { %s9013_s26 = sld [smem:[#allocation21_spill]] (!%p4545_p8) }
  0xa2   : > { %s9014_s4 = sld [smem:[#allocation27_spill]] (!%p4545_p8) }
  0xa3   : > { %v606_v0 = vld [vmem:[%s9009_s24] sm:$0xff]  ;;  %v607_v1 = vld [vmem:[%s9009_s24 + $0x8] sm:$0xff]  ;;  %v608_v2 = vld [vmem:[%s9009_s24 + $0x10] sm:$0xff]  ;;  %vm640_vm0 = vcmask 7168  }
  0xa4   : > { %614 = vst [vmem:[%s9010_s27] sm:$0xff] %v606_v0  ;;  %v609_v3 = vld [vmem:[%s9009_s24 + $0x18] sm:$0xff]  ;;  %v610_v4 = vld [vmem:[%s9009_s24 + $0x20] sm:$0xff]  ;;  %v611_v5 = vld [vmem:[%s9009_s24 + $0x28] sm:$0xff] }
  0xa5   : > { %615 = vst [vmem:[%s9010_s27 + $0x8] sm:$0xff] %v607_v1  ;;  %v612_v6 = vld [vmem:[%s9009_s24 + $0x30] sm:$0xff]  ;;  %v613_v7 = vld [vmem:[%s9009_s24 + $0x38] sm:$0xff]  ;;  %v622_v8 = vld [vmem:[%s9011_s28] sm:$0xff] }
  0xa6   : > { %616 = vst [vmem:[%s9010_s27 + $0x10] sm:$0xff] %v608_v2  ;;  %v623_v9 = vld [vmem:[%s9011_s28 + $0x8] sm:$0xff]  ;;  %v624_v10 = vld [vmem:[%s9011_s28 + $0x10] sm:$0xff]  ;;  %v625_v11 = vld [vmem:[%s9011_s28 + $0x18] sm:$0xff] }
  0xa7   : > { %617 = vst [vmem:[%s9010_s27 + $0x18] sm:$0xff] %v609_v3  ;;  %v626_v12 = vld [vmem:[%s9011_s28 + $0x20] sm:$0xff]  ;;  %v627_v13 = vld [vmem:[%s9011_s28 + $0x28] sm:$0xff]  ;;  %v628_v14 = vld [vmem:[%s9011_s28 + $0x30] sm:$0xff] }
  0xa8   : > { %618 = vst [vmem:[%s9010_s27 + $0x20] sm:$0xff] %v610_v4  ;;  %v629_v15 = vld [vmem:[%s9011_s28 + $0x38] sm:$0xff]  ;;  %v638_v16 = vld [vmem:[%s9013_s26] sm:$0xff]  ;;  %v639_v17 = vld [vmem:[%s9013_s26 + $0x8] sm:$0xff] }
  0xa9   : > { %619 = vst [vmem:[%s9010_s27 + $0x28] sm:$0xff] %v611_v5 }
  0xaa   : > { %620 = vst [vmem:[%s9010_s27 + $0x30] sm:$0xff] %v612_v6 }
  0xab   : > { %621 = vst [vmem:[%s9010_s27 + $0x38] sm:$0xff] %v613_v7 }
  0xac   : > { %630 = vst [vmem:[%s9012_s2] sm:$0xff] %v622_v8 }
  0xad   : > { %631 = vst [vmem:[%s9012_s2 + $0x8] sm:$0xff] %v623_v9 }
  0xae   : > { %632 = vst [vmem:[%s9012_s2 + $0x10] sm:$0xff] %v624_v10 }
  0xaf   : > { %633 = vst [vmem:[%s9012_s2 + $0x18] sm:$0xff] %v625_v11 }
  0xb0   : > { %634 = vst [vmem:[%s9012_s2 + $0x20] sm:$0xff] %v626_v12 }
  0xb1   : > { %635 = vst [vmem:[%s9012_s2 + $0x28] sm:$0xff] %v627_v13 }
  0xb2   : > { %636 = vst [vmem:[%s9012_s2 + $0x30] sm:$0xff] %v628_v14 }
  0xb3   : > { %637 = vst [vmem:[%s9012_s2 + $0x38] sm:$0xff] %v629_v15 }
  0xb4   : > { %641 = vst.msk [vmem:[%s9014_s4] sm:$0xff] %vm640_vm0, %v638_v16 }
  0xb5   : > { %642 = vst.msk [vmem:[%s9014_s4 + $0x8] sm:$0xff] %vm640_vm0, %v639_v17 }
  0xb6 PF: > { %v4604_v18 = vld [vmem:[%s7641_s15 + $0x70] sm:$0xf]  ;;  %v6591_v19 = vld [vmem:[%s7641_s15 + $0x74] sm:$0xf0]  ;;  %v4596_v29 = vld [vmem:[%s7641_s15 + $0x60] sm:$0xf] }
  0xb7   : > { %v4668_v20 = vld [vmem:[%s7641_s15 + $0xf0] sm:$0xf]  ;;  %v4605_v21 = vor.u32 %v6591_v19, %v4604_v18  ;;  %v6607_v22 = vld [vmem:[%s7641_s15 + $0xf4] sm:$0xf0]  ;;  %v6589_v31 = vld [vmem:[%s7641_s15 + $0x64] sm:$0xf0] }
  0xb8   : > { %v4732_v23 = vld [vmem:[%s7641_s15 + $0x170] sm:$0xf]  ;;  %v6623_v24 = vld [vmem:[%s7641_s15 + $0x174] sm:$0xf0]  ;;  %v4669_v25 = vor.u32 %v6607_v22, %v4668_v20  ;;  %v4660_v32 = vld [vmem:[%s7641_s15 + $0xe0] sm:$0xf]  ;;  %v4597_v34 = vor.u32 %v6589_v31, %v4596_v29 }
  0xb9   : > { %v4733_v26 = vor.u32 %v6623_v24, %v4732_v23  ;;  %v4796_v27 = vld [vmem:[%s7641_s15 + $0x1f0] sm:$0xf]  ;;  %v6639_v28 = vld [vmem:[%s7641_s15 + $0x1f4] sm:$0xf0]  ;;  %1053 = vmatpush.bf16.msra.mxu0 %v4605_v21  ;;  %v6605_v33 = vld [vmem:[%s7641_s15 + $0xe4] sm:$0xf0] }
  0xba   : > { %v4797_v30 = vor.u32 %v6639_v28, %v4796_v27  ;;  %1067 = vmatpush.bf16.msra.mxu1 %v4669_v25  ;;  %v4661_v35 = vor.u32 %v6605_v33, %v4660_v32  ;;  %v4724_v36 = vld [vmem:[%s7641_s15 + $0x160] sm:$0xf]  ;;  %v6621_v37 = vld [vmem:[%s7641_s15 + $0x164] sm:$0xf0]  ;;  %v4588_v41 = vld [vmem:[%s7641_s15 + $0x50] sm:$0xf] }
  0xbb   : > { %1081 = vmatpush.bf16.msra.mxu2 %v4733_v26  ;;  %v4788_v38 = vld [vmem:[%s7641_s15 + $0x1e0] sm:$0xf]  ;;  %v4725_v39 = vor.u32 %v6621_v37, %v4724_v36  ;;  %v6637_v40 = vld [vmem:[%s7641_s15 + $0x1e4] sm:$0xf0]  ;;  %v6587_v42 = vld [vmem:[%s7641_s15 + $0x54] sm:$0xf0] }
  0xbc   : > { %1095 = vmatpush.bf16.msra.mxu3 %v4797_v30  ;;  %v4789_v43 = vor.u32 %v6637_v40, %v4788_v38  ;;  %v4652_v44 = vld [vmem:[%s7641_s15 + $0xd0] sm:$0xf]  ;;  %v6603_v45 = vld [vmem:[%s7641_s15 + $0xd4] sm:$0xf0]  ;;  %v4589_v47 = vor.u32 %v6587_v42, %v4588_v41  ;;  %v4580_v53 = vld [vmem:[%s7641_s15 + $0x40] sm:$0xf] }
  0xbd   : > { %v4716_v46 = vld [vmem:[%s7641_s15 + $0x150] sm:$0xf]  ;;  %1054 = vmatpush.bf16.msra.mxu0 %v4597_v34  ;;  %v6619_v48 = vld [vmem:[%s7641_s15 + $0x154] sm:$0xf0]  ;;  %v4653_v51 = vor.u32 %v6603_v45, %v4652_v44  ;;  %v6585_v54 = vld [vmem:[%s7641_s15 + $0x44] sm:$0xf0] }
  0xbe   : > { %v4780_v49 = vld [vmem:[%s7641_s15 + $0x1d0] sm:$0xf]  ;;  %v6635_v50 = vld [vmem:[%s7641_s15 + $0x1d4] sm:$0xf0]  ;;  %1068 = vmatpush.bf16.msra.mxu1 %v4661_v35  ;;  %v4717_v52 = vor.u32 %v6619_v48, %v4716_v46  ;;  %v4644_v55 = vld [vmem:[%s7641_s15 + $0xc0] sm:$0xf]  ;;  %v4581_v62 = vor.u32 %v6585_v54, %v4580_v53 }
  0xbf   : > { %1082 = vmatpush.bf16.msra.mxu2 %v4725_v39  ;;  %v4781_v56 = vor.u32 %v6635_v50, %v4780_v49  ;;  %v6601_v57 = vld [vmem:[%s7641_s15 + $0xc4] sm:$0xf0]  ;;  %v4708_v58 = vld [vmem:[%s7641_s15 + $0x140] sm:$0xf]  ;;  %v4572_v1 = vld [vmem:[%s7641_s15 + $0x30] sm:$0xf] }
  0xc0   : > { %1096 = vmatpush.bf16.msra.mxu3 %v4789_v43  ;;  %v6617_v59 = vld [vmem:[%s7641_s15 + $0x144] sm:$0xf0]  ;;  %v4772_v60 = vld [vmem:[%s7641_s15 + $0x1c0] sm:$0xf]  ;;  %v4645_v63 = vor.u32 %v6601_v57, %v4644_v55  ;;  %v6583_v2 = vld [vmem:[%s7641_s15 + $0x34] sm:$0xf0] }
  0xc1   : > { %v6633_v61 = vld [vmem:[%s7641_s15 + $0x1c4] sm:$0xf0]  ;;  %1055 = vmatpush.bf16.msra.mxu0 %v4589_v47  ;;  %v4709_v0 = vor.u32 %v6617_v59, %v4708_v58  ;;  %v4636_v3 = vld [vmem:[%s7641_s15 + $0xb0] sm:$0xf]  ;;  %v6599_v5 = vld [vmem:[%s7641_s15 + $0xb4] sm:$0xf0]  ;;  %v4573_v10 = vor.u32 %v6583_v2, %v4572_v1 }
  0xc2   : > { %1069 = vmatpush.bf16.msra.mxu1 %v4653_v51  ;;  %v4773_v4 = vor.u32 %v6633_v61, %v4772_v60  ;;  %v4700_v6 = vld [vmem:[%s7641_s15 + $0x130] sm:$0xf]  ;;  %v6615_v7 = vld [vmem:[%s7641_s15 + $0x134] sm:$0xf0]  ;;  %v4637_v11 = vor.u32 %v6599_v5, %v4636_v3  ;;  %v4564_v13 = vld [vmem:[%s7641_s15 + $0x20] sm:$0xf] }
  0xc3   : > { %1083 = vmatpush.bf16.msra.mxu2 %v4717_v52  ;;  %v4764_v8 = vld [vmem:[%s7641_s15 + $0x1b0] sm:$0xf]  ;;  %v6631_v9 = vld [vmem:[%s7641_s15 + $0x1b4] sm:$0xf0]  ;;  %v4701_v12 = vor.u32 %v6615_v7, %v4700_v6  ;;  %v6581_v14 = vld [vmem:[%s7641_s15 + $0x24] sm:$0xf0] }
  0xc4   : > { %1097 = vmatpush.bf16.msra.mxu3 %v4781_v56  ;;  %v4628_v15 = vld [vmem:[%s7641_s15 + $0xa0] sm:$0xf]  ;;  %v4765_v16 = vor.u32 %v6631_v9, %v4764_v8  ;;  %v6597_v17 = vld [vmem:[%s7641_s15 + $0xa4] sm:$0xf0]  ;;  %v4565_v22 = vor.u32 %v6581_v14, %v4564_v13  ;;  %v4556_v23 = vld [vmem:[%s7641_s15 + $0x10] sm:$0xf] }
  0xc5   : > { %1056 = vmatpush.bf16.msra.mxu0 %v4581_v62  ;;  %v4692_v18 = vld [vmem:[%s7641_s15 + $0x120] sm:$0xf]  ;;  %v6613_v19 = vld [vmem:[%s7641_s15 + $0x124] sm:$0xf0]  ;;  %v4629_v24 = vor.u32 %v6597_v17, %v4628_v15  ;;  %v6579_v26 = vld [vmem:[%s7641_s15 + $0x14] sm:$0xf0] }
  0xc6   : > { %1070 = vmatpush.bf16.msra.mxu1 %v4645_v63  ;;  %v4756_v20 = vld [vmem:[%s7641_s15 + $0x1a0] sm:$0xf]  ;;  %v6629_v21 = vld [vmem:[%s7641_s15 + $0x1a4] sm:$0xf0]  ;;  %v4693_v25 = vor.u32 %v6613_v19, %v4692_v18  ;;  %v4620_v27 = vld [vmem:[%s7641_s15 + $0x90] sm:$0xf]  ;;  %v4557_v36 = vor.u32 %v6579_v26, %v4556_v23 }
  0xc7   : > { %1084 = vmatpush.bf16.msra.mxu2 %v4709_v0  ;;  %v6595_v28 = vld [vmem:[%s7641_s15 + $0x94] sm:$0xf0]  ;;  %v4757_v29 = vor.u32 %v6629_v21, %v4756_v20  ;;  %v4684_v30 = vld [vmem:[%s7641_s15 + $0x110] sm:$0xf]  ;;  %v4548_v34 = vld [vmem:[%s7641_s15] sm:$0xf] }
  0xc8   : > { %1098 = vmatpush.bf16.msra.mxu3 %v4773_v4  ;;  %v6611_v31 = vld [vmem:[%s7641_s15 + $0x114] sm:$0xf0]  ;;  %v4748_v32 = vld [vmem:[%s7641_s15 + $0x190] sm:$0xf]  ;;  %v6577_v35 = vld [vmem:[%s7641_s15 + $0x4] sm:$0xf0]  ;;  %v4621_v41 = vor.u32 %v6595_v28, %v4620_v27 }
  0xc9   : > { %1057 = vmatpush.bf16.msra.mxu0 %v4573_v10  ;;  %v6627_v33 = vld [vmem:[%s7641_s15 + $0x194] sm:$0xf0]  ;;  %v4612_v37 = vld [vmem:[%s7641_s15 + $0x80] sm:$0xf]  ;;  %v6593_v38 = vld [vmem:[%s7641_s15 + $0x84] sm:$0xf0]  ;;  %v4685_v42 = vor.u32 %v6611_v31, %v4684_v30  ;;  %v4549_v53 = vor.u32 %v6577_v35, %v4548_v34 }
  0xca   : > { %1071 = vmatpush.bf16.msra.mxu1 %v4637_v11  ;;  %v4676_v39 = vld [vmem:[%s7641_s15 + $0x100] sm:$0xf]  ;;  %v6609_v40 = vld [vmem:[%s7641_s15 + $0x104] sm:$0xf0]  ;;  %v6590_v45 = vld [vmem:[%s7641_s15 + $0x74] sm:$0xf]  ;;  %v4749_v46 = vor.u32 %v6627_v33, %v4748_v32  ;;  %v4613_v57 = vor.u32 %v6593_v38, %v4612_v37 }
  0xcb   : > { %1085 = vmatpush.bf16.msra.mxu2 %v4701_v12  ;;  %v4740_v43 = vld [vmem:[%s7641_s15 + $0x180] sm:$0xf]  ;;  %v6625_v44 = vld [vmem:[%s7641_s15 + $0x184] sm:$0xf0]  ;;  %v4606_v47 = vld [vmem:[%s7641_s15 + $0x78] sm:$0xf0]  ;;  %v4677_v58 = vor.u32 %v6609_v40, %v4676_v39 }
  0xcc   : > { %1099 = vmatpush.bf16.msra.mxu3 %v4765_v16  ;;  %v6606_v48 = vld [vmem:[%s7641_s15 + $0xf4] sm:$0xf]  ;;  %v4670_v49 = vld [vmem:[%s7641_s15 + $0xf8] sm:$0xf0]  ;;  %s9015_s10 = sld [smem:[#allocation25_spill]]  ;;  %v4741_v62 = vor.u32 %v6625_v44, %v4740_v43  ;;  %v4609_v63 = vor.u32 %v6590_v45, %v4606_v47  ;;  %vm4351_vm1 = vcmask 7168  }
  0xcd   : > { %1058 = vmatpush.bf16.msra.mxu0 %v4565_v22  ;;  %v6622_v50 = vld [vmem:[%s7641_s15 + $0x174] sm:$0xf]  ;;  %v4734_v51 = vld [vmem:[%s7641_s15 + $0x178] sm:$0xf0]  ;;  %v6588_v1 = vld [vmem:[%s7641_s15 + $0x64] sm:$0xf]  ;;  %v4673_v3 = vor.u32 %v6606_v48, %v4670_v49 }
  0xce   : > { %1072 = vmatpush.bf16.msra.mxu1 %v4629_v24  ;;  %v6638_v52 = vld [vmem:[%s7641_s15 + $0x1f4] sm:$0xf]  ;;  %v4798_v54 = vld [vmem:[%s7641_s15 + $0x1f8] sm:$0xf0]  ;;  %v4598_v2 = vld [vmem:[%s7641_s15 + $0x68] sm:$0xf0]  ;;  %v4737_v4 = vor.u32 %v6622_v50, %v4734_v51 }
  0xcf   : > { %1086 = vmatpush.bf16.msra.mxu2 %v4693_v25  ;;  %v6604_v5 = vld [vmem:[%s7641_s15 + $0xe4] sm:$0xf]  ;;  %v4801_v8 = vor.u32 %v6638_v52, %v4798_v54  ;;  %v4662_v10 = vld [vmem:[%s7641_s15 + $0xe8] sm:$0xf0]  ;;  %v4601_v17 = vor.u32 %v6588_v1, %v4598_v2  ;;  %v6586_v21 = vld [vmem:[%s7641_s15 + $0x54] sm:$0xf] }
  0xd0   : > { %1100 = vmatpush.bf16.msra.mxu3 %v4757_v29  ;;  %v6620_v11 = vld [vmem:[%s7641_s15 + $0x164] sm:$0xf]  ;;  %v4726_v12 = vld [vmem:[%s7641_s15 + $0x168] sm:$0xf0]  ;;  %v4665_v19 = vor.u32 %v6604_v5, %v4662_v10  ;;  %v4590_v22 = vld [vmem:[%s7641_s15 + $0x58] sm:$0xf0] }
  0xd1   : > { %1059 = vmatpush.bf16.msra.mxu0 %v4557_v36  ;;  %v6636_v15 = vld [vmem:[%s7641_s15 + $0x1e4] sm:$0xf]  ;;  %v4790_v16 = vld [vmem:[%s7641_s15 + $0x1e8] sm:$0xf0]  ;;  %v4729_v20 = vor.u32 %v6620_v11, %v4726_v12  ;;  %v6602_v23 = vld [vmem:[%s7641_s15 + $0xd4] sm:$0xf]  ;;  %v4593_v30 = vor.u32 %v6586_v21, %v4590_v22 }
  0xd2   : > { %v645_v55 = vld [vmem:[%s9015_s10 + $0x10] sm:$0xff]  ;;  %1073 = vmatpush.bf16.msra.mxu1 %v4621_v41  ;;  %v643_v59 = vld [vmem:[%s9015_s10] sm:$0xff]  ;;  %v646_v61 = vld [vmem:[%s9015_s10 + $0x18] sm:$0xff]  ;;  %v4793_v24 = vor.u32 %v6636_v15, %v4790_v16  ;;  %s9016_s29 = sld [smem:[#allocation26_spill]] }
  0xd3   : > { %v649_v56 = vld [vmem:[%s9015_s10 + $0x30] sm:$0xff]  ;;  %1087 = vmatpush.bf16.msra.mxu2 %v4685_v42  ;;  %v647_v60 = vld [vmem:[%s9015_s10 + $0x20] sm:$0xff]  ;;  %v650_v0 = vld [vmem:[%s9015_s10 + $0x38] sm:$0xff] }
  0xd4   : > { %1101 = vmatpush.bf16.msra.mxu3 %v4749_v46  ;;  %v644_v6 = vld [vmem:[%s9015_s10 + $0x8] sm:$0xff]  ;;  %v7878_v9 = vpack.c.bf16 %v649_v56, %v645_v55  ;;  %v7883_v13 = vpack.c.bf16 %v647_v60, %v643_v59  ;;  %v7885_v14 = vpack.c.bf16 %v650_v0, %v646_v61  ;;  %v4654_v25 = vld [vmem:[%s7641_s15 + $0xd8] sm:$0xf0]  ;;  %v6618_v26 = vld [vmem:[%s7641_s15 + $0x154] sm:$0xf] }
  0xd5   : > { %v648_v7 = vld [vmem:[%s9015_s10 + $0x28] sm:$0xff]  ;;  %1060 = vmatpush.bf16.msra.mxu0 %v4549_v53  ;;  %v4718_v27 = vld [vmem:[%s7641_s15 + $0x158] sm:$0xf0]  ;;  %v6634_v28 = vld [vmem:[%s7641_s15 + $0x1d4] sm:$0xf]  ;;  %v4657_v31 = vor.u32 %v6602_v23, %v4654_v25 }
  0xd6   : > { %1074 = vmatpush.bf16.msra.mxu1 %v4613_v57  ;;  %v7889_v18 = vpack.c.bf16 %v648_v7, %v644_v6  ;;  %v4782_v29 = vld [vmem:[%s7641_s15 + $0x1d8] sm:$0xf0]  ;;  %v4721_v32 = vor.u32 %v6618_v26, %v4718_v27  ;;  %v6584_v33 = vld [vmem:[%s7641_s15 + $0x44] sm:$0xf]  ;;  %v4582_v34 = vld [vmem:[%s7641_s15 + $0x48] sm:$0xf0] }
  0xd7   : > { %1088 = vmatpush.bf16.msra.mxu2 %v4677_v58  ;;  %v6600_v35 = vld [vmem:[%s7641_s15 + $0xc4] sm:$0xf]  ;;  %v4785_v36 = vor.u32 %v6634_v28, %v4782_v29  ;;  %v4646_v37 = vld [vmem:[%s7641_s15 + $0xc8] sm:$0xf0]  ;;  %v4585_v42 = vor.u32 %v6584_v33, %v4582_v34  ;;  %v6582_v45 = vld [vmem:[%s7641_s15 + $0x34] sm:$0xf] }
  0xd8   : > { %1102 = vmatpush.bf16.msra.mxu3 %v4741_v62  ;;  %1061 = vmatmul.bf16.vlgmr.msra.gmra.mxu0 %v7883_v13  ;;  %v6616_v38 = vld [vmem:[%s7641_s15 + $0x144] sm:$0xf]  ;;  %v4710_v39 = vld [vmem:[%s7641_s15 + $0x148] sm:$0xf0]  ;;  %v4649_v43 = vor.u32 %v6600_v35, %v4646_v37  ;;  %v4574_v46 = vld [vmem:[%s7641_s15 + $0x38] sm:$0xf0] }
  0xd9   : > { %1109 = vmatpush.bf16.msrb.mxu0 %v4609_v63  ;;  %1075 = vmatmul.bf16.vlgmr.msra.gmra.mxu1 %v7889_v18  ;;  %v6632_v40 = vld [vmem:[%s7641_s15 + $0x1c4] sm:$0xf]  ;;  %v4774_v41 = vld [vmem:[%s7641_s15 + $0x1c8] sm:$0xf0]  ;;  %v4713_v44 = vor.u32 %v6616_v38, %v4710_v39  ;;  %v6598_v47 = vld [vmem:[%s7641_s15 + $0xb4] sm:$0xf]  ;;  %v4577_v54 = vor.u32 %v6582_v45, %v4574_v46 }
  0xda   : > { %1123 = vmatpush.bf16.msrb.mxu1 %v4673_v3  ;;  %1089 = vmatmul.bf16.vlgmr.msra.gmra.mxu2 %v7878_v9  ;;  %v4777_v48 = vor.u32 %v6632_v40, %v4774_v41  ;;  %v4638_v49 = vld [vmem:[%s7641_s15 + $0xb8] sm:$0xf0]  ;;  %v6614_v50 = vld [vmem:[%s7641_s15 + $0x134] sm:$0xf]  ;;  %v6580_v57 = vld [vmem:[%s7641_s15 + $0x24] sm:$0xf] }
  0xdb   : > { %1137 = vmatpush.bf16.msrb.mxu2 %v4737_v4  ;;  %1103 = vmatmul.bf16.vlgmr.msra.gmra.mxu3 %v7885_v14  ;;  %v4702_v51 = vld [vmem:[%s7641_s15 + $0x138] sm:$0xf0]  ;;  %v6630_v52 = vld [vmem:[%s7641_s15 + $0x1b4] sm:$0xf]  ;;  %v4641_v55 = vor.u32 %v6598_v47, %v4638_v49  ;;  %v4566_v58 = vld [vmem:[%s7641_s15 + $0x28] sm:$0xf0] }
  0xdc   : > { %1151 = vmatpush.bf16.msrb.mxu3 %v4801_v8  ;;  %v4766_v53 = vld [vmem:[%s7641_s15 + $0x1b8] sm:$0xf0]  ;;  %v4705_v56 = vor.u32 %v6614_v50, %v4702_v51  ;;  %v6596_v59 = vld [vmem:[%s7641_s15 + $0xa4] sm:$0xf]  ;;  %v4630_v61 = vld [vmem:[%s7641_s15 + $0xa8] sm:$0xf0]  ;;  %v4569_v2 = vor.u32 %v6580_v57, %v4566_v58 }
  0xdd   : > { %1110 = vmatpush.bf16.msrb.mxu0 %v4601_v17  ;;  %v4769_v60 = vor.u32 %v6630_v52, %v4766_v53  ;;  %v6612_v62 = vld [vmem:[%s7641_s15 + $0x124] sm:$0xf]  ;;  %v4694_v63 = vld [vmem:[%s7641_s15 + $0x128] sm:$0xf0]  ;;  %v4633_v3 = vor.u32 %v6596_v59, %v4630_v61  ;;  %v6578_v5 = vld [vmem:[%s7641_s15 + $0x14] sm:$0xf] }
  0xde   : > { %1124 = vmatpush.bf16.msrb.mxu1 %v4665_v19  ;;  %v6628_v0 = vld [vmem:[%s7641_s15 + $0x1a4] sm:$0xf]  ;;  %v4758_v1 = vld [vmem:[%s7641_s15 + $0x1a8] sm:$0xf0]  ;;  %v4697_v4 = vor.u32 %v6612_v62, %v4694_v63  ;;  %v4558_v6 = vld [vmem:[%s7641_s15 + $0x18] sm:$0xf0] }
  0xdf   : > { %1138 = vmatpush.bf16.msrb.mxu2 %v4729_v20  ;;  %v6594_v7 = vld [vmem:[%s7641_s15 + $0x94] sm:$0xf]  ;;  %v4761_v8 = vor.u32 %v6628_v0, %v4758_v1  ;;  %v4622_v10 = vld [vmem:[%s7641_s15 + $0x98] sm:$0xf0]  ;;  %v4561_v17 = vor.u32 %v6578_v5, %v4558_v6  ;;  %v6576_v19 = vld [vmem:[%s7641_s15 + $0x4] sm:$0xf] }
  0xe0   : > { %1152 = vmatpush.bf16.msrb.mxu3 %v4793_v24  ;;  %v6610_v11 = vld [vmem:[%s7641_s15 + $0x114] sm:$0xf]  ;;  %v4686_v12 = vld [vmem:[%s7641_s15 + $0x118] sm:$0xf0]  ;;  %v4625_v20 = vor.u32 %v6594_v7, %v4622_v10  ;;  %v4550_v22 = vld [vmem:[%s7641_s15 + $0x8] sm:$0xf0] }
  0xe1   : > { %1111 = vmatpush.bf16.msrb.mxu0 %v4593_v30  ;;  %v6626_v15 = vld [vmem:[%s7641_s15 + $0x194] sm:$0xf]  ;;  %v4750_v16 = vld [vmem:[%s7641_s15 + $0x198] sm:$0xf0]  ;;  %v4689_v21 = vor.u32 %v6610_v11, %v4686_v12  ;;  %v6592_v23 = vld [vmem:[%s7641_s15 + $0x84] sm:$0xf] }
  0xe2   : > { %1125 = vmatpush.bf16.msrb.mxu1 %v4657_v31  ;;  %v4614_v24 = vld [vmem:[%s7641_s15 + $0x88] sm:$0xf0]  ;;  %v4753_v25 = vor.u32 %v6626_v15, %v4750_v16  ;;  %v6608_v26 = vld [vmem:[%s7641_s15 + $0x104] sm:$0xf]  ;;  %v4860_v30 = vld [vmem:[%s7654_s14 + $0x70] sm:$0xf] }
  0xe3   : > { %1139 = vmatpush.bf16.msrb.mxu2 %v4721_v32  ;;  %v4678_v27 = vld [vmem:[%s7641_s15 + $0x108] sm:$0xf0]  ;;  %v6624_v28 = vld [vmem:[%s7641_s15 + $0x184] sm:$0xf]  ;;  %v6655_v31 = vld [vmem:[%s7654_s14 + $0x74] sm:$0xf0]  ;;  %v4553_v32 = vor.u32 %v6576_v19, %v4550_v22  ;;  %v4617_v35 = vor.u32 %v6592_v23, %v4614_v24 }
  0xe4   : > { %1153 = vmatpush.bf16.msrb.mxu3 %v4785_v36  ;;  %v4742_v29 = vld [vmem:[%s7641_s15 + $0x188] sm:$0xf0]  ;;  %v6654_v33 = vld [vmem:[%s7654_s14 + $0x74] sm:$0xf]  ;;  %v4862_v34 = vld [vmem:[%s7654_s14 + $0x78] sm:$0xf0]  ;;  %v4681_v36 = vor.u32 %v6608_v26, %v4678_v27  ;;  %v4861_v38 = vor.u32 %v6655_v31, %v4860_v30 }
  0xe5   : > { %1112 = vmatpush.bf16.msrb.mxu0 %v4585_v42  ;;  %v4745_v37 = vor.u32 %v6624_v28, %v4742_v29  ;;  %v4865_v39 = vor.u32 %v6654_v33, %v4862_v34  ;;  %v4852_v40 = vld [vmem:[%s7654_s14 + $0x60] sm:$0xf]  ;;  %v6653_v41 = vld [vmem:[%s7654_s14 + $0x64] sm:$0xf0]  ;;  %v6652_v42 = vld [vmem:[%s7654_s14 + $0x64] sm:$0xf] }
  0xe6   : > { %1126 = vmatpush.bf16.msrb.mxu1 %v4649_v43  ;;  %v4854_v43 = vld [vmem:[%s7654_s14 + $0x68] sm:$0xf0]  ;;  %v4844_v46 = vld [vmem:[%s7654_s14 + $0x50] sm:$0xf]  ;;  %v6651_v47 = vld [vmem:[%s7654_s14 + $0x54] sm:$0xf0] }
  0xe7   : > { %1140 = vmatpush.bf16.msrb.mxu2 %v4713_v44  ;;  %v4853_v44 = vor.u32 %v6653_v41, %v4852_v40  ;;  %v4857_v45 = vor.u32 %v6652_v42, %v4854_v43  ;;  %v4846_v49 = vld [vmem:[%s7654_s14 + $0x58] sm:$0xf0]  ;;  %v4836_v51 = vld [vmem:[%s7654_s14 + $0x40] sm:$0xf]  ;;  %v6649_v52 = vld [vmem:[%s7654_s14 + $0x44] sm:$0xf0] }
  0xe8   : > { %1154 = vmatpush.bf16.msrb.mxu3 %v4777_v48  ;;  %v6650_v48 = vld [vmem:[%s7654_s14 + $0x54] sm:$0xf]  ;;  %v4838_v53 = vld [vmem:[%s7654_s14 + $0x48] sm:$0xf0]  ;;  %v4830_v58 = vld [vmem:[%s7654_s14 + $0x38] sm:$0xf0] }
  0xe9   : > { %1113 = vmatpush.bf16.msrb.mxu0 %v4577_v54  ;;  %v4849_v50 = vor.u32 %v6650_v48, %v4846_v49  ;;  %v6645_v61 = vld [vmem:[%s7654_s14 + $0x24] sm:$0xf0]  ;;  %v6644_v62 = vld [vmem:[%s7654_s14 + $0x24] sm:$0xf]  ;;  %v4822_v0 = vld [vmem:[%s7654_s14 + $0x28] sm:$0xf0] }
  0xea   : > { %1127 = vmatpush.bf16.msrb.mxu1 %v4641_v55  ;;  %v6647_v55 = vld [vmem:[%s7654_s14 + $0x34] sm:$0xf0]  ;;  %v4825_v1 = vor.u32 %v6644_v62, %v4822_v0  ;;  %v4814_v6 = vld [vmem:[%s7654_s14 + $0x18] sm:$0xf0]  ;;  %v6641_v10 = vld [vmem:[%s7654_s14 + $0x4] sm:$0xf0] }
  0xeb   : > { %1141 = vmatpush.bf16.msrb.mxu2 %v4705_v56  ;;  %v6646_v56 = vld [vmem:[%s7654_s14 + $0x34] sm:$0xf]  ;;  %v6640_v11 = vld [vmem:[%s7654_s14 + $0x4] sm:$0xf]  ;;  %v4806_v15 = vld [vmem:[%s7654_s14 + $0x8] sm:$0xf0] }
  0xec   : > { %1155 = vmatpush.bf16.msrb.mxu3 %v4769_v60  ;;  %v4833_v59 = vor.u32 %v6646_v56, %v4830_v58  ;;  %v4820_v60 = vld [vmem:[%s7654_s14 + $0x20] sm:$0xf]  ;;  %v4924_v16 = vld [vmem:[%s7654_s14 + $0xf0] sm:$0xf]  ;;  %v4809_v19 = vor.u32 %v6640_v11, %v4806_v15  ;;  %v4926_v22 = vld [vmem:[%s7654_s14 + $0xf8] sm:$0xf0] }
  0xed   : > { %1114 = vmatpush.bf16.msrb.mxu0 %v4569_v2  ;;  %v4821_v63 = vor.u32 %v6645_v61, %v4820_v60  ;;  %v4812_v2 = vld [vmem:[%s7654_s14 + $0x10] sm:$0xf]  ;;  %v4916_v24 = vld [vmem:[%s7654_s14 + $0xe0] sm:$0xf]  ;;  %v6668_v26 = vld [vmem:[%s7654_s14 + $0xe4] sm:$0xf] }
  0xee   : > { %1128 = vmatpush.bf16.msrb.mxu1 %v4633_v3  ;;  %v6643_v3 = vld [vmem:[%s7654_s14 + $0x14] sm:$0xf0]  ;;  %v4918_v28 = vld [vmem:[%s7654_s14 + $0xe8] sm:$0xf0]  ;;  %v4908_v31 = vld [vmem:[%s7654_s14 + $0xd0] sm:$0xf] }
  0xef   : > { %1142 = vmatpush.bf16.msrb.mxu2 %v4697_v4  ;;  %v6642_v4 = vld [vmem:[%s7654_s14 + $0x14] sm:$0xf]  ;;  %v4813_v5 = vor.u32 %v6643_v3, %v4812_v2  ;;  %v4921_v29 = vor.u32 %v6668_v26, %v4918_v28  ;;  %v7988_v30 = vld [vmem:[%s7648_s16] sm:$0x3]  ;;  %v6664_v40 = vld [vmem:[%s7654_s14 + $0xc4] sm:$0xf] }
  0xf0   : > { %1156 = vmatpush.bf16.msrb.mxu3 %v4761_v8  ;;  %v4817_v7 = vor.u32 %v6642_v4, %v4814_v6  ;;  %v4804_v8 = vld [vmem:[%s7654_s14] sm:$0xf]  ;;  %v6666_v33 = vld [vmem:[%s7654_s14 + $0xd4] sm:$0xf]  ;;  %v4902_v43 = vld [vmem:[%s7654_s14 + $0xc8] sm:$0xf0] }
  0xf1   : > { %1115 = vmatpush.bf16.msrb.mxu0 %v4561_v17  ;;  %v4805_v12 = vor.u32 %v6641_v10, %v4804_v8  ;;  %v6671_v17 = vld [vmem:[%s7654_s14 + $0xf4] sm:$0xf0]  ;;  %v6662_v49 = vld [vmem:[%s7654_s14 + $0xb4] sm:$0xf]  ;;  %v4886_v58 = vld [vmem:[%s7654_s14 + $0xa8] sm:$0xf0] }
  0xf2   : > { %1129 = vmatpush.bf16.msrb.mxu1 %v4625_v20  ;;  %v4925_v20 = vor.u32 %v6671_v17, %v4924_v16  ;;  %v6663_v48 = vld [vmem:[%s7654_s14 + $0xb4] sm:$0xf0]  ;;  %v4878_v4 = vld [vmem:[%s7654_s14 + $0x98] sm:$0xf0]  ;;  %v4868_v10 = vld [vmem:[%s7654_s14 + $0x80] sm:$0xf] }
  0xf3   : > { %1143 = vmatpush.bf16.msrb.mxu2 %v4689_v21  ;;  %v6670_v21 = vld [vmem:[%s7654_s14 + $0xf4] sm:$0xf]  ;;  %v6659_v0 = vld [vmem:[%s7654_s14 + $0x94] sm:$0xf0]  ;;  %v6657_v11 = vld [vmem:[%s7654_s14 + $0x84] sm:$0xf0] }
  0xf4   : > { %1157 = vmatpush.bf16.msrb.mxu3 %v4753_v25  ;;  %v4929_v23 = vor.u32 %v6670_v21, %v4926_v22  ;;  %v6669_v25 = vld [vmem:[%s7654_s14 + $0xe4] sm:$0xf0]  ;;  %v4869_v17 = vor.u32 %v6657_v11, %v4868_v10 }
  0xf5   : > { %1116 = vmatpush.bf16.msrb.mxu0 %v4553_v32  ;;  %v4917_v27 = vor.u32 %v6669_v25, %v4916_v24  ;;  %v6667_v32 = vld [vmem:[%s7654_s14 + $0xd4] sm:$0xf0]  ;;  %v6732_v24 = vld [vmem:[%s7662_s6 + $0x1dc] sm:$0xf0]  ;;  %v6728_v25 = vld [vmem:[%s7662_s6 + $0x1c4] sm:$0xf] }
  0xf6   : > { %1130 = vmatpush.bf16.msrb.mxu1 %v4617_v35  ;;  %v4909_v34 = vor.u32 %v6667_v32, %v4908_v31  ;;  %v4910_v35 = vld [vmem:[%s7654_s14 + $0xd8] sm:$0xf0]  ;;  %v5124_v28 = vld [vmem:[%s7662_s6 + $0x180] sm:$0xf]  ;;  %v6720_v32 = vld [vmem:[%s7662_s6 + $0x184] sm:$0xf] }
  0xf7   : > { %1144 = vmatpush.bf16.msrb.mxu2 %v4681_v36  ;;  %v729_v36 = vperm.slane %v7988_v30, 0 }
  0xf8   : > { %1158 = vmatpush.bf16.msrb.mxu3 %v4745_v37  ;;  %1117 = vmatmul.bf16.vlgmr.msrb.gmra.mxu0 %v7883_v13  ;;  %v4845_v13 = vor.u32 %v6651_v47, %v4844_v46  ;;  %v4913_v37 = vor.u32 %v6666_v33, %v4910_v35  ;;  %v4905_v46 = vor.u32 %v6664_v40, %v4902_v43  ;;  %v4892_v47 = vld [vmem:[%s7654_s14 + $0xb0] sm:$0xf]  ;;  %v5126_v33 = vld [vmem:[%s7662_s6 + $0x1a0] sm:$0xf0]  ;;  %v6716_v43 = vld [vmem:[%s7662_s6 + $0x15c] sm:$0xf0] }
  0xf9   : > { %1369 = vmatpush.bf16.msra.mxu0 %v4861_v38  ;;  %1131 = vmatmul.bf16.vlgmr.msrb.gmra.mxu1 %v7889_v18  ;;  %v6648_v18 = vld [vmem:[%s7654_s14 + $0x44] sm:$0xf]  ;;  %v4900_v38 = vld [vmem:[%s7654_s14 + $0xc0] sm:$0xf] }
  0xfa   : > { %1145 = vmatmul.bf16.vlgmr.msrb.gmra.mxu2 %v7878_v9  ;;  %v4837_v9 = vor.u32 %v6649_v52, %v4836_v51  ;;  %v4841_v54 = vor.u32 %v6648_v18, %v4838_v53  ;;  %1383 = vmatpush.bf16.msra.mxu1 %v4925_v20  ;;  %v4894_v51 = vld [vmem:[%s7654_s14 + $0xb8] sm:$0xf0]  ;;  %v4884_v53 = vld [vmem:[%s7654_s14 + $0xa0] sm:$0xf] }
  0xfb   : > { %1397 = vmatpush.bf16.msra.mxu2 %v4865_v39  ;;  %1159 = vmatmul.bf16.vlgmr.msrb.gmra.mxu3 %v7885_v14  ;;  %v4828_v14 = vld [vmem:[%s7654_s14 + $0x30] sm:$0xf]  ;;  %v6665_v39 = vld [vmem:[%s7654_s14 + $0xc4] sm:$0xf0]  ;;  %v4897_v18 = vor.u32 %v6662_v49, %v4894_v51  ;;  %v6784_v49 = vld [vmem:[%s7662_s6 + $0x384] sm:$0xf] }
  0xfc   : > { %v4829_v57 = vor.u32 %v6647_v55, %v4828_v14  ;;  %1411 = vmatpush.bf16.msra.mxu3 %v4929_v23  ;;  %v4901_v42 = vor.u32 %v6665_v39, %v4900_v38  ;;  %v6660_v14 = vld [vmem:[%s7654_s14 + $0xa4] sm:$0xf]  ;;  %v5156_v23 = vld [vmem:[%s7662_s6 + $0x1c0] sm:$0xf]  ;;  %v5414_v38 = vld [vmem:[%s7662_s6 + $0x3e0] sm:$0xf0]  ;;  %v5129_v39 = vor.u32 %v6720_v32, %v5126_v33 }
  0xfd   : > { %1370 = vmatpush.bf16.msra.mxu0 %v4853_v44  ;;  %v4889_v61 = vor.u32 %v6660_v14, %v4886_v58  ;;  %v5157_v26 = vor.u32 %v6732_v24, %v5156_v23  ;;  %v6704_v14 = vld [vmem:[%s7662_s6 + $0x104] sm:$0xf] }
  0xfe   : > { %1384 = vmatpush.bf16.msra.mxu1 %v4917_v27  ;;  %v5158_v27 = vld [vmem:[%s7662_s6 + $0x1e0] sm:$0xf0] }
  0xff   : > { %1398 = vmatpush.bf16.msra.mxu2 %v4857_v45  ;;  %v5161_v31 = vor.u32 %v6728_v25, %v5158_v27  ;;  %v6696_v23 = vld [vmem:[%s7662_s6 + $0xc4] sm:$0xf]  ;;  %v6772_v27 = vld [vmem:[%s7662_s6 + $0x31c] sm:$0xf0] }
 0x100   : > { %1412 = vmatpush.bf16.msra.mxu3 %v4921_v29  ;;  %v6724_v29 = vld [vmem:[%s7662_s6 + $0x19c] sm:$0xf0]  ;;  %v5030_v25 = vld [vmem:[%s7662_s6 + $0xe0] sm:$0xf0] }
 0x101   : > { %1371 = vmatpush.bf16.msra.mxu0 %v4845_v13  ;;  %v5125_v35 = vor.u32 %v6724_v29, %v5124_v28  ;;  %v5033_v28 = vor.u32 %v6696_v23, %v5030_v25  ;;  %v5318_v32 = vld [vmem:[%s7662_s6 + $0x320] sm:$0xf0]  ;;  %v6793_v25 = vld [vmem:[%s7662_s6 + $0x3cc] sm:$0xf] }
 0x102   : > { %1385 = vmatpush.bf16.msra.mxu1 %v4909_v34  ;;  %v5412_v34 = vld [vmem:[%s7662_s6 + $0x3c0] sm:$0xf] }
 0x103   : > { %1399 = vmatpush.bf16.msra.mxu2 %v4849_v50  ;;  %v4893_v50 = vor.u32 %v6663_v48, %v4892_v47  ;;  %v6788_v47 = vld [vmem:[%s7662_s6 + $0x39c] sm:$0xf0] }
 0x104   : > { %1413 = vmatpush.bf16.msra.mxu3 %v4913_v37  ;;  %v6792_v37 = vld [vmem:[%s7662_s6 + $0x3c4] sm:$0xf] }
 0x105   : > { %1372 = vmatpush.bf16.msra.mxu0 %v4837_v9 }
 0x106   : > { %1386 = vmatpush.bf16.msra.mxu1 %v4901_v42  ;;  %v5092_v42 = vld [vmem:[%s7662_s6 + $0x140] sm:$0xf] }
 0x107   : > { %1400 = vmatpush.bf16.msra.mxu2 %v4841_v54  ;;  %v6661_v54 = vld [vmem:[%s7654_s14 + $0xa4] sm:$0xf0] }
 0x108   : > { %1414 = vmatpush.bf16.msra.mxu3 %v4905_v46  ;;  %v5380_v46 = vld [vmem:[%s7662_s6 + $0x380] sm:$0xf] }
 0x109   : > { %1373 = vmatpush.bf16.msra.mxu0 %v4829_v57  ;;  %v4885_v57 = vor.u32 %v6661_v54, %v4884_v53  ;;  %v5381_v48 = vor.u32 %v6788_v47, %v5380_v46  ;;  %v5060_v53 = vld [vmem:[%s7662_s6 + $0x100] sm:$0xf] }
 0x10a   : > { %1387 = vmatpush.bf16.msra.mxu1 %v4893_v50  ;;  %v5093_v50 = vor.u32 %v6716_v43, %v5092_v42  ;;  %v6708_v54 = vld [vmem:[%s7662_s6 + $0x11c] sm:$0xf0]  ;;  %v6760_v42 = vld [vmem:[%s7662_s6 + $0x2c4] sm:$0xf] }
 0x10b   : > { %1401 = vmatpush.bf16.msra.mxu2 %v4833_v59  ;;  %v4964_v46 = vld [vmem:[%s7662_s6 + $0x40] sm:$0xf] }
 0x10c   : > { %1415 = vmatpush.bf16.msra.mxu3 %v4897_v18  ;;  %v6684_v47 = vld [vmem:[%s7662_s6 + $0x5c] sm:$0xf0] }
 0x10d   : > { %1374 = vmatpush.bf16.msra.mxu0 %v4821_v63  ;;  %v4876_v63 = vld [vmem:[%s7654_s14 + $0x90] sm:$0xf] }
 0x10e   : > { %1388 = vmatpush.bf16.msra.mxu1 %v4885_v57  ;;  %v4877_v3 = vor.u32 %v6659_v0, %v4876_v63  ;;  %v5061_v57 = vor.u32 %v6708_v54, %v5060_v53  ;;  %v5254_v53 = vld [vmem:[%s7662_s6 + $0x2a0] sm:$0xf0] }
 0x10f   : > { %1402 = vmatpush.bf16.msra.mxu2 %v4825_v1  ;;  %v6658_v1 = vld [vmem:[%s7654_s14 + $0x94] sm:$0xf] }
 0x110   : > { %1416 = vmatpush.bf16.msra.mxu3 %v4889_v61  ;;  %v4881_v6 = vor.u32 %v6658_v1, %v4878_v4 }
 0x111   : > { %1375 = vmatpush.bf16.msra.mxu0 %v4813_v5 }
 0x112   : > { %1389 = vmatpush.bf16.msra.mxu1 %v4877_v3 }
 0x113   : > { %1403 = vmatpush.bf16.msra.mxu2 %v4817_v7 }
 0x114   : > { %1417 = vmatpush.bf16.msra.mxu3 %v4881_v6 }
 0x115   : > { %1376 = vmatpush.bf16.msra.mxu0 %v4805_v12  ;;  %v6656_v12 = vld [vmem:[%s7654_s14 + $0x84] sm:$0xf] }
 0x116   : > { %1390 = vmatpush.bf16.msra.mxu1 %v4869_v17 }
 0x117   : > { %1404 = vmatpush.bf16.msra.mxu2 %v4809_v19  ;;  %v4870_v19 = vld [vmem:[%s7654_s14 + $0x88] sm:$0xf0] }
 0x118   : > { %v4873_v20 = vor.u32 %v6656_v12, %v4870_v19  ;;  %v5348_v12 = vld [vmem:[%s7662_s6 + $0x340] sm:$0xf]  ;;  %v5350_v19 = vld [vmem:[%s7662_s6 + $0x360] sm:$0xf0] }
 0x119   : > { %2217 = vmatpush.bf16.msrb.mxu0 %v5157_v26  ;;  %v5316_v26 = vld [vmem:[%s7662_s6 + $0x300] sm:$0xf] }
 0x11a   : > { %1418 = vmatpush.bf16.msra.mxu3 %v4873_v20  ;;  %v5317_v29 = vor.u32 %v6772_v27, %v5316_v26  ;;  %v5422_v26 = vld [vmem:[%s7662_s6 + $0x3e8] sm:$0xf0] }
 0x11b   : > { %2245 = vmatpush.bf16.msrb.mxu2 %v5161_v31  ;;  %v6768_v31 = vld [vmem:[%s7662_s6 + $0x304] sm:$0xf] }
 0x11c   : > { %v5321_v33 = vor.u32 %v6768_v31, %v5318_v32  ;;  %v6717_v31 = vld [vmem:[%s7662_s6 + $0x164] sm:$0xf0]  ;;  %v6713_v32 = vld [vmem:[%s7662_s6 + $0x14c] sm:$0xf] }
 0x11d   : > { %2218 = vmatpush.bf16.msrb.mxu0 %v5125_v35  ;;  %v6692_v35 = vld [vmem:[%s7662_s6 + $0x9c] sm:$0xf0] }
 0x11f   : > { %2246 = vmatpush.bf16.msrb.mxu2 %v5129_v39 }
 0x121   : > { %2219 = vmatpush.bf16.msrb.mxu0 %v5093_v50  ;;  %v5252_v50 = vld [vmem:[%s7662_s6 + $0x280] sm:$0xf] }
 0x125   : > { %2220 = vmatpush.bf16.msrb.mxu0 %v5061_v57 }
 0x155   : > { %v1062_v41 = vpop.f32.mrf.mxu0 }
 0x156   : > { %v1063_v44 = vadd.f32 %v1062_v41, %v729_v36  ;;  %v1076_v45 = vpop.f32.mrf.mxu1  ;;  %v5417_v41 = vor.u32 %v6792_v37, %v5414_v38  ;;  %v4998_v38 = vld [vmem:[%s7662_s6 + $0xa0] sm:$0xf0] }
 0x158   : > { %v1077_v13 = vadd.f32 %v1076_v45, %v1063_v44  ;;  %v6712_v44 = vld [vmem:[%s7662_s6 + $0x144] sm:$0xf]  ;;  %2259 = vmatpush.bf16.msrb.mxu3 %v5417_v41  ;;  %v6764_v41 = vld [vmem:[%s7662_s6 + $0x2dc] sm:$0xf0] }
 0x159   : > { %v5094_v45 = vld [vmem:[%s7662_s6 + $0x160] sm:$0xf0] }
 0x15d   : > { %v1090_v52 = vpop.f32.mrf.mxu2  ;;  %v1064_v56 = vpop.f32.mrf.mxu0 }
 0x15e   : > { %v1104_v9 = vpop.f32.mrf.mxu3  ;;  %v1091_v55 = vadd.f32 %v1090_v52, %v1077_v13  ;;  %v1065_v59 = vadd.f32 %v1064_v56, %v729_v36  ;;  %v1078_v60 = vpop.f32.mrf.mxu1  ;;  %v6796_v36 = vld [vmem:[%s7662_s6 + $0x3dc] sm:$0xf0]  ;;  %v5382_v13 = vld [vmem:[%s7662_s6 + $0x3a0] sm:$0xf0]  ;;  %v730_v52 = vperm.slane %v7988_v30, 1 }
 0x15f   : > { %v5413_v40 = vor.u32 %v6796_v36, %v5412_v34  ;;  %v5385_v51 = vor.u32 %v6784_v49, %v5382_v13  ;;  %v4996_v34 = vld [vmem:[%s7662_s6 + $0x80] sm:$0xf]  ;;  %v6688_v36 = vld [vmem:[%s7662_s6 + $0x84] sm:$0xf]  ;;  %v4965_v49 = vor.u32 %v6684_v47, %v4964_v46 }
 0x160   : > { %v1079_v62 = vadd.f32 %v1078_v60, %v1065_v59  ;;  %v1105_v2 = vadd.f32 %v1104_v9, %v1091_v55  ;;  %v5097_v9 = vor.u32 %v6712_v44, %v5094_v45  ;;  %v5062_v55 = vld [vmem:[%s7662_s6 + $0x120] sm:$0xf0]  ;;  %v4997_v37 = vor.u32 %v6692_v35, %v4996_v34  ;;  %v5102_v34 = vld [vmem:[%s7662_s6 + $0x168] sm:$0xf0]  ;;  %v5388_v35 = vld [vmem:[%s7662_s6 + $0x388] sm:$0xf] }
 0x161   : > { %2231 = vmatpush.bf16.msrb.mxu1 %v5413_v40  ;;  %2260 = vmatpush.bf16.msrb.mxu3 %v5385_v51  ;;  %v5065_v59 = vor.u32 %v6704_v14, %v5062_v55  ;;  %v5001_v39 = vor.u32 %v6688_v36, %v4998_v38  ;;  %v5284_v40 = vld [vmem:[%s7662_s6 + $0x2c0] sm:$0xf]  ;;  %v5286_v44 = vld [vmem:[%s7662_s6 + $0x2e0] sm:$0xf0]  ;;  %v6789_v36 = vld [vmem:[%s7662_s6 + $0x3a4] sm:$0xf0] }
 0x162   : > { %v1165_v15 = vmax.f32 %v1105_v2, 0.0  ;;  %2247 = vmatpush.bf16.msrb.mxu2 %v5097_v9  ;;  %v5285_v43 = vor.u32 %v6764_v41, %v5284_v40  ;;  %v5289_v45 = vor.u32 %v6760_v42, %v5286_v44  ;;  %v4966_v13 = vld [vmem:[%s7662_s6 + $0x60] sm:$0xf0]  ;;  %v6756_v51 = vld [vmem:[%s7662_s6 + $0x29c] sm:$0xf0]  ;;  %v5389_v41 = vor.u32 %v6789_v36, %v5388_v35 }
 0x163   : > { %v6752_v9 = vld [vmem:[%s7662_s6 + $0x284] sm:$0xf]  ;;  %v4932_v14 = vld [vmem:[%s7662_s6] sm:$0xf]  ;;  %v6785_v38 = vld [vmem:[%s7662_s6 + $0x38c] sm:$0xf] }
 0x164   : > { %v5257_v54 = vor.u32 %v6752_v9, %v5254_v53  ;;  %v6676_v55 = vld [vmem:[%s7662_s6 + $0x1c] sm:$0xf0]  ;;  %v5068_v40 = vld [vmem:[%s7662_s6 + $0x108] sm:$0xf]  ;;  %v6705_v44 = vld [vmem:[%s7662_s6 + $0x10c] sm:$0xf] }
 0x165   : > { %v1092_v5 = vpop.f32.mrf.mxu2  ;;  %2232 = vmatpush.bf16.msrb.mxu1 %v5381_v48  ;;  %v6680_v48 = vld [vmem:[%s7662_s6 + $0x44] sm:$0xf]  ;;  %v4933_v57 = vor.u32 %v6676_v55, %v4932_v14  ;;  %v6701_v9 = vld [vmem:[%s7662_s6 + $0xe4] sm:$0xf0]  ;;  %v6697_v53 = vld [vmem:[%s7662_s6 + $0xcc] sm:$0xf] }
 0x166   : > { %v1093_v7 = vadd.f32 %v1092_v5, %v1079_v62  ;;  %v1106_v8 = vpop.f32.mrf.mxu3  ;;  %2248 = vmatpush.bf16.msrb.mxu2 %v5065_v59  ;;  %v5164_v59 = vld [vmem:[%s7662_s6 + $0x1c8] sm:$0xf]  ;;  %v5038_v14 = vld [vmem:[%s7662_s6 + $0xe8] sm:$0xf0] }
 0x167   : > { %v5041_v55 = vor.u32 %v6697_v53, %v5038_v14  ;;  %v5230_v35 = vld [vmem:[%s7662_s6 + $0x268] sm:$0xf0]  ;;  %v5172_v53 = vld [vmem:[%s7662_s6 + $0x1d0] sm:$0xf] }
 0x168   : > { %v1107_v16 = vadd.f32 %v1106_v8, %v1093_v7  ;;  %v6734_v14 = vld [vmem:[%s7662_s6 + $0x1ec] sm:$0xf0] }
 0x16a   : > { %v1167_v21 = vmax.f32 %v1107_v16, 0.0  ;;  %v6776_v16 = vld [vmem:[%s7662_s6 + $0x344] sm:$0xf]  ;;  %2249 = vmatpush.bf16.msrb.mxu2 %v5033_v28  ;;  %v5425_v28 = vor.u32 %v6793_v25, %v5422_v26  ;;  %v4940_v25 = vld [vmem:[%s7662_s6 + $0x8] sm:$0xf] }
 0x16b   : > { %v5353_v20 = vor.u32 %v6776_v16, %v5350_v19  ;;  %v6740_v16 = vld [vmem:[%s7662_s6 + $0x21c] sm:$0xf0]  ;;  %v6677_v26 = vld [vmem:[%s7662_s6 + $0x24] sm:$0xf0] }
 0x16c   : > { %v1169_v22 = vpack.c.bf16 %v1167_v21, %v1165_v15  ;;  %v6780_v15 = vld [vmem:[%s7662_s6 + $0x35c] sm:$0xf0] }
 0x16d   : > { %v5349_v17 = vor.u32 %v6780_v15, %v5348_v12  ;;  %v5028_v21 = vld [vmem:[%s7662_s6 + $0xc0] sm:$0xf]  ;;  %2261 = vmatpush.bf16.msrb.mxu3 %v5353_v20  ;;  %v5134_v12 = vld [vmem:[%s7662_s6 + $0x1a8] sm:$0xf0]  ;;  %v6736_v20 = vld [vmem:[%s7662_s6 + $0x204] sm:$0xf] }
 0x16e   : > { %1377 = vmatmul.bf16.vlgmr.msra.gmra.mxu0 %v1169_v22  ;;  %1405 = vmatmul.bf16.vlgmr.msra.gmra.mxu2 %v1169_v22  ;;  %v6700_v22 = vld [vmem:[%s7662_s6 + $0xdc] sm:$0xf0] }
 0x16f   : > { %2233 = vmatpush.bf16.msrb.mxu1 %v5349_v17  ;;  %v5029_v24 = vor.u32 %v6700_v22, %v5028_v21  ;;  %2250 = vmatpush.bf16.msrb.mxu2 %v5001_v39  ;;  %v5188_v15 = vld [vmem:[%s7662_s6 + $0x200] sm:$0xf]  ;;  %v5190_v21 = vld [vmem:[%s7662_s6 + $0x220] sm:$0xf0]  ;;  %v5420_v22 = vld [vmem:[%s7662_s6 + $0x3c8] sm:$0xf] }
 0x170   : > { %v5189_v19 = vor.u32 %v6740_v16, %v5188_v15  ;;  %v5193_v23 = vor.u32 %v6736_v20, %v5190_v21  ;;  %v5390_v39 = vld [vmem:[%s7662_s6 + $0x3a8] sm:$0xf0]  ;;  %v6757_v20 = vld [vmem:[%s7662_s6 + $0x2a4] sm:$0xf0] }
 0x171   : > { %2221 = vmatpush.bf16.msrb.mxu0 %v5029_v24  ;;  %2262 = vmatpush.bf16.msrb.mxu3 %v5321_v33  ;;  %v6797_v24 = vld [vmem:[%s7662_s6 + $0x3e4] sm:$0xf0]  ;;  %v5393_v42 = vor.u32 %v6785_v38, %v5390_v39  ;;  %v4974_v16 = vld [vmem:[%s7662_s6 + $0x68] sm:$0xf0] }
 0x172   : > { %v5421_v27 = vor.u32 %v6797_v24, %v5420_v22  ;;  %v6753_v21 = vld [vmem:[%s7662_s6 + $0x28c] sm:$0xf]  ;;  %v5196_v38 = vld [vmem:[%s7662_s6 + $0x208] sm:$0xf] }
 0x173   : > { %2234 = vmatpush.bf16.msrb.mxu1 %v5317_v29  ;;  %v5100_v29 = vld [vmem:[%s7662_s6 + $0x148] sm:$0xf] }
 0x174   : > { %v5101_v33 = vor.u32 %v6717_v31, %v5100_v29  ;;  %v4942_v29 = vld [vmem:[%s7662_s6 + $0x28] sm:$0xf0]  ;;  %v6741_v39 = vld [vmem:[%s7662_s6 + $0x224] sm:$0xf0] }
 0x175   : > { %v1118_v18 = vpop.f32.mrf.mxu0  ;;  %2222 = vmatpush.bf16.msrb.mxu0 %v4997_v37  ;;  %2263 = vmatpush.bf16.msrb.mxu3 %v5289_v45  ;;  %v5105_v37 = vor.u32 %v6713_v32, %v5102_v34  ;;  %v5070_v45 = vld [vmem:[%s7662_s6 + $0x128] sm:$0xf0]  ;;  %v5228_v32 = vld [vmem:[%s7662_s6 + $0x248] sm:$0xf] }
 0x176   : > { %v1132_v56 = vpop.f32.mrf.mxu1  ;;  %v1119_v58 = vadd.f32 %v1118_v18, %v730_v52  ;;  %v5253_v18 = vor.u32 %v6756_v51, %v5252_v50  ;;  %v5073_v47 = vor.u32 %v6705_v44, %v5070_v45  ;;  %v5358_v51 = vld [vmem:[%s7662_s6 + $0x368] sm:$0xf0]  ;;  %v1203_v45 = vld [vmem:[%s7656_s0] sm:$0x3] }
 0x177   : > { %2235 = vmatpush.bf16.msrb.mxu1 %v5285_v43  ;;  %v6709_v43 = vld [vmem:[%s7662_s6 + $0x124] sm:$0xf0]  ;;  %v6745_v34 = vld [vmem:[%s7662_s6 + $0x24c] sm:$0xf] }
 0x178   : > { %v1133_v61 = vadd.f32 %v1132_v56, %v1119_v58  ;;  %v6672_v56 = vld [vmem:[%s7662_s6 + $0x4] sm:$0xf]  ;;  %v5069_v46 = vor.u32 %v6709_v43, %v5068_v40  ;;  %v5197_v40 = vor.u32 %v6741_v39, %v5196_v38  ;;  %v5364_v39 = vld [vmem:[%s7662_s6 + $0x350] sm:$0xf] }
 0x179   : > { %2223 = vmatpush.bf16.msrb.mxu0 %v4965_v49  ;;  %v4934_v58 = vld [vmem:[%s7662_s6 + $0x20] sm:$0xf0]  ;;  %2264 = vmatpush.bf16.msrb.mxu3 %v5257_v54  ;;  %v6781_v49 = vld [vmem:[%s7662_s6 + $0x364] sm:$0xf0] }
 0x17b   : > { %2236 = vmatpush.bf16.msrb.mxu1 %v5253_v18  ;;  %v5036_v18 = vld [vmem:[%s7662_s6 + $0xc8] sm:$0xf] }
 0x17c   : > { %v5037_v54 = vor.u32 %v6701_v9, %v5036_v18 }
 0x17d   : > { %v1146_v60 = vpop.f32.mrf.mxu2  ;;  %v1120_v30 = vpop.f32.mrf.mxu0  ;;  %2224 = vmatpush.bf16.msrb.mxu0 %v4933_v57  ;;  %v6773_v57 = vld [vmem:[%s7662_s6 + $0x324] sm:$0xf0] }
 0x17e   : > { %v1160_v62 = vpop.f32.mrf.mxu3  ;;  %v1121_v63 = vadd.f32 %v1120_v30, %v730_v52  ;;  %v1147_v0 = vadd.f32 %v1146_v60, %v1133_v61  ;;  %v1134_v1 = vpop.f32.mrf.mxu1  ;;  %v4969_v52 = vor.u32 %v6680_v48, %v4966_v13  ;;  %v6733_v60 = vld [vmem:[%s7662_s6 + $0x1e4] sm:$0xf0]  ;;  %v4937_v61 = vor.u32 %v6672_v56, %v4934_v58  ;;  %v6729_v30 = vld [vmem:[%s7662_s6 + $0x1cc] sm:$0xf] }
 0x17f   : > { %v5356_v48 = vld [vmem:[%s7662_s6 + $0x348] sm:$0xf]  ;;  %v6777_v13 = vld [vmem:[%s7662_s6 + $0x34c] sm:$0xf] }
 0x180   : > { %v1135_v2 = vadd.f32 %v1134_v1, %v1121_v63  ;;  %v1161_v4 = vadd.f32 %v1160_v62, %v1147_v0  ;;  %2251 = vmatpush.bf16.msrb.mxu2 %v4969_v52  ;;  %v5165_v62 = vor.u32 %v6733_v60, %v5164_v59  ;;  %v5166_v63 = vld [vmem:[%s7662_s6 + $0x1e8] sm:$0xf0]  ;;  %v5220_v0 = vld [vmem:[%s7662_s6 + $0x240] sm:$0xf]  ;;  %v5357_v50 = vor.u32 %v6781_v49, %v5356_v48  ;;  %v5324_v56 = vld [vmem:[%s7662_s6 + $0x308] sm:$0xf] }
 0x181   : > { %v5169_v1 = vor.u32 %v6729_v30, %v5166_v63  ;;  %v5361_v52 = vor.u32 %v6777_v13, %v5358_v51  ;;  %v6769_v58 = vld [vmem:[%s7662_s6 + $0x30c] sm:$0xf]  ;;  %v5325_v59 = vor.u32 %v6773_v57, %v5324_v56  ;;  %v6693_v30 = vld [vmem:[%s7662_s6 + $0xa4] sm:$0xf0]  ;;  %v1205_v48 = vperm.slane %v1203_v45, 0 }
 0x182   : > { %v1166_v8 = vmax.f32 %v1161_v4, 0.0  ;;  %v5222_v4 = vld [vmem:[%s7662_s6 + $0x260] sm:$0xf0]  ;;  %2273 = vmatpush.bf16.msra.mxu0 %v5165_v62  ;;  %v5326_v60 = vld [vmem:[%s7662_s6 + $0x328] sm:$0xf0]  ;;  %v1206_v51 = vperm.slane %v1203_v45, 1 }
 0x183   : > { %v5004_v62 = vld [vmem:[%s7662_s6 + $0x88] sm:$0xf]  ;;  %v6689_v63 = vld [vmem:[%s7662_s6 + $0x8c] sm:$0xf]  ;;  %v5174_v56 = vld [vmem:[%s7662_s6 + $0x1f0] sm:$0xf0] }
 0x184   : > { %2252 = vmatpush.bf16.msrb.mxu2 %v4937_v61  ;;  %v5329_v61 = vor.u32 %v6769_v58, %v5326_v60  ;;  %v5044_v45 = vld [vmem:[%s7662_s6 + $0xd0] sm:$0xf] }
 0x185   : > { %v1148_v3 = vpop.f32.mrf.mxu2 }
 0x186   : > { %v1149_v5 = vadd.f32 %v1148_v3, %v1135_v2  ;;  %v1162_v6 = vpop.f32.mrf.mxu3  ;;  %v6748_v2 = vld [vmem:[%s7662_s6 + $0x25c] sm:$0xf0]  ;;  %v6744_v3 = vld [vmem:[%s7662_s6 + $0x244] sm:$0xf] }
 0x188   : > { %v1163_v7 = vadd.f32 %v1162_v6, %v1149_v5  ;;  %v5221_v5 = vor.u32 %v6748_v2, %v5220_v0  ;;  %v5225_v6 = vor.u32 %v6744_v3, %v5222_v4  ;;  %2301 = vmatpush.bf16.msra.mxu2 %v5169_v1  ;;  %v5005_v0 = vor.u32 %v6693_v30, %v5004_v62  ;;  %v5006_v1 = vld [vmem:[%s7662_s6 + $0xa8] sm:$0xf0]  ;;  %v5292_v3 = vld [vmem:[%s7662_s6 + $0x2c8] sm:$0xf]  ;;  %v5140_v30 = vld [vmem:[%s7662_s6 + $0x190] sm:$0xf] }
 0x189   : > { %v5009_v2 = vor.u32 %v6689_v63, %v5006_v1  ;;  %v6765_v4 = vld [vmem:[%s7662_s6 + $0x2e4] sm:$0xf0] }
 0x18a   : > { %v1168_v10 = vmax.f32 %v1163_v7, 0.0  ;;  %v5132_v7 = vld [vmem:[%s7662_s6 + $0x188] sm:$0xf]  ;;  %2237 = vmatpush.bf16.msrb.mxu1 %v5221_v5  ;;  %2265 = vmatpush.bf16.msrb.mxu3 %v5225_v6  ;;  %v6761_v5 = vld [vmem:[%s7662_s6 + $0x2cc] sm:$0xf]  ;;  %v5293_v6 = vor.u32 %v6765_v4, %v5292_v3 }
 0x18b   : > { %v6722_v3 = vld [vmem:[%s7662_s6 + $0x194] sm:$0xf] }
 0x18c   : > { %v1170_v11 = vpack.c.bf16 %v1168_v10, %v1166_v8  ;;  %v6725_v8 = vld [vmem:[%s7662_s6 + $0x1a4] sm:$0xf0]  ;;  %v6721_v10 = vld [vmem:[%s7662_s6 + $0x18c] sm:$0xf]  ;;  %v5142_v4 = vld [vmem:[%s7662_s6 + $0x1b0] sm:$0xf0] }
 0x18d   : > { %v5137_v17 = vor.u32 %v6721_v10, %v5134_v12  ;;  %v4972_v10 = vld [vmem:[%s7662_s6 + $0x48] sm:$0xf]  ;;  %v6681_v12 = vld [vmem:[%s7662_s6 + $0x4c] sm:$0xf] }
 0x18e   : > { %1391 = vmatmul.bf16.vlgmr.msra.gmra.mxu1 %v1170_v11  ;;  %1419 = vmatmul.bf16.vlgmr.msra.gmra.mxu3 %v1170_v11  ;;  %v5133_v11 = vor.u32 %v6725_v8, %v5132_v7  ;;  %v5294_v7 = vld [vmem:[%s7662_s6 + $0x2e8] sm:$0xf0] }
 0x18f   : > { %2302 = vmatpush.bf16.msra.mxu2 %v5137_v17  ;;  %2238 = vmatpush.bf16.msrb.mxu1 %v5189_v19  ;;  %v5297_v8 = vor.u32 %v6761_v5, %v5294_v7  ;;  %v4977_v17 = vor.u32 %v6681_v12, %v4974_v16  ;;  %v5260_v19 = vld [vmem:[%s7662_s6 + $0x288] sm:$0xf]  ;;  %v5108_v16 = vld [vmem:[%s7662_s6 + $0x150] sm:$0xf] }
 0x190   : > { %2274 = vmatpush.bf16.msra.mxu0 %v5133_v11  ;;  %2266 = vmatpush.bf16.msrb.mxu3 %v5193_v23  ;;  %v6685_v11 = vld [vmem:[%s7662_s6 + $0x64] sm:$0xf0]  ;;  %v5261_v22 = vor.u32 %v6757_v20, %v5260_v19  ;;  %v5262_v23 = vld [vmem:[%s7662_s6 + $0x2a8] sm:$0xf0] }
 0x191   : > { %v4973_v15 = vor.u32 %v6685_v11, %v4972_v10  ;;  %v5265_v24 = vor.u32 %v6753_v21, %v5262_v23  ;;  %v6794_v10 = vld [vmem:[%s7662_s6 + $0x3d4] sm:$0xf] }
 0x192   : > { %v5430_v11 = vld [vmem:[%s7662_s6 + $0x3f0] sm:$0xf0] }
 0x193   : > { %2287 = vmatpush.bf16.msra.mxu1 %v5421_v27  ;;  %2303 = vmatpush.bf16.msra.mxu2 %v5105_v37  ;;  %v6673_v27 = vld [vmem:[%s7662_s6 + $0xc] sm:$0xf]  ;;  %v5233_v37 = vor.u32 %v6745_v34, %v5230_v35  ;;  %v6714_v21 = vld [vmem:[%s7662_s6 + $0x154] sm:$0xf]  ;;  %v6710_v34 = vld [vmem:[%s7662_s6 + $0x12c] sm:$0xf0] }
 0x194   : > { %2315 = vmatpush.bf16.msra.mxu3 %v5425_v28  ;;  %2275 = vmatpush.bf16.msra.mxu0 %v5101_v33  ;;  %v4941_v28 = vor.u32 %v6677_v26, %v4940_v25  ;;  %v4945_v31 = vor.u32 %v6673_v27, %v4942_v29  ;;  %v6749_v33 = vld [vmem:[%s7662_s6 + $0x264] sm:$0xf0]  ;;  %v5396_v25 = vld [vmem:[%s7662_s6 + $0x390] sm:$0xf]  ;;  %v5398_v29 = vld [vmem:[%s7662_s6 + $0x3b0] sm:$0xf0] }
 0x195   : > { %v5229_v36 = vor.u32 %v6749_v33, %v5228_v32  ;;  %v6790_v27 = vld [vmem:[%s7662_s6 + $0x3ac] sm:$0xf0]  ;;  %v6706_v35 = vld [vmem:[%s7662_s6 + $0x114] sm:$0xf] }
 0x196   : > { %v5076_v33 = vld [vmem:[%s7662_s6 + $0x110] sm:$0xf] }
 0x197   : > { %2288 = vmatpush.bf16.msra.mxu1 %v5389_v41  ;;  %2304 = vmatpush.bf16.msra.mxu2 %v5073_v47  ;;  %v6737_v41 = vld [vmem:[%s7662_s6 + $0x20c] sm:$0xf] }
 0x198   : > { %2316 = vmatpush.bf16.msra.mxu3 %v5393_v42  ;;  %2276 = vmatpush.bf16.msra.mxu0 %v5069_v46  ;;  %v5198_v42 = vld [vmem:[%s7662_s6 + $0x228] sm:$0xf0] }
 0x199   : > { %v5201_v43 = vor.u32 %v6737_v41, %v5198_v42  ;;  %v6778_v41 = vld [vmem:[%s7662_s6 + $0x354] sm:$0xf] }
 0x19a   : > { %v5366_v42 = vld [vmem:[%s7662_s6 + $0x370] sm:$0xf0] }
 0x19b   : > { %2289 = vmatpush.bf16.msra.mxu1 %v5357_v50  ;;  %2305 = vmatpush.bf16.msra.mxu2 %v5041_v55  ;;  %v6730_v55 = vld [vmem:[%s7662_s6 + $0x1d4] sm:$0xf] }
 0x19c   : > { %2317 = vmatpush.bf16.msra.mxu3 %v5361_v52  ;;  %2277 = vmatpush.bf16.msra.mxu0 %v5037_v54  ;;  %v5177_v62 = vor.u32 %v6730_v55, %v5174_v56  ;;  %v6690_v55 = vld [vmem:[%s7662_s6 + $0x94] sm:$0xf] }
 0x19d   : > { %v5014_v56 = vld [vmem:[%s7662_s6 + $0xb0] sm:$0xf0] }
 0x19f   : > { %2290 = vmatpush.bf16.msra.mxu1 %v5325_v59  ;;  %2306 = vmatpush.bf16.msra.mxu2 %v5009_v2  ;;  %v6726_v2 = vld [vmem:[%s7662_s6 + $0x1ac] sm:$0xf0] }
 0x1a0   : > { %2318 = vmatpush.bf16.msra.mxu3 %v5329_v61  ;;  %2278 = vmatpush.bf16.msra.mxu0 %v5005_v0  ;;  %v5173_v61 = vor.u32 %v6734_v14, %v5172_v53  ;;  %v5141_v12 = vor.u32 %v6726_v2, %v5140_v30  ;;  %v6694_v14 = vld [vmem:[%s7662_s6 + $0xac] sm:$0xf0] }
 0x1a1   : > { %v6686_v2 = vld [vmem:[%s7662_s6 + $0x6c] sm:$0xf0] }
 0x1a3   : > { %2291 = vmatpush.bf16.msra.mxu1 %v5293_v6  ;;  %2307 = vmatpush.bf16.msra.mxu2 %v4977_v17  ;;  %v5428_v6 = vld [vmem:[%s7662_s6 + $0x3d0] sm:$0xf] }
 0x1a4   : > { %2319 = vmatpush.bf16.msra.mxu3 %v5297_v8  ;;  %2279 = vmatpush.bf16.msra.mxu0 %v4973_v15  ;;  %v6798_v8 = vld [vmem:[%s7662_s6 + $0x3ec] sm:$0xf0]  ;;  %v5145_v15 = vor.u32 %v6722_v3, %v5142_v4  ;;  %v6682_v3 = vld [vmem:[%s7662_s6 + $0x54] sm:$0xf] }
 0x1a5   : > { %v6718_v17 = vld [vmem:[%s7662_s6 + $0x16c] sm:$0xf0]  ;;  %v5429_v23 = vor.u32 %v6798_v8, %v5428_v6  ;;  %v4982_v4 = vld [vmem:[%s7662_s6 + $0x70] sm:$0xf0] }
 0x1a6   : > { %v6758_v8 = vld [vmem:[%s7662_s6 + $0x2ac] sm:$0xf0] }
 0x1a7   : > { %2292 = vmatpush.bf16.msra.mxu1 %v5261_v22  ;;  %2308 = vmatpush.bf16.msra.mxu2 %v4945_v31  ;;  %v5110_v22 = vld [vmem:[%s7662_s6 + $0x170] sm:$0xf0]  ;;  %v5109_v31 = vor.u32 %v6718_v17, %v5108_v16  ;;  %v4948_v16 = vld [vmem:[%s7662_s6 + $0x10] sm:$0xf] }
 0x1a8   : > { %2320 = vmatpush.bf16.msra.mxu3 %v5265_v24  ;;  %2280 = vmatpush.bf16.msra.mxu0 %v4941_v28  ;;  %v5433_v24 = vor.u32 %v6794_v10, %v5430_v11  ;;  %v6786_v28 = vld [vmem:[%s7662_s6 + $0x394] sm:$0xf]  ;;  %v5113_v32 = vor.u32 %v6714_v21, %v5110_v22  ;;  %v6678_v17 = vld [vmem:[%s7662_s6 + $0x2c] sm:$0xf0]  ;;  %v5180_v21 = vld [vmem:[%s7662_s6 + $0x1d8] sm:$0xf] }
 0x1a9   : > { %v5401_v38 = vor.u32 %v6786_v28, %v5398_v29  ;;  %v6754_v10 = vld [vmem:[%s7662_s6 + $0x294] sm:$0xf]  ;;  %v6735_v22 = vld [vmem:[%s7662_s6 + $0x1f4] sm:$0xf0]  ;;  %v5236_v28 = vld [vmem:[%s7662_s6 + $0x250] sm:$0xf] }
 0x1aa   : > { %v5270_v11 = vld [vmem:[%s7662_s6 + $0x2b0] sm:$0xf0]  ;;  %v6750_v29 = vld [vmem:[%s7662_s6 + $0x26c] sm:$0xf0] }
 0x1ab   : > { %2293 = vmatpush.bf16.msra.mxu1 %v5229_v36  ;;  %v5078_v36 = vld [vmem:[%s7662_s6 + $0x130] sm:$0xf0] }
 0x1ac   : > { %2321 = vmatpush.bf16.msra.mxu3 %v5233_v37  ;;  %v5397_v37 = vor.u32 %v6790_v27, %v5396_v25  ;;  %v6731_v25 = vld [vmem:[%s7662_s6 + $0x1dc] sm:$0xf] }
 0x1ad   : > { %v5182_v27 = vld [vmem:[%s7662_s6 + $0x1f8] sm:$0xf0] }
 0x1af   : > { %2294 = vmatpush.bf16.msra.mxu1 %v5197_v40  ;;  %v6782_v40 = vld [vmem:[%s7662_s6 + $0x36c] sm:$0xf0] }
 0x1b0   : > { %2322 = vmatpush.bf16.msra.mxu3 %v5201_v43  ;;  %v5077_v43 = vor.u32 %v6710_v34, %v5076_v33  ;;  %v4949_v33 = vor.u32 %v6678_v17, %v4948_v16  ;;  %v6699_v16 = vld [vmem:[%s7662_s6 + $0xdc] sm:$0xf] }
 0x1b1   : > { %v5054_v17 = vld [vmem:[%s7662_s6 + $0xf8] sm:$0xf0] }
 0x1eb   : > { %v1378_v44 = vpop.f32.mrf.mxu0 }
 0x1ec   : > { %v1379_v13 = vadd.f32 %v1378_v44, %v1205_v48  ;;  %v5081_v44 = vor.u32 %v6706_v35, %v5078_v36  ;;  %v5181_v35 = vor.u32 %v6735_v22, %v5180_v21  ;;  %v5185_v36 = vor.u32 %v6731_v25, %v5182_v27  ;;  %v5340_v21 = vld [vmem:[%s7662_s6 + $0x318] sm:$0xf] }
 0x1ed   : > { %v6775_v22 = vld [vmem:[%s7662_s6 + $0x334] sm:$0xf0]  ;;  %v5057_v27 = vor.u32 %v6699_v16, %v5054_v17  ;;  %v5549_v16 = vld [vmem:[%s7641_s15 + $0x250] sm:$0xf] }
 0x1f1   : > { %v1406_v46 = vpop.f32.mrf.mxu2 }
 0x1f2   : > { %v1407_v58 = vadd.f32 %v1406_v46, %v1206_v51  ;;  %v6702_v46 = vld [vmem:[%s7662_s6 + $0xec] sm:$0xf0] }
 0x1f3   : > { %v1380_v49 = vpop.f32.mrf.mxu0 }
 0x1f4   : > { %v1381_v52 = vadd.f32 %v1380_v49, %v1205_v48  ;;  %v5046_v48 = vld [vmem:[%s7662_s6 + $0xf0] sm:$0xf0]  ;;  %v5365_v49 = vor.u32 %v6782_v40, %v5364_v39  ;;  %v6723_v39 = vld [vmem:[%s7662_s6 + $0x19c] sm:$0xf]  ;;  %v5237_v40 = vor.u32 %v6750_v29, %v5236_v28  ;;  %v5020_v28 = vld [vmem:[%s7662_s6 + $0x98] sm:$0xf] }
 0x1f5   : > { %v6695_v29 = vld [vmem:[%s7662_s6 + $0xb4] sm:$0xf0] }
 0x1f9   : > { %v1408_v57 = vpop.f32.mrf.mxu2 }
 0x1fa   : > { %v1409_v63 = vadd.f32 %v1408_v57, %v1206_v51  ;;  %v6774_v51 = vld [vmem:[%s7662_s6 + $0x32c] sm:$0xf0] }
 0x20b   : > { %v1392_v47 = vpop.f32.mrf.mxu1 }
 0x20c   : > { %v1393_v18 = vadd.f32 %v1392_v47, %v1379_v13  ;;  %v6698_v47 = vld [vmem:[%s7662_s6 + $0xd4] sm:$0xf]  ;;  %v5369_v13 = vor.u32 %v6778_v41, %v5366_v42  ;;  %v5150_v42 = vld [vmem:[%s7662_s6 + $0x1b8] sm:$0xf0] }
 0x20d   : > { %v5049_v53 = vor.u32 %v6698_v47, %v5046_v48  ;;  %v5436_v47 = vld [vmem:[%s7662_s6 + $0x3d8] sm:$0xf] }
 0x20e   : > { %v1425_v59 = vmax.f32 %v1393_v18, 0.0  ;;  %v5334_v18 = vld [vmem:[%s7662_s6 + $0x330] sm:$0xf0]  ;;  %v6799_v48 = vld [vmem:[%s7662_s6 + $0x3f4] sm:$0xf0] }
 0x211   : > { %v1420_v50 = vpop.f32.mrf.mxu3 }
 0x212   : > { %v1421_v0 = vadd.f32 %v1420_v50, %v1407_v58  ;;  %v5332_v50 = vld [vmem:[%s7662_s6 + $0x310] sm:$0xf] }
 0x213   : > { %v1394_v9 = vpop.f32.mrf.mxu1  ;;  %v5333_v57 = vor.u32 %v6774_v51, %v5332_v50  ;;  %v5153_v51 = vor.u32 %v6723_v39, %v5150_v42  ;;  %v5021_v39 = vor.u32 %v6695_v29, %v5020_v28  ;;  %v6687_v42 = vld [vmem:[%s7662_s6 + $0x74] sm:$0xf0]  ;;  %v5533_v29 = vld [vmem:[%s7641_s15 + $0x230] sm:$0xf] }
 0x214   : > { %v1395_v54 = vadd.f32 %v1394_v9, %v1381_v52  ;;  %v1426_v19 = vmax.f32 %v1421_v0, 0.0  ;;  %v6770_v52 = vld [vmem:[%s7662_s6 + $0x314] sm:$0xf]  ;;  %v5045_v9 = vor.u32 %v6702_v46, %v5044_v45  ;;  %v4980_v0 = vld [vmem:[%s7662_s6 + $0x50] sm:$0xf] }
 0x215   : > { %v5337_v58 = vor.u32 %v6770_v52, %v5334_v18  ;;  %v6738_v45 = vld [vmem:[%s7662_s6 + $0x214] sm:$0xf]  ;;  %v5116_v52 = vld [vmem:[%s7662_s6 + $0x158] sm:$0xf] }
 0x216   : > { %v1427_v60 = vmax.f32 %v1395_v54, 0.0  ;;  %v5012_v54 = vld [vmem:[%s7662_s6 + $0x90] sm:$0xf]  ;;  %v5206_v46 = vld [vmem:[%s7662_s6 + $0x230] sm:$0xf0] }
 0x217   : > { %v5013_v30 = vor.u32 %v6694_v14, %v5012_v54  ;;  %v6715_v54 = vld [vmem:[%s7662_s6 + $0x15c] sm:$0xf] }
 0x218   : > { %v8150_v1 = vpack.c.bf16 %v1427_v60, %v1425_v59  ;;  %v5300_v59 = vld [vmem:[%s7662_s6 + $0x2d0] sm:$0xf]  ;;  %v5118_v14 = vld [vmem:[%s7662_s6 + $0x178] sm:$0xf0] }
 0x219   : > { %v1422_v5 = vpop.f32.mrf.mxu3  ;;  %v6766_v60 = vld [vmem:[%s7662_s6 + $0x2ec] sm:$0xf0] }
 0x21a   : > { %v1423_v7 = vadd.f32 %v1422_v5, %v1409_v63  ;;  %2225 = vmatmul.bf16.vlgmr.msrb.gmra.mxu0 %v8150_v1  ;;  %2253 = vmatmul.bf16.vlgmr.msrb.gmra.mxu2 %v8150_v1  ;;  %v5017_v63 = vor.u32 %v6690_v55, %v5014_v56  ;;  %v5301_v5 = vor.u32 %v6766_v60, %v5300_v59  ;;  %v6787_v59 = vld [vmem:[%s7662_s6 + $0x39c] sm:$0xf] }
 0x21b   : > { %2329 = vmatpush.bf16.msrb.mxu0 %v5173_v61  ;;  %2357 = vmatpush.bf16.msrb.mxu2 %v5177_v62  ;;  %v6762_v61 = vld [vmem:[%s7662_s6 + $0x2d4] sm:$0xf]  ;;  %v5437_v55 = vor.u32 %v6799_v48, %v5436_v47  ;;  %v5406_v60 = vld [vmem:[%s7662_s6 + $0x3b8] sm:$0xf0]  ;;  %v5276_v47 = vld [vmem:[%s7662_s6 + $0x298] sm:$0xf] }
 0x21c   : > { %v1428_v20 = vmax.f32 %v1423_v7, 0.0  ;;  %v5302_v62 = vld [vmem:[%s7662_s6 + $0x2f0] sm:$0xf0]  ;;  %v5268_v7 = vld [vmem:[%s7662_s6 + $0x290] sm:$0xf] }
 0x21d   : > { %v5305_v6 = vor.u32 %v6762_v61, %v5302_v62  ;;  %v5121_v62 = vor.u32 %v6715_v54, %v5118_v14  ;;  %v6759_v48 = vld [vmem:[%s7662_s6 + $0x2b4] sm:$0xf0] }
 0x21e   : > { %v8166_v26 = vpack.c.bf16 %v1428_v20, %v1426_v19  ;;  %v6674_v19 = vld [vmem:[%s7662_s6 + $0x14] sm:$0xf]  ;;  %v5277_v54 = vor.u32 %v6759_v48, %v5276_v47  ;;  %v6821_v47 = vld [vmem:[%s7641_s15 + $0x2a4] sm:$0xf0] }
 0x21f   : > { %2330 = vmatpush.bf16.msrb.mxu0 %v5141_v12  ;;  %2358 = vmatpush.bf16.msrb.mxu2 %v5145_v15  ;;  %v4981_v12 = vor.u32 %v6686_v2, %v4980_v0  ;;  %v4985_v15 = vor.u32 %v6682_v3, %v4982_v4  ;;  %v4950_v20 = vld [vmem:[%s7662_s6 + $0x30] sm:$0xf0]  ;;  %v6707_v0 = vld [vmem:[%s7662_s6 + $0x11c] sm:$0xf]  ;;  %v5409_v4 = vor.u32 %v6787_v59, %v5406_v60 }
 0x220   : > { %2239 = vmatmul.bf16.vlgmr.msrb.gmra.mxu1 %v8166_v26  ;;  %2267 = vmatmul.bf16.vlgmr.msrb.gmra.mxu3 %v8166_v26  ;;  %v4953_v34 = vor.u32 %v6674_v19, %v4950_v20  ;;  %v5086_v2 = vld [vmem:[%s7662_s6 + $0x138] sm:$0xf0]  ;;  %v8320_v48 = vld [vmem:[%s7664_s23] sm:$0xff] }
 0x221   : > { %2343 = vmatpush.bf16.msrb.mxu1 %v5429_v23  ;;  %2371 = vmatpush.bf16.msrb.mxu3 %v5433_v24  ;;  %v5269_v23 = vor.u32 %v6758_v8, %v5268_v7  ;;  %v5273_v24 = vor.u32 %v6754_v10, %v5270_v11  ;;  %v6779_v7 = vld [vmem:[%s7662_s6 + $0x35c] sm:$0xf]  ;;  %v5089_v11 = vor.u32 %v6707_v0, %v5086_v2 }
 0x222   : > { %v5374_v8 = vld [vmem:[%s7662_s6 + $0x378] sm:$0xf0] }
 0x223   : > { %2331 = vmatpush.bf16.msrb.mxu0 %v5109_v31  ;;  %2359 = vmatpush.bf16.msrb.mxu2 %v5113_v32  ;;  %v6746_v31 = vld [vmem:[%s7662_s6 + $0x254] sm:$0xf]  ;;  %v5377_v20 = vor.u32 %v6779_v7, %v5374_v8  ;;  %v6739_v0 = vld [vmem:[%s7662_s6 + $0x21c] sm:$0xf]  ;;  %v5557_v8 = vld [vmem:[%s7641_s15 + $0x260] sm:$0xf] }
 0x224   : > { %v5238_v32 = vld [vmem:[%s7662_s6 + $0x270] sm:$0xf0]  ;;  %v5214_v2 = vld [vmem:[%s7662_s6 + $0x238] sm:$0xf0] }
 0x225   : > { %2344 = vmatpush.bf16.msrb.mxu1 %v5397_v37  ;;  %2372 = vmatpush.bf16.msrb.mxu3 %v5401_v38  ;;  %v5148_v37 = vld [vmem:[%s7662_s6 + $0x198] sm:$0xf]  ;;  %v5241_v41 = vor.u32 %v6746_v31, %v5238_v32  ;;  %v6691_v31 = vld [vmem:[%s7662_s6 + $0x9c] sm:$0xf] }
 0x226   : > { %v6727_v38 = vld [vmem:[%s7662_s6 + $0x1b4] sm:$0xf0]  ;;  %v5022_v32 = vld [vmem:[%s7662_s6 + $0xb8] sm:$0xf0] }
 0x227   : > { %2332 = vmatpush.bf16.msrb.mxu0 %v5077_v43  ;;  %2360 = vmatpush.bf16.msrb.mxu2 %v5081_v44  ;;  %v5204_v43 = vld [vmem:[%s7662_s6 + $0x210] sm:$0xf]  ;;  %v5149_v50 = vor.u32 %v6727_v38, %v5148_v37  ;;  %v6763_v37 = vld [vmem:[%s7662_s6 + $0x2dc] sm:$0xf] }
 0x228   : > { %v6742_v44 = vld [vmem:[%s7662_s6 + $0x22c] sm:$0xf0]  ;;  %v5310_v38 = vld [vmem:[%s7662_s6 + $0x2f8] sm:$0xf0] }
 0x229   : > { %2345 = vmatpush.bf16.msrb.mxu1 %v5365_v49  ;;  %2373 = vmatpush.bf16.msrb.mxu3 %v5369_v13  ;;  %v6795_v49 = vld [vmem:[%s7662_s6 + $0x3dc] sm:$0xf]  ;;  %v5205_v18 = vor.u32 %v6742_v44, %v5204_v43 }
 0x22a   : > { %2281 = vmatmul.bf16.vlgmr.msra.gmra.mxu0 %v8150_v1  ;;  %2309 = vmatmul.bf16.vlgmr.msra.gmra.mxu2 %v8150_v1  ;;  %v5438_v13 = vld [vmem:[%s7662_s6 + $0x3f8] sm:$0xf0] }
 0x22b   : > { %2333 = vmatpush.bf16.msrb.mxu0 %v5045_v9  ;;  %2361 = vmatpush.bf16.msrb.mxu2 %v5049_v53  ;;  %v5209_v9 = vor.u32 %v6738_v45, %v5206_v46  ;;  %v6719_v53 = vld [vmem:[%s7662_s6 + $0x174] sm:$0xf0]  ;;  %v5441_v56 = vor.u32 %v6795_v49, %v5438_v13  ;;  %v6683_v43 = vld [vmem:[%s7662_s6 + $0x5c] sm:$0xf]  ;;  %v5313_v46 = vor.u32 %v6763_v37, %v5310_v38 }
 0x22c   : > { %v5117_v61 = vor.u32 %v6719_v53, %v5116_v52  ;;  %v4990_v44 = vld [vmem:[%s7662_s6 + $0x78] sm:$0xf0]  ;;  %v4956_v52 = vld [vmem:[%s7662_s6 + $0x18] sm:$0xf] }
 0x22d   : > { %2346 = vmatpush.bf16.msrb.mxu1 %v5333_v57  ;;  %2374 = vmatpush.bf16.msrb.mxu3 %v5337_v58  ;;  %v5404_v57 = vld [vmem:[%s7662_s6 + $0x398] sm:$0xf]  ;;  %v6755_v49 = vld [vmem:[%s7662_s6 + $0x29c] sm:$0xf] }
 0x22e   : > { %v6791_v58 = vld [vmem:[%s7662_s6 + $0x3b4] sm:$0xf0]  ;;  %v5278_v13 = vld [vmem:[%s7662_s6 + $0x2b8] sm:$0xf0] }
 0x22f   : > { %2334 = vmatpush.bf16.msrb.mxu0 %v5013_v30  ;;  %2362 = vmatpush.bf16.msrb.mxu2 %v5017_v63  ;;  %v5084_v30 = vld [vmem:[%s7662_s6 + $0x118] sm:$0xf]  ;;  %v5405_v3 = vor.u32 %v6791_v58, %v5404_v57  ;;  %v4958_v53 = vld [vmem:[%s7662_s6 + $0x38] sm:$0xf0]  ;;  %v5281_v14 = vor.u32 %v6755_v49, %v5278_v13  ;;  %v5509_v13 = vld [vmem:[%s7641_s15 + $0x200] sm:$0xf] }
 0x230   : > { %2295 = vmatmul.bf16.vlgmr.msra.gmra.mxu1 %v8166_v26  ;;  %2323 = vmatmul.bf16.vlgmr.msra.gmra.mxu3 %v8166_v26  ;;  %v6711_v63 = vld [vmem:[%s7662_s6 + $0x134] sm:$0xf0]  ;;  %v6747_v57 = vld [vmem:[%s7662_s6 + $0x25c] sm:$0xf] }
 0x231   : > { %2347 = vmatpush.bf16.msrb.mxu1 %v5301_v5  ;;  %2375 = vmatpush.bf16.msrb.mxu3 %v5305_v6  ;;  %v5372_v5 = vld [vmem:[%s7662_s6 + $0x358] sm:$0xf]  ;;  %v5085_v10 = vor.u32 %v6711_v63, %v5084_v30  ;;  %v5246_v58 = vld [vmem:[%s7662_s6 + $0x278] sm:$0xf0] }
 0x232   : > { %v6783_v6 = vld [vmem:[%s7662_s6 + $0x374] sm:$0xf0] }
 0x233   : > { %2335 = vmatpush.bf16.msrb.mxu0 %v4981_v12  ;;  %2363 = vmatpush.bf16.msrb.mxu2 %v4985_v15  ;;  %v5052_v12 = vld [vmem:[%s7662_s6 + $0xd8] sm:$0xf]  ;;  %v5373_v19 = vor.u32 %v6783_v6, %v5372_v5  ;;  %v5565_v5 = vld [vmem:[%s7641_s15 + $0x270] sm:$0xf]  ;;  %v6815_v6 = vld [vmem:[%s7641_s15 + $0x274] sm:$0xf0] }
 0x234   : > { %v6703_v15 = vld [vmem:[%s7662_s6 + $0xf4] sm:$0xf0]  ;;  %v5566_v7 = vor.u32 %v6815_v6, %v5565_v5  ;;  %v5757_v6 = vld [vmem:[%s7641_s15 + $0x3f0] sm:$0xf] }
 0x235   : > { %2348 = vmatpush.bf16.msrb.mxu1 %v5269_v23  ;;  %2376 = vmatpush.bf16.msrb.mxu3 %v5273_v24  ;;  %v6771_v23 = vld [vmem:[%s7662_s6 + $0x31c] sm:$0xf]  ;;  %v5053_v25 = vor.u32 %v6703_v15, %v5052_v12  ;;  %v5212_v30 = vld [vmem:[%s7662_s6 + $0x218] sm:$0xf]  ;;  %v6831_v12 = vld [vmem:[%s7641_s15 + $0x2f4] sm:$0xf0] }
 0x236   : > { %v5342_v24 = vld [vmem:[%s7662_s6 + $0x338] sm:$0xf0]  ;;  %v6743_v63 = vld [vmem:[%s7662_s6 + $0x234] sm:$0xf0] }
 0x237   : > { %2336 = vmatpush.bf16.msrb.mxu0 %v4949_v33  ;;  %2364 = vmatpush.bf16.msrb.mxu2 %v4953_v34  ;;  %v5341_v33 = vor.u32 %v6775_v22, %v5340_v21  ;;  %v5345_v34 = vor.u32 %v6771_v23, %v5342_v24  ;;  %v5541_v22 = vld [vmem:[%s7641_s15 + $0x240] sm:$0xf]  ;;  %v6809_v23 = vld [vmem:[%s7641_s15 + $0x244] sm:$0xf0] }
 0x238   : > { %v5542_v24 = vor.u32 %v6809_v23, %v5541_v22  ;;  %v6805_v37 = vld [vmem:[%s7641_s15 + $0x224] sm:$0xf0]  ;;  %v1562_v23 = vperm.slane %v8320_v48, 1 }
 0x239   : > { %2349 = vmatpush.bf16.msrb.mxu1 %v5237_v40  ;;  %2377 = vmatpush.bf16.msrb.mxu3 %v5241_v41  ;;  %v5025_v40 = vor.u32 %v6691_v31, %v5022_v32  ;;  %v4988_v41 = vld [vmem:[%s7662_s6 + $0x58] sm:$0xf]  ;;  %v6807_v31 = vld [vmem:[%s7641_s15 + $0x234] sm:$0xf0] }
 0x23a   : > { %2337 = vmatmul.bf16.vlgmr.msrb.gmra.mxu0 %v8150_v1  ;;  %2365 = vmatmul.bf16.vlgmr.msrb.gmra.mxu2 %v8150_v1  ;;  %v5534_v32 = vor.u32 %v6807_v31, %v5533_v29  ;;  %v6817_v5 = vld [vmem:[%s7641_s15 + $0x284] sm:$0xf0] }
 0x23b   : > { %2385 = vmatpush.bf16.msra.mxu0 %v5181_v35  ;;  %2413 = vmatpush.bf16.msra.mxu2 %v5185_v36  ;;  %v5308_v35 = vld [vmem:[%s7662_s6 + $0x2d8] sm:$0xf] }
 0x23c   : > { %v6767_v36 = vld [vmem:[%s7662_s6 + $0x2f4] sm:$0xf0] }
 0x23d   : > { %2350 = vmatpush.bf16.msrb.mxu1 %v5205_v18  ;;  %2378 = vmatpush.bf16.msrb.mxu3 %v5209_v9  ;;  %v5309_v45 = vor.u32 %v6767_v36, %v5308_v35  ;;  %v6679_v18 = vld [vmem:[%s7662_s6 + $0x34] sm:$0xf0]  ;;  %v6675_v9 = vld [vmem:[%s7662_s6 + $0x1c] sm:$0xf]  ;;  %v5525_v36 = vld [vmem:[%s7641_s15 + $0x220] sm:$0xf] }
 0x23e   : > { %v4957_v59 = vor.u32 %v6679_v18, %v4956_v52  ;;  %v4961_v60 = vor.u32 %v6675_v9, %v4958_v53  ;;  %v5526_v38 = vor.u32 %v6805_v37, %v5525_v36  ;;  %v6847_v18 = vld [vmem:[%s7641_s15 + $0x374] sm:$0xf0]  ;;  %v6814_v9 = vld [vmem:[%s7641_s15 + $0x274] sm:$0xf]  ;;  %v5567_v53 = vld [vmem:[%s7641_s15 + $0x278] sm:$0xf0] }
 0x23f   : > { %2386 = vmatpush.bf16.msra.mxu0 %v5149_v50  ;;  %2414 = vmatpush.bf16.msra.mxu2 %v5153_v51  ;;  %v4989_v50 = vor.u32 %v6687_v42, %v4988_v41  ;;  %v4993_v51 = vor.u32 %v6683_v43, %v4990_v44  ;;  %v5517_v42 = vld [vmem:[%s7641_s15 + $0x210] sm:$0xf]  ;;  %v6803_v43 = vld [vmem:[%s7641_s15 + $0x214] sm:$0xf0]  ;;  %v6841_v36 = vld [vmem:[%s7641_s15 + $0x344] sm:$0xf0] }
 0x240   : > { %2351 = vmatmul.bf16.vlgmr.msrb.gmra.mxu1 %v8166_v26  ;;  %2379 = vmatmul.bf16.vlgmr.msrb.gmra.mxu3 %v8166_v26 }
 0x241   : > { %2399 = vmatpush.bf16.msra.mxu1 %v5437_v55  ;;  %2427 = vmatpush.bf16.msra.mxu3 %v5441_v56  ;;  %v5244_v55 = vld [vmem:[%s7662_s6 + $0x258] sm:$0xf] }
 0x242   : > { %v6751_v56 = vld [vmem:[%s7662_s6 + $0x274] sm:$0xf0] }
 0x243   : > { %2387 = vmatpush.bf16.msra.mxu0 %v5117_v61  ;;  %2415 = vmatpush.bf16.msra.mxu2 %v5121_v62  ;;  %v5245_v61 = vor.u32 %v6751_v56, %v5244_v55  ;;  %v5249_v62 = vor.u32 %v6747_v57, %v5246_v58  ;;  %v5581_v55 = vld [vmem:[%s7641_s15 + $0x290] sm:$0xf]  ;;  %v6819_v56 = vld [vmem:[%s7641_s15 + $0x294] sm:$0xf0] }
 0x245   : > { %2400 = vmatpush.bf16.msra.mxu1 %v5405_v3  ;;  %2428 = vmatpush.bf16.msra.mxu3 %v5409_v4  ;;  %v5213_v3 = vor.u32 %v6743_v63, %v5212_v30  ;;  %v5217_v4 = vor.u32 %v6739_v0, %v5214_v2  ;;  %v6812_v0 = vld [vmem:[%s7641_s15 + $0x264] sm:$0xf]  ;;  %v5559_v2 = vld [vmem:[%s7641_s15 + $0x268] sm:$0xf0] }
 0x247   : > { %2388 = vmatpush.bf16.msra.mxu0 %v5085_v10  ;;  %2416 = vmatpush.bf16.msra.mxu2 %v5089_v11  ;;  %v6813_v10 = vld [vmem:[%s7641_s15 + $0x264] sm:$0xf0] }
 0x248   : > { %v5558_v11 = vor.u32 %v6813_v10, %v5557_v8  ;;  %v6863_v8 = vld [vmem:[%s7641_s15 + $0x3f4] sm:$0xf0]  ;;  %v6830_v10 = vld [vmem:[%s7641_s15 + $0x2f4] sm:$0xf] }
 0x249   : > { %2401 = vmatpush.bf16.msra.mxu1 %v5373_v19  ;;  %2429 = vmatpush.bf16.msra.mxu3 %v5377_v20  ;;  %v5621_v19 = vld [vmem:[%s7641_s15 + $0x2e0] sm:$0xf]  ;;  %v6829_v20 = vld [vmem:[%s7641_s15 + $0x2e4] sm:$0xf0] }
 0x24a   : > { %v5622_v21 = vor.u32 %v6829_v20, %v5621_v19  ;;  %v6810_v20 = vld [vmem:[%s7641_s15 + $0x254] sm:$0xf] }
 0x24b   : > { %2389 = vmatpush.bf16.msra.mxu0 %v5053_v25  ;;  %2417 = vmatpush.bf16.msra.mxu2 %v5057_v27  ;;  %v5613_v25 = vld [vmem:[%s7641_s15 + $0x2d0] sm:$0xf]  ;;  %v6827_v27 = vld [vmem:[%s7641_s15 + $0x2d4] sm:$0xf0] }
 0x24c   : > { %v5614_v28 = vor.u32 %v6827_v27, %v5613_v25  ;;  %v5749_v25 = vld [vmem:[%s7641_s15 + $0x3e0] sm:$0xf]  ;;  %v6861_v27 = vld [vmem:[%s7641_s15 + $0x3e4] sm:$0xf0] }
 0x24d   : > { %2402 = vmatpush.bf16.msra.mxu1 %v5341_v33  ;;  %2430 = vmatpush.bf16.msra.mxu3 %v5345_v34  ;;  %v5605_v33 = vld [vmem:[%s7641_s15 + $0x2c0] sm:$0xf]  ;;  %v6825_v34 = vld [vmem:[%s7641_s15 + $0x2c4] sm:$0xf0]  ;;  %v5750_v31 = vor.u32 %v6861_v27, %v5749_v25  ;;  %v6835_v25 = vld [vmem:[%s7641_s15 + $0x314] sm:$0xf0] }
 0x24e   : > { %v5606_v35 = vor.u32 %v6825_v34, %v5605_v33  ;;  %v5623_v33 = vld [vmem:[%s7641_s15 + $0x2e8] sm:$0xf0] }
 0x24f   : > { %2390 = vmatpush.bf16.msra.mxu0 %v5021_v39  ;;  %2418 = vmatpush.bf16.msra.mxu2 %v5025_v40  ;;  %v5597_v39 = vld [vmem:[%s7641_s15 + $0x2b0] sm:$0xf]  ;;  %v6823_v40 = vld [vmem:[%s7641_s15 + $0x2b4] sm:$0xf0] }
 0x250   : > { %v5598_v41 = vor.u32 %v6823_v40, %v5597_v39  ;;  %v6808_v39 = vld [vmem:[%s7641_s15 + $0x244] sm:$0xf]  ;;  %v5543_v40 = vld [vmem:[%s7641_s15 + $0x248] sm:$0xf0] }
 0x251   : > { %2403 = vmatpush.bf16.msra.mxu1 %v5309_v45  ;;  %2431 = vmatpush.bf16.msra.mxu3 %v5313_v46  ;;  %v5518_v45 = vor.u32 %v6803_v43, %v5517_v42  ;;  %v5589_v46 = vld [vmem:[%s7641_s15 + $0x2a0] sm:$0xf]  ;;  %v1563_v42 = vperm.slane %v8320_v48, 2  ;;  %v5546_v43 = vor.u32 %v6808_v39, %v5543_v40 }
 0x252   : > { %v5590_v49 = vor.u32 %v6821_v47, %v5589_v46  ;;  %v6826_v47 = vld [vmem:[%s7641_s15 + $0x2d4] sm:$0xf] }
 0x253   : > { %2391 = vmatpush.bf16.msra.mxu0 %v4989_v50  ;;  %2419 = vmatpush.bf16.msra.mxu2 %v4993_v51  ;;  %v6801_v50 = vld [vmem:[%s7641_s15 + $0x204] sm:$0xf0]  ;;  %v5693_v51 = vld [vmem:[%s7641_s15 + $0x370] sm:$0xf] }
 0x254   : > { %v5510_v52 = vor.u32 %v6801_v50, %v5509_v13 }
 0x255   : > { %2404 = vmatpush.bf16.msra.mxu1 %v5277_v54  ;;  %2432 = vmatpush.bf16.msra.mxu3 %v5281_v14  ;;  %v5694_v54 = vor.u32 %v6847_v18, %v5693_v51  ;;  %v5570_v14 = vor.u32 %v6814_v9, %v5567_v53  ;;  %v6839_v18 = vld [vmem:[%s7641_s15 + $0x334] sm:$0xf0] }
 0x257   : > { %2392 = vmatpush.bf16.msra.mxu0 %v4957_v59  ;;  %2420 = vmatpush.bf16.msra.mxu2 %v4961_v60  ;;  %v5582_v59 = vor.u32 %v6819_v56, %v5581_v55  ;;  %v1561_v60 = vperm.slane %v8320_v48, 0 }
 0x259   : > { %2405 = vmatpush.bf16.msra.mxu1 %v5245_v61  ;;  %2433 = vmatpush.bf16.msra.mxu3 %v5249_v62  ;;  %v5685_v61 = vld [vmem:[%s7641_s15 + $0x360] sm:$0xf]  ;;  %v6845_v62 = vld [vmem:[%s7641_s15 + $0x364] sm:$0xf0] }
 0x25a   : > { %2393 = vmatmul.bf16.vlgmr.msra.gmra.mxu0 %v8150_v1  ;;  %2421 = vmatmul.bf16.vlgmr.msra.gmra.mxu2 %v8150_v1  ;;  %v5629_v1 = vld [vmem:[%s7641_s15 + $0x2f0] sm:$0xf]  ;;  %v5686_v63 = vor.u32 %v6845_v62, %v5685_v61 }
 0x25b   : > { %2887 = vmatpush.bf16.msrb.mxu0 %v5566_v7  ;;  %v5630_v15 = vor.u32 %v6831_v12, %v5629_v1  ;;  %2915 = vmatpush.bf16.msrb.mxu2 %v5694_v54  ;;  %v5758_v12 = vor.u32 %v6863_v8, %v5757_v6  ;;  %v6806_v54 = vld [vmem:[%s7641_s15 + $0x234] sm:$0xf]  ;;  %v6837_v6 = vld [vmem:[%s7641_s15 + $0x324] sm:$0xf0] }
 0x25d   : > { %2406 = vmatpush.bf16.msra.mxu1 %v5213_v3  ;;  %2434 = vmatpush.bf16.msra.mxu3 %v5217_v4  ;;  %v5562_v3 = vor.u32 %v6812_v0, %v5559_v2  ;;  %v5573_v4 = vld [vmem:[%s7641_s15 + $0x280] sm:$0xf] }
 0x25e   : > { %v5574_v7 = vor.u32 %v6817_v5, %v5573_v4  ;;  %v5653_v5 = vld [vmem:[%s7641_s15 + $0x320] sm:$0xf] }
 0x25f   : > { %2888 = vmatpush.bf16.msrb.mxu0 %v5558_v11  ;;  %v5631_v11 = vld [vmem:[%s7641_s15 + $0x2f8] sm:$0xf0]  ;;  %2916 = vmatpush.bf16.msrb.mxu2 %v5686_v63  ;;  %v5607_v63 = vld [vmem:[%s7641_s15 + $0x2c8] sm:$0xf0]  ;;  %v5654_v8 = vor.u32 %v6837_v6, %v5653_v5  ;;  %v6844_v5 = vld [vmem:[%s7641_s15 + $0x364] sm:$0xf] }
 0x260   : > { %2407 = vmatmul.bf16.vlgmr.msra.gmra.mxu1 %v8166_v26  ;;  %2435 = vmatmul.bf16.vlgmr.msra.gmra.mxu3 %v8166_v26  ;;  %v6811_v26 = vld [vmem:[%s7641_s15 + $0x254] sm:$0xf0]  ;;  %v5687_v6 = vld [vmem:[%s7641_s15 + $0x368] sm:$0xf0] }
 0x261   : > { %2901 = vmatpush.bf16.msrb.mxu1 %v5630_v15  ;;  %v5550_v17 = vor.u32 %v6811_v26, %v5549_v16  ;;  %v5634_v15 = vor.u32 %v6830_v10, %v5631_v11  ;;  %v5677_v16 = vld [vmem:[%s7641_s15 + $0x350] sm:$0xf]  ;;  %v6843_v26 = vld [vmem:[%s7641_s15 + $0x354] sm:$0xf0]  ;;  %2929 = vmatpush.bf16.msrb.mxu3 %v5758_v12  ;;  %v6804_v10 = vld [vmem:[%s7641_s15 + $0x224] sm:$0xf] }
 0x262   : > { %v5678_v19 = vor.u32 %v6843_v26, %v5677_v16  ;;  %v5527_v11 = vld [vmem:[%s7641_s15 + $0x228] sm:$0xf0]  ;;  %v5725_v12 = vld [vmem:[%s7641_s15 + $0x3b0] sm:$0xf] }
 0x263   : > { %2889 = vmatpush.bf16.msrb.mxu0 %v5550_v17 }
 0x264   : > { %2917 = vmatpush.bf16.msrb.mxu2 %v5678_v19  ;;  %v6822_v19 = vld [vmem:[%s7641_s15 + $0x2b4] sm:$0xf] }
 0x265   : > { %2902 = vmatpush.bf16.msrb.mxu1 %v5622_v21  ;;  %v5551_v21 = vld [vmem:[%s7641_s15 + $0x258] sm:$0xf0]  ;;  %2930 = vmatpush.bf16.msrb.mxu3 %v5750_v31 }
 0x267   : > { %2890 = vmatpush.bf16.msrb.mxu0 %v5542_v24  ;;  %v5554_v24 = vor.u32 %v6810_v20, %v5551_v21  ;;  %v5599_v20 = vld [vmem:[%s7641_s15 + $0x2b8] sm:$0xf0] }
 0x269   : > { %2903 = vmatpush.bf16.msrb.mxu1 %v5614_v28 }
 0x26b   : > { %2891 = vmatpush.bf16.msrb.mxu0 %v5534_v32  ;;  %v6828_v32 = vld [vmem:[%s7641_s15 + $0x2e4] sm:$0xf] }
 0x26c   : > { %v5626_v34 = vor.u32 %v6828_v32, %v5623_v33 }
 0x26d   : > { %2904 = vmatpush.bf16.msrb.mxu1 %v5606_v35  ;;  %v5669_v35 = vld [vmem:[%s7641_s15 + $0x340] sm:$0xf] }
 0x26f   : > { %2892 = vmatpush.bf16.msrb.mxu0 %v5526_v38  ;;  %v5670_v38 = vor.u32 %v6841_v36, %v5669_v35  ;;  %v5717_v36 = vld [vmem:[%s7641_s15 + $0x3a0] sm:$0xf] }
 0x271   : > { %2905 = vmatpush.bf16.msrb.mxu1 %v5598_v41  ;;  %2918 = vmatpush.bf16.msrb.mxu2 %v5670_v38 }
 0x273   : > { %2893 = vmatpush.bf16.msrb.mxu0 %v5518_v45  ;;  %v6859_v45 = vld [vmem:[%s7641_s15 + $0x3d4] sm:$0xf0] }
 0x275   : > { %2906 = vmatpush.bf16.msrb.mxu1 %v5590_v49  ;;  %v5615_v49 = vld [vmem:[%s7641_s15 + $0x2d8] sm:$0xf0] }
 0x276   : > { %v5618_v51 = vor.u32 %v6826_v47, %v5615_v49  ;;  %v6833_v47 = vld [vmem:[%s7641_s15 + $0x304] sm:$0xf0] }
 0x277   : > { %2894 = vmatpush.bf16.msrb.mxu0 %v5510_v52  ;;  %v5661_v52 = vld [vmem:[%s7641_s15 + $0x330] sm:$0xf] }
 0x278   : > { %v5662_v53 = vor.u32 %v6839_v18, %v5661_v52 }
 0x279   : > { %2907 = vmatpush.bf16.msrb.mxu1 %v5582_v59  ;;  %v6857_v59 = vld [vmem:[%s7641_s15 + $0x3c4] sm:$0xf0] }
 0x27a   : > { %2919 = vmatpush.bf16.msrb.mxu2 %v5662_v53  ;;  %v6846_v53 = vld [vmem:[%s7641_s15 + $0x374] sm:$0xf] }
 0x27b   : > { %2943 = vmatpush.bf16.msra.mxu0 %v5570_v14  ;;  %v5535_v14 = vld [vmem:[%s7641_s15 + $0x238] sm:$0xf0] }
 0x27d   : > { %2908 = vmatpush.bf16.msrb.mxu1 %v5574_v7 }
 0x27e   : > { %2920 = vmatpush.bf16.msrb.mxu2 %v5654_v8  ;;  %v651_v8 = vld [vmem:[%s9016_s29] sm:$0xff] }
 0x27f   : > { %2944 = vmatpush.bf16.msra.mxu0 %v5562_v3  ;;  %v1564_v3 = vperm.slane %v8320_v48, 3 }
 0x281   : > { %2957 = vmatpush.bf16.msra.mxu1 %v5634_v15  ;;  %v6855_v15 = vld [vmem:[%s7641_s15 + $0x3b4] sm:$0xf0] }
 0x283   : > { %2945 = vmatpush.bf16.msra.mxu0 %v5554_v24  ;;  %v5645_v24 = vld [vmem:[%s7641_s15 + $0x310] sm:$0xf] }
 0x284   : > { %v5646_v31 = vor.u32 %v6835_v25, %v5645_v24  ;;  %v6862_v24 = vld [vmem:[%s7641_s15 + $0x3f4] sm:$0xf]  ;;  %v5759_v25 = vld [vmem:[%s7641_s15 + $0x3f8] sm:$0xf0] }
 0x285   : > { %2958 = vmatpush.bf16.msra.mxu1 %v5626_v34 }
 0x286   : > { %2921 = vmatpush.bf16.msrb.mxu2 %v5646_v31  ;;  %v1566_v31 = vperm.slane %v8320_v48, 5 }
 0x287   : > { %2946 = vmatpush.bf16.msra.mxu0 %v5546_v43  ;;  %v5591_v43 = vld [vmem:[%s7641_s15 + $0x2a8] sm:$0xf0] }
 0x289   : > { %2959 = vmatpush.bf16.msra.mxu1 %v5618_v51  ;;  %v5511_v51 = vld [vmem:[%s7641_s15 + $0x208] sm:$0xf0] }
 0x297   : > { %v2226_v44 = vpop.f32.mrf.mxu0 }
 0x298   : > { %v2227_v1 = vadd.f32 %v2226_v44, %v1561_v60  ;;  %v5741_v44 = vld [vmem:[%s7641_s15 + $0x3d0] sm:$0xf] }
 0x299   : > { %v5742_v46 = vor.u32 %v6859_v45, %v5741_v44  ;;  %v1565_v45 = vperm.slane %v8320_v48, 4 }
 0x29b   : > { %2931 = vmatpush.bf16.msrb.mxu3 %v5742_v46  ;;  %v5637_v46 = vld [vmem:[%s7641_s15 + $0x300] sm:$0xf] }
 0x29d   : > { %v2240_v57 = vpop.f32.mrf.mxu1  ;;  %v2254_v58 = vpop.f32.mrf.mxu2 }
 0x29e   : > { %v2241_v22 = vadd.f32 %v2240_v57, %v2227_v1  ;;  %v2255_v41 = vadd.f32 %v2254_v58, %v1562_v23  ;;  %v5538_v57 = vor.u32 %v6806_v54, %v5535_v14  ;;  %v5733_v58 = vld [vmem:[%s7641_s15 + $0x3c0] sm:$0xf]  ;;  %v5530_v1 = vor.u32 %v6804_v10, %v5527_v11  ;;  %v5695_v54 = vld [vmem:[%s7641_s15 + $0x378] sm:$0xf0]  ;;  %v5709_v14 = vld [vmem:[%s7641_s15 + $0x390] sm:$0xf] }
 0x29f   : > { %v2228_v30 = vpop.f32.mrf.mxu0  ;;  %v5734_v62 = vor.u32 %v6857_v59, %v5733_v58  ;;  %v5698_v58 = vor.u32 %v6846_v53, %v5695_v54  ;;  %v6851_v59 = vld [vmem:[%s7641_s15 + $0x394] sm:$0xf0]  ;;  %v5690_v10 = vor.u32 %v6844_v5, %v5687_v6  ;;  %v5701_v11 = vld [vmem:[%s7641_s15 + $0x380] sm:$0xf]  ;;  %v5735_v5 = vld [vmem:[%s7641_s15 + $0x3c8] sm:$0xf0] }
 0x2a0   : > { %7093 = vtanh.f32 %v2241_v22  ;;  %v2229_v13 = vadd.f32 %v2228_v30, %v1561_v60  ;;  %v6824_v30 = vld [vmem:[%s7641_s15 + $0x2c4] sm:$0xf]  ;;  %2947 = vmatpush.bf16.msra.mxu0 %v5538_v57  ;;  %v5602_v22 = vor.u32 %v6822_v19, %v5599_v20  ;;  %v5575_v19 = vld [vmem:[%s7641_s15 + $0x288] sm:$0xf0] }
 0x2a1   : > { %v5610_v4 = vor.u32 %v6824_v30, %v5607_v63  ;;  %2932 = vmatpush.bf16.msrb.mxu3 %v5734_v62  ;;  %v5710_v62 = vor.u32 %v6851_v59, %v5709_v14  ;;  %v5583_v30 = vld [vmem:[%s7641_s15 + $0x298] sm:$0xf0] }
 0x2a3   : > { %v2268_v17 = vpop.f32.mrf.mxu3  ;;  %2960 = vmatpush.bf16.msra.mxu1 %v5610_v4 }
 0x2a4   : > { %v2269_v50 = vadd.f32 %v2268_v17, %v2255_v41  ;;  %v5726_v17 = vor.u32 %v6855_v15, %v5725_v12  ;;  %2948 = vmatpush.bf16.msra.mxu0 %v5530_v1  ;;  %v6820_v41 = vld [vmem:[%s7641_s15 + $0x2a4] sm:$0xf]  ;;  %v6849_v1 = vld [vmem:[%s7641_s15 + $0x384] sm:$0xf0] }
 0x2a5   : > { %v2242_v28 = vpop.f32.mrf.mxu1  ;;  %v8348_v29 = vpop.f32.mrf.mxu2 }
 0x2a6   : > { %v2243_v55 = vadd.f32 %v2242_v28, %v2229_v13  ;;  %v8373_v0 = vpop.eup %7093  ;;  %7095 = vtanh.f32 %v2269_v50  ;;  %v2257_v26 = vadd.f32 %v8348_v29, %v1562_v23  ;;  %v6802_v23 = vld [vmem:[%s7641_s15 + $0x214] sm:$0xf]  ;;  %v5519_v29 = vld [vmem:[%s7641_s15 + $0x218] sm:$0xf0]  ;;  %2933 = vmatpush.bf16.msrb.mxu3 %v5726_v17  ;;  %v5594_v13 = vor.u32 %v6820_v41, %v5591_v43  ;;  %v6800_v50 = vld [vmem:[%s7641_s15 + $0x204] sm:$0xf] }
 0x2a7   : > { %v2282_v37 = vpop.f32.mrf.mxu0  ;;  %v2449_v16 = vmul.f32 1.442695, %v8373_v0  ;;  %2961 = vmatpush.bf16.msra.mxu1 %v5602_v22  ;;  %v5522_v35 = vor.u32 %v6802_v23, %v5519_v29  ;;  %v5514_v57 = vor.u32 %v6800_v50, %v5511_v51  ;;  %v6816_v17 = vld [vmem:[%s7641_s15 + $0x284] sm:$0xf]  ;;  %v6842_v23 = vld [vmem:[%s7641_s15 + $0x354] sm:$0xf] }
 0x2a8   : > { %v2283_v56 = vadd.f32 %v2282_v37, %v1563_v42  ;;  %7097 = vtanh.f32 %v2243_v55  ;;  %v6853_v37 = vld [vmem:[%s7641_s15 + $0x3a4] sm:$0xf0]  ;;  %v5578_v22 = vor.u32 %v6816_v17, %v5575_v19  ;;  %v5679_v29 = vld [vmem:[%s7641_s15 + $0x358] sm:$0xf0]  ;;  %v6854_v19 = vld [vmem:[%s7641_s15 + $0x3b4] sm:$0xf] }
 0x2a9   : > { %v5718_v40 = vor.u32 %v6853_v37, %v5717_v36  ;;  %2949 = vmatpush.bf16.msra.mxu0 %v5522_v35  ;;  %v5682_v35 = vor.u32 %v6842_v23, %v5679_v29  ;;  %v652_v43 = vld [vmem:[%s9016_s29 + $0x8] sm:$0xff]  ;;  %v6832_v29 = vld [vmem:[%s7641_s15 + $0x304] sm:$0xf] }
 0x2aa   : > { %v5719_v23 = vld [vmem:[%s7641_s15 + $0x3a8] sm:$0xf0] }
 0x2ab   : > { %v2270_v9 = vpop.f32.mrf.mxu3  ;;  %2934 = vmatpush.bf16.msrb.mxu3 %v5718_v40  ;;  %2962 = vmatpush.bf16.msra.mxu1 %v5594_v13  ;;  %v5671_v13 = vld [vmem:[%s7641_s15 + $0x348] sm:$0xf0] }
 0x2ac   : > { %v2271_v27 = vadd.f32 %v2270_v9, %v2257_v26  ;;  %v7096_v32 = vpop.eup %7095  ;;  %v5638_v9 = vor.u32 %v6833_v47, %v5637_v46  ;;  %v5702_v26 = vor.u32 %v6849_v1, %v5701_v11  ;;  %v6836_v1 = vld [vmem:[%s7641_s15 + $0x324] sm:$0xf] }
 0x2ad   : > { %v2296_v60 = vpop.f32.mrf.mxu1  ;;  %v2310_v61 = vpop.f32.mrf.mxu2  ;;  %v2451_v49 = vmul.f32 1.442695, %v7096_v32  ;;  %2950 = vmatpush.bf16.msra.mxu0 %v5514_v57  ;;  %v5743_v57 = vld [vmem:[%s7641_s15 + $0x3d8] sm:$0xf0] }
 0x2ae   : > { %v2297_v2 = vadd.f32 %v2296_v60, %v2283_v56  ;;  %v2311_v21 = vadd.f32 %v2310_v61, %v1564_v3  ;;  %v8400_v44 = vpop.eup %7097  ;;  %v2481_v56 = vadd.f32 %v7096_v32, %v8373_v0  ;;  %v6818_v60 = vld [vmem:[%s7641_s15 + $0x294] sm:$0xf]  ;;  %2922 = vmatpush.bf16.msrb.mxu2 %v5638_v9 }
 0x2af   : > { %v2284_v7 = vpop.f32.mrf.mxu0  ;;  %v2457_v55 = vmul.f32 1.442695, %v8400_v44  ;;  %v5586_v4 = vor.u32 %v6818_v60, %v5583_v30  ;;  %2935 = vmatpush.bf16.msrb.mxu3 %v5710_v62  ;;  %v6838_v30 = vld [vmem:[%s7641_s15 + $0x334] sm:$0xf] }
 0x2b0   : > { %7099 = vtanh.f32 %v2297_v2  ;;  %v2285_v33 = vadd.f32 %v2284_v7, %v1563_v42 }
 0x2b1   : > { %7101 = vpow2.f32 %v2449_v16  ;;  %2963 = vmatpush.bf16.msra.mxu1 %v5586_v4  ;;  %v6856_v4 = vld [vmem:[%s7641_s15 + $0x3c4] sm:$0xf] }
 0x2b2   : > { %2971 = vmatpush.bf16.msra.mxu2 %v5698_v58 }
 0x2b3   : > { %v2324_v28 = vpop.f32.mrf.mxu3  ;;  %2936 = vmatpush.bf16.msrb.mxu3 %v5702_v26 }
 0x2b4   : > { %v2325_v34 = vadd.f32 %v2324_v28, %v2311_v21 }
 0x2b5   : > { %v2298_v38 = vpop.f32.mrf.mxu1  ;;  %v2312_v39 = vpop.f32.mrf.mxu2  ;;  %2964 = vmatpush.bf16.msra.mxu1 %v5578_v22 }
 0x2b6   : > { %7103 = vtanh.f32 %v2325_v34  ;;  %v2299_v42 = vadd.f32 %v2298_v38, %v2285_v33  ;;  %v8407_v52 = vpop.eup %7099  ;;  %v2313_v61 = vadd.f32 %v2312_v39, %v1564_v3  ;;  %2972 = vmatpush.bf16.msra.mxu2 %v5690_v10  ;;  %v5762_v34 = vor.u32 %v6862_v24, %v5759_v25  ;;  %v6860_v38 = vld [vmem:[%s7641_s15 + $0x3e4] sm:$0xf]  ;;  %v5751_v39 = vld [vmem:[%s7641_s15 + $0x3e8] sm:$0xf0]  ;;  %v6834_v25 = vld [vmem:[%s7641_s15 + $0x314] sm:$0xf] }
 0x2b7   : > { %7105 = vtanh.f32 %v2271_v27  ;;  %v2338_v18 = vpop.f32.mrf.mxu0  ;;  %v7102_v63 = vpop.eup %7101  ;;  %v2482_v0 = vadd.f32 %v8407_v52, %v2481_v56  ;;  %v6858_v56 = vld [vmem:[%s7641_s15 + $0x3d4] sm:$0xf] }
 0x2b8   : > { %7107 = vtanh.f32 %v2299_v42  ;;  %v2339_v15 = vadd.f32 %v2338_v18, %v1565_v45  ;;  %v2465_v28 = vmul.f32 %v7102_v63, %v651_v8  ;;  %2985 = vmatpush.bf16.msra.mxu3 %v5762_v34  ;;  %v5754_v42 = vor.u32 %v6860_v38, %v5751_v39  ;;  %v655_v18 = vld [vmem:[%s9016_s29 + $0x20] sm:$0xff]  ;;  %v5663_v63 = vld [vmem:[%s7641_s15 + $0x338] sm:$0xf0] }
 0x2b9   : > { %7109 = vpow2.f32 %v2451_v49  ;;  %v6840_v49 = vld [vmem:[%s7641_s15 + $0x344] sm:$0xf]  ;;  %v5746_v59 = vor.u32 %v6858_v56, %v5743_v57  ;;  %v5738_v8 = vor.u32 %v6856_v4, %v5735_v5  ;;  %v654_v56 = vld [vmem:[%s9016_s29 + $0x18] sm:$0xff] }
 0x2ba   : > { %7111 = vpow2.f32 %v2457_v55  ;;  %2973 = vmatpush.bf16.msra.mxu2 %v5682_v35  ;;  %v5674_v9 = vor.u32 %v6840_v49, %v5671_v13  ;;  %v5703_v49 = vld [vmem:[%s7641_s15 + $0x388] sm:$0xf0]  ;;  %v658_v5 = vld [vmem:[%s9016_s29 + $0x38] sm:$0xff] }
 0x2bb   : > { %v2326_v2 = vpop.f32.mrf.mxu3 }
 0x2bc   : > { %v8422_v7 = vpop.eup %7103  ;;  %v2327_v3 = vadd.f32 %v2326_v2, %v2313_v61  ;;  %2986 = vmatpush.bf16.msra.mxu3 %v5754_v42  ;;  %v5666_v2 = vor.u32 %v6838_v30, %v5663_v63 }
 0x2bd   : > { %v7106_v12 = vpop.eup %7105  ;;  %v2483_v16 = vadd.f32 %v8422_v7, %v2482_v0  ;;  %v2352_v20 = vpop.f32.mrf.mxu1  ;;  %v2455_v38 = vmul.f32 1.442695, %v8422_v7 }
 0x2be   : > { %7113 = vtanh.f32 %v2327_v3  ;;  %v2366_v21 = vpop.f32.mrf.mxu2  ;;  %v2353_v27 = vadd.f32 %v2352_v20, %v2339_v15  ;;  %v8439_v32 = vpop.eup %7107  ;;  %v2459_v33 = vmul.f32 1.442695, %v7106_v12  ;;  %v2486_v37 = vadd.f32 %v7106_v12, %v8400_v44  ;;  %2974 = vmatpush.bf16.msra.mxu2 %v5674_v9  ;;  %v656_v3 = vld [vmem:[%s9016_s29 + $0x28] sm:$0xff]  ;;  %v5727_v20 = vld [vmem:[%s7641_s15 + $0x3b8] sm:$0xf0] }
 0x2bf   : > { %2484 = vadd.xlane.f32.xlu0 %v2483_v16  ;;  %v7110_v40 = vpop.eup %7109  ;;  %v2340_v41 = vpop.f32.mrf.mxu0  ;;  %v2367_v47 = vadd.f32 %v2366_v21, %v1566_v31  ;;  %v5655_v12 = vld [vmem:[%s7641_s15 + $0x328] sm:$0xf0]  ;;  %v2453_v21 = vmul.f32 1.442695, %v8407_v52  ;;  %v5730_v22 = vor.u32 %v6854_v19, %v5727_v20  ;;  %v5856_v19 = vld [vmem:[%s7654_s14 + $0x178] sm:$0xf0] }
 0x2c0   : > { %v2473_v36 = vadd.f32 %v2465_v28, %v2353_v27  ;;  %v7112_v46 = vpop.eup %7111  ;;  %v2487_v44 = vadd.f32 %v8439_v32, %v2486_v37  ;;  %7115 = vpow2.f32 %v2459_v33  ;;  %v2341_v53 = vadd.f32 %v2340_v41, %v1565_v45  ;;  %2987 = vmatpush.bf16.msra.mxu3 %v5746_v59  ;;  %v5647_v27 = vld [vmem:[%s7641_s15 + $0x318] sm:$0xf0]  ;;  %v6852_v28 = vld [vmem:[%s7641_s15 + $0x3a4] sm:$0xf]  ;;  %v5639_v33 = vld [vmem:[%s7641_s15 + $0x308] sm:$0xf0] }
 0x2c1   : > { %v2466_v14 = vmul.f32 %v7110_v40, %v652_v43  ;;  %v2469_v62 = vmul.f32 %v7112_v46, %v655_v18  ;;  %v5658_v16 = vor.u32 %v6836_v1, %v5655_v12  ;;  %7117 = vpow2.f32 %v2453_v21  ;;  %v5711_v37 = vld [vmem:[%s7641_s15 + $0x398] sm:$0xf0]  ;;  %v653_v46 = vld [vmem:[%s9016_s29 + $0x10] sm:$0xff]  ;;  %v5846_v21 = vld [vmem:[%s7654_s14 + $0x160] sm:$0xf] }
 0x2c2   : > { %4337 = vst [vmem:[%s9016_s29] sm:$0xff] %v2473_v36  ;;  %2975 = vmatpush.bf16.msra.mxu2 %v5666_v2  ;;  %v5722_v52 = vor.u32 %v6852_v28, %v5719_v23  ;;  %v5642_v35 = vor.u32 %v6832_v29, %v5639_v33  ;;  %v1567_v40 = vperm.slane %v8320_v48, 6  ;;  %v2461_v41 = vmul.f32 1.442695, %v8439_v32  ;;  %v6875_v23 = vld [vmem:[%s7654_s14 + $0x154] sm:$0xf0] }
 0x2c3   : > { %v2380_v51 = vpop.f32.mrf.mxu3  ;;  %7119 = vpow2.f32 %v2455_v38  ;;  %v1568_v32 = vperm.slane %v8320_v48, 7  ;;  %v657_v48 = vld [vmem:[%s9016_s29 + $0x30] sm:$0xff]  ;;  %v6874_v29 = vld [vmem:[%s7654_s14 + $0x154] sm:$0xf] }
 0x2c4   : > { %v8453_v50 = vpop.eup %7113  ;;  %v2381_v54 = vadd.f32 %v2380_v51, %v2367_v47  ;;  %2988 = vmatpush.bf16.msra.mxu3 %v5738_v8  ;;  %7121 = vpow2.f32 %v2461_v41  ;;  %v5822_v41 = vld [vmem:[%s7654_s14 + $0x130] sm:$0xf] }
 0x2c5   : > { %v2488_v55 = vadd.f32 %v8453_v50, %v2487_v44  ;;  %v2354_v58 = vpop.f32.mrf.mxu1  ;;  %v6848_v44 = vld [vmem:[%s7641_s15 + $0x384] sm:$0xf] }
 0x2c6   : > { %v2474_v60 = vadd.f32 %v2466_v14, %v2381_v54  ;;  %v2355_v61 = vadd.f32 %v2354_v58, %v2341_v53  ;;  %v2368_v45 = vpop.f32.mrf.mxu2  ;;  %v7116_v6 = vpop.eup %7115  ;;  %2976 = vmatpush.bf16.msra.mxu2 %v5658_v16  ;;  %v5706_v51 = vor.u32 %v6848_v44, %v5703_v49  ;;  %v2463_v53 = vmul.f32 1.442695, %v8453_v50  ;;  %v6879_v16 = vld [vmem:[%s7654_s14 + $0x174] sm:$0xf0]  ;;  %v6870_v44 = vld [vmem:[%s7654_s14 + $0x134] sm:$0xf] }
 0x2c7   : > { %2489 = vadd.xlane.f32.xlu0 %v2488_v55  ;;  %v2369_v11 = vadd.f32 %v2368_v45, %v1566_v31  ;;  %v2470_v17 = vmul.f32 %v7116_v6, %v656_v3  ;;  %v5650_v31 = vor.u32 %v6834_v25, %v5647_v27  ;;  %v7118_v42 = vpop.eup %7117  ;;  %v5848_v27 = vld [vmem:[%s7654_s14 + $0x168] sm:$0xf0]  ;;  %v5824_v49 = vld [vmem:[%s7654_s14 + $0x138] sm:$0xf0] }
 0x2c8   : > { %4338 = vst [vmem:[%s9016_s29 + $0x8] sm:$0xff] %v2474_v60  ;;  %v2477_v0 = vadd.f32 %v2469_v62, %v2355_v61  ;;  %2989 = vmatpush.bf16.msra.mxu3 %v5730_v22  ;;  %v2467_v9 = vmul.f32 %v7118_v42, %v653_v46  ;;  %7123 = vpow2.f32 %v2463_v53  ;;  %v6877_v22 = vld [vmem:[%s7654_s14 + $0x164] sm:$0xf0]  ;;  %v5918_v42 = vld [vmem:[%s7654_s14 + $0x1f0] sm:$0xf] }
 0x2c9   : > { %v7120_v14 = vpop.eup %7119  ;;  %v5847_v25 = vor.u32 %v6877_v22, %v5846_v21  ;;  %v6869_v53 = vld [vmem:[%s7654_s14 + $0x124] sm:$0xf0]  ;;  %v5896_v21 = vld [vmem:[%s7654_s14 + $0x1c8] sm:$0xf0] }
 0x2ca   : > { %v2491_v10 = vpack.c.bf16 %v2477_v0, %v2473_v36  ;;  %4341 = vst [vmem:[%s9016_s29 + $0x20] sm:$0xff] %v2477_v0  ;;  %2977 = vmatpush.bf16.msra.mxu2 %v5650_v31  ;;  %v6850_v36 = vld [vmem:[%s7641_s15 + $0x394] sm:$0xf]  ;;  %v7122_v58 = vpop.eup %7121  ;;  %v2468_v61 = vmul.f32 %v7120_v14, %v654_v56  ;;  %v5838_v31 = vld [vmem:[%s7654_s14 + $0x150] sm:$0xf]  ;;  %s9017_s15 = sld [smem:[#allocation27_spill]] }
 0x2cb   : > { %v2382_v15 = vpop.f32.mrf.mxu3  ;;  %v5714_v43 = vor.u32 %v6850_v36, %v5711_v37  ;;  %v2471_v45 = vmul.f32 %v7122_v58, %v657_v48  ;;  %v5839_v33 = vor.u32 %v6875_v23, %v5838_v31  ;;  %v6873_v36 = vld [vmem:[%s7654_s14 + $0x144] sm:$0xf0]  ;;  %v6872_v37 = vld [vmem:[%s7654_s14 + $0x144] sm:$0xf]  ;;  %v5888_v31 = vld [vmem:[%s7654_s14 + $0x1b8] sm:$0xf0] }
 0x2cc   : > { %v2383_v26 = vadd.f32 %v2382_v15, %v2369_v11  ;;  %2895 = vmatmul.bf16.vlgmr.msrb.gmra.mxu0 %v2491_v10  ;;  %2990 = vmatpush.bf16.msra.mxu3 %v5722_v52  ;;  %v5854_v15 = vld [vmem:[%s7654_s14 + $0x170] sm:$0xf]  ;;  %v6868_v56 = vld [vmem:[%s7654_s14 + $0x124] sm:$0xf] }
 0x2cd   : > { %v6892_v48 = vld [vmem:[%s7654_s14 + $0x1e4] sm:$0xf] }
 0x2ce   : > { %v2478_v24 = vadd.f32 %v2470_v17, %v2383_v26  ;;  %2978 = vmatpush.bf16.msra.mxu2 %v5642_v35  ;;  %v7124_v4 = vpop.eup %7123  ;;  %v6878_v26 = vld [vmem:[%s7654_s14 + $0x174] sm:$0xf]  ;;  %v5855_v17 = vor.u32 %v6879_v16, %v5854_v15  ;;  %v5830_v35 = vld [vmem:[%s7654_s14 + $0x140] sm:$0xf]  ;;  %v6889_v15 = vld [vmem:[%s7654_s14 + $0x1c4] sm:$0xf0] }
 0x2cf   : > { %v2472_v11 = vmul.f32 %v7124_v4, %v658_v5  ;;  %v5859_v20 = vor.u32 %v6878_v26, %v5856_v19  ;;  %v5831_v38 = vor.u32 %v6873_v36, %v5830_v35  ;;  %v6864_v16 = vld [vmem:[%s7654_s14 + $0x104] sm:$0xf]  ;;  %v5800_v26 = vld [vmem:[%s7654_s14 + $0x108] sm:$0xf0] }
 0x2d0   : > { %v2492_v34 = vpack.c.bf16 %v2478_v24, %v2474_v60  ;;  %4342 = vst [vmem:[%s9016_s29 + $0x28] sm:$0xff] %v2478_v24  ;;  %2991 = vmatpush.bf16.msra.mxu3 %v5714_v43  ;;  %3205 = vmatpush.bf16.msrb.mxu0 %v5855_v17  ;;  %v6876_v24 = vld [vmem:[%s7654_s14 + $0x164] sm:$0xf]  ;;  %v6871_v43 = vld [vmem:[%s7654_s14 + $0x134] sm:$0xf0]  ;;  %v5803_v19 = vor.u32 %v6864_v16, %v5800_v26 }
 0x2d1   : > { %v5851_v28 = vor.u32 %v6876_v24, %v5848_v27  ;;  %v5823_v46 = vor.u32 %v6871_v43, %v5822_v41  ;;  %v5886_v24 = vld [vmem:[%s7654_s14 + $0x1b0] sm:$0xf]  ;;  %v6886_v27 = vld [vmem:[%s7654_s14 + $0x1b4] sm:$0xf]  ;;  %v5880_v36 = vld [vmem:[%s7654_s14 + $0x1a8] sm:$0xf0] }
 0x2d2   : > { %2909 = vmatmul.bf16.vlgmr.msrb.gmra.mxu1 %v2492_v34  ;;  %v5891_v23 = vor.u32 %v6886_v27, %v5888_v31  ;;  %v6882_v41 = vld [vmem:[%s7654_s14 + $0x194] sm:$0xf]  ;;  %v6217_v16 = vld [vmem:[%s7662_s6 + $0x560] sm:$0xf0]  ;;  %v6503_v26 = vld [vmem:[%s7662_s6 + $0x780] sm:$0xf] }
 0x2d3   : > { %v6183_v31 = vld [vmem:[%s7662_s6 + $0x500] sm:$0xf] }
 0x2d4   : > { %2992 = vmatpush.bf16.msra.mxu3 %v5706_v51  ;;  %3206 = vmatpush.bf16.msrb.mxu0 %v5847_v25  ;;  %v6894_v51 = vld [vmem:[%s7654_s14 + $0x1f4] sm:$0xf]  ;;  %v6887_v25 = vld [vmem:[%s7654_s14 + $0x1b4] sm:$0xf0] }
 0x2d7   : > { %v2394_v39 = vpop.f32.mrf.mxu0 }
 0x2d8   : > { %v2395_v47 = vadd.f32 %v2394_v39, %v1567_v40  ;;  %3207 = vmatpush.bf16.msrb.mxu0 %v5839_v33  ;;  %v5832_v39 = vld [vmem:[%s7654_s14 + $0x148] sm:$0xf0]  ;;  %v5878_v33 = vld [vmem:[%s7654_s14 + $0x1a0] sm:$0xf] }
 0x2dc   : > { %2951 = vmatmul.bf16.vlgmr.msra.gmra.mxu0 %v2491_v10 }
 0x2dd   : > { %v2408_v13 = vpop.f32.mrf.mxu1  ;;  %v2422_v7 = vpop.f32.mrf.mxu2  ;;  %3208 = vmatpush.bf16.msrb.mxu0 %v5831_v38 }
 0x2de   : > { %v2409_v18 = vadd.f32 %v2408_v13, %v2395_v47  ;;  %v2423_v57 = vadd.f32 %v2422_v7, %v1568_v32  ;;  %v6895_v47 = vld [vmem:[%s7654_s14 + $0x1f4] sm:$0xf0]  ;;  %v5827_v7 = vor.u32 %v6870_v44, %v5824_v49  ;;  %v5862_v44 = vld [vmem:[%s7654_s14 + $0x180] sm:$0xf]  ;;  %v6881_v49 = vld [vmem:[%s7654_s14 + $0x184] sm:$0xf0] }
 0x2df   : > { %v2396_v55 = vpop.f32.mrf.mxu0  ;;  %v5919_v13 = vor.u32 %v6895_v47, %v5918_v42  ;;  %v5872_v42 = vld [vmem:[%s7654_s14 + $0x198] sm:$0xf0] }
 0x2e0   : > { %v2475_v54 = vadd.f32 %v2467_v9, %v2409_v18  ;;  %v2397_v50 = vadd.f32 %v2396_v55, %v1567_v40  ;;  %v5835_v40 = vor.u32 %v6872_v37, %v5832_v39  ;;  %v5920_v18 = vld [vmem:[%s7654_s14 + $0x1f8] sm:$0xf0]  ;;  %v6893_v55 = vld [vmem:[%s7654_s14 + $0x1e4] sm:$0xf0]  ;;  %v5870_v39 = vld [vmem:[%s7654_s14 + $0x190] sm:$0xf] }
 0x2e1   : > { %3209 = vmatpush.bf16.msrb.mxu0 %v5823_v46  ;;  %v5923_v9 = vor.u32 %v6894_v51, %v5920_v18  ;;  %3219 = vmatpush.bf16.msrb.mxu1 %v5919_v13  ;;  %v5875_v46 = vor.u32 %v6882_v41, %v5872_v42  ;;  %v8584_v47 = vld [vmem:[%s7648_s16 + $0x2] sm:$0x3]  ;;  %v6880_v13 = vld [vmem:[%s7654_s14 + $0x184] sm:$0xf]  ;;  %v5863_v51 = vor.u32 %v6881_v49, %v5862_v44  ;;  %v5864_v18 = vld [vmem:[%s7654_s14 + $0x188] sm:$0xf0] }
 0x2e2   : > { %4339 = vst [vmem:[%s9016_s29 + $0x10] sm:$0xff] %v2475_v54  ;;  %2965 = vmatmul.bf16.vlgmr.msra.gmra.mxu1 %v2492_v34  ;;  %v5840_v34 = vld [vmem:[%s7654_s14 + $0x158] sm:$0xf0]  ;;  %v6928_v41 = vld [vmem:[%s7662_s6 + $0x504] sm:$0xf] }
 0x2e3   : > { %v2436_v59 = vpop.f32.mrf.mxu3  ;;  %v5843_v52 = vor.u32 %v6874_v29, %v5840_v34  ;;  %v6885_v34 = vld [vmem:[%s7654_s14 + $0x1a4] sm:$0xf0] }
 0x2e4   : > { %v2437_v60 = vadd.f32 %v2436_v59, %v2423_v57  ;;  %v5816_v57 = vld [vmem:[%s7654_s14 + $0x128] sm:$0xf0]  ;;  %v5879_v35 = vor.u32 %v6885_v34, %v5878_v33  ;;  %v6151_v44 = vld [vmem:[%s7662_s6 + $0x4c0] sm:$0xf] }
 0x2e5   : > { %v2410_v62 = vpop.f32.mrf.mxu1  ;;  %v2424_v2 = vpop.f32.mrf.mxu2  ;;  %v5819_v59 = vor.u32 %v6868_v56, %v5816_v57  ;;  %v6952_v56 = vld [vmem:[%s7662_s6 + $0x5c4] sm:$0xf] }
 0x2e6   : > { %v2476_v30 = vadd.f32 %v2468_v61, %v2437_v60  ;;  %v2411_v63 = vadd.f32 %v2410_v62, %v2397_v50  ;;  %v2425_v3 = vadd.f32 %v2424_v2, %v1568_v32  ;;  %v5814_v32 = vld [vmem:[%s7654_s14 + $0x120] sm:$0xf]  ;;  %v5912_v50 = vld [vmem:[%s7654_s14 + $0x1e8] sm:$0xf0]  ;;  %v5806_v61 = vld [vmem:[%s7654_s14 + $0x110] sm:$0xf] }
 0x2e7   : > { %v5815_v14 = vor.u32 %v6869_v53, %v5814_v32  ;;  %v5915_v60 = vor.u32 %v6892_v48, %v5912_v50  ;;  %v6867_v62 = vld [vmem:[%s7654_s14 + $0x114] sm:$0xf0]  ;;  %v6866_v2 = vld [vmem:[%s7654_s14 + $0x114] sm:$0xf]  ;;  %v5867_v32 = vor.u32 %v6880_v13, %v5864_v18  ;;  %v2563_v53 = vperm.slane %v8584_v47, 0 }
 0x2e8   : > { %4340 = vst [vmem:[%s9016_s29 + $0x18] sm:$0xff] %v2476_v30  ;;  %v2479_v0 = vadd.f32 %v2471_v45, %v2411_v63  ;;  %v5807_v63 = vor.u32 %v6867_v62, %v5806_v61  ;;  %v6891_v45 = vld [vmem:[%s7654_s14 + $0x1d4] sm:$0xf0]  ;;  %v6281_v48 = vld [vmem:[%s7662_s6 + $0x5e0] sm:$0xf0] }
 0x2e9   : > { %3210 = vmatpush.bf16.msrb.mxu0 %v5815_v14  ;;  %v6279_v14 = vld [vmem:[%s7662_s6 + $0x5c0] sm:$0xf]  ;;  %v6284_v61 = vor.u32 %v6952_v56, %v6281_v48  ;;  %v6944_v62 = vld [vmem:[%s7662_s6 + $0x584] sm:$0xf] }
 0x2ea   : > { %v2493_v6 = vpack.c.bf16 %v2479_v0, %v2475_v54  ;;  %4343 = vst [vmem:[%s9016_s29 + $0x30] sm:$0xff] %v2479_v0  ;;  %v5910_v54 = vld [vmem:[%s7654_s14 + $0x1e0] sm:$0xf]  ;;  %v5808_v0 = vld [vmem:[%s7654_s14 + $0x118] sm:$0xf0] }
 0x2eb   : > { %v2438_v8 = vpop.f32.mrf.mxu3  ;;  %v5911_v58 = vor.u32 %v6893_v55, %v5910_v54  ;;  %v5811_v5 = vor.u32 %v6866_v2, %v5808_v0  ;;  %v6956_v55 = vld [vmem:[%s7662_s6 + $0x5dc] sm:$0xf0]  ;;  %v6992_v18 = vld [vmem:[%s7662_s6 + $0x704] sm:$0xf] }
 0x2ec   : > { %v2439_v10 = vadd.f32 %v2438_v8, %v2425_v3  ;;  %2923 = vmatmul.bf16.vlgmr.msrb.gmra.mxu2 %v2493_v6  ;;  %v5904_v3 = vld [vmem:[%s7654_s14 + $0x1d8] sm:$0xf0]  ;;  %v6247_v50 = vld [vmem:[%s7662_s6 + $0x580] sm:$0xf] }
 0x2ed   : > { %3233 = vmatpush.bf16.msrb.mxu2 %v5859_v20  ;;  %3220 = vmatpush.bf16.msrb.mxu1 %v5911_v58  ;;  %v6888_v20 = vld [vmem:[%s7654_s14 + $0x1c4] sm:$0xf] }
 0x2ee   : > { %v2480_v1 = vadd.f32 %v2472_v11, %v2439_v10  ;;  %3211 = vmatpush.bf16.msrb.mxu0 %v5807_v63  ;;  %v5798_v10 = vld [vmem:[%s7654_s14 + $0x100] sm:$0xf]  ;;  %v6865_v11 = vld [vmem:[%s7654_s14 + $0x104] sm:$0xf0]  ;;  %v5899_v22 = vor.u32 %v6888_v20, %v5896_v21 }
 0x2ef   : > { %v6535_v63 = vld [vmem:[%s7662_s6 + $0x7c0] sm:$0xf] }
 0x2f0   : > { %v2494_v12 = vpack.c.bf16 %v2480_v1, %v2476_v30  ;;  %4344 = vst [vmem:[%s9016_s29 + $0x38] sm:$0xff] %v2480_v1  ;;  %v5902_v30 = vld [vmem:[%s7654_s14 + $0x1d0] sm:$0xf]  ;;  %v5894_v1 = vld [vmem:[%s7654_s14 + $0x1c0] sm:$0xf] }
 0x2f1   : > { %3234 = vmatpush.bf16.msrb.mxu2 %v5851_v28  ;;  %v5903_v4 = vor.u32 %v6891_v45, %v5902_v30  ;;  %v5895_v17 = vor.u32 %v6889_v15, %v5894_v1  ;;  %v5887_v28 = vor.u32 %v6887_v25, %v5886_v24  ;;  %v6249_v30 = vld [vmem:[%s7662_s6 + $0x5a0] sm:$0xf0]  ;;  %v6215_v1 = vld [vmem:[%s7662_s6 + $0x540] sm:$0xf] }
 0x2f2   : > { %2937 = vmatmul.bf16.vlgmr.msrb.gmra.mxu3 %v2494_v12  ;;  %v6936_v15 = vld [vmem:[%s7662_s6 + $0x544] sm:$0xf]  ;;  %v7012_v21 = vld [vmem:[%s7662_s6 + $0x79c] sm:$0xf0] }
 0x2f3   : > { %3247 = vmatpush.bf16.msrb.mxu3 %v5923_v9  ;;  %3221 = vmatpush.bf16.msrb.mxu1 %v5903_v4  ;;  %v7020_v4 = vld [vmem:[%s7662_s6 + $0x7dc] sm:$0xf0]  ;;  %v6505_v24 = vld [vmem:[%s7662_s6 + $0x7a0] sm:$0xf0]  ;;  %v6504_v27 = vor.u32 %v7012_v21, %v6503_v26  ;;  %v6220_v34 = vor.u32 %v6936_v15, %v6217_v16 }
 0x2f4   : > { %v6980_v15 = vld [vmem:[%s7662_s6 + $0x69c] sm:$0xf0]  ;;  %v6976_v16 = vld [vmem:[%s7662_s6 + $0x684] sm:$0xf] }
 0x2f5   : > { %3235 = vmatpush.bf16.msrb.mxu2 %v5843_v52  ;;  %v6884_v52 = vld [vmem:[%s7654_s14 + $0x1a4] sm:$0xf]  ;;  %v6377_v26 = vld [vmem:[%s7662_s6 + $0x6a0] sm:$0xf0] }
 0x2f6   : > { %v5883_v38 = vor.u32 %v6884_v52, %v5880_v36  ;;  %v6932_v52 = vld [vmem:[%s7662_s6 + $0x51c] sm:$0xf0] }
 0x2f7   : > { %3248 = vmatpush.bf16.msrb.mxu3 %v5915_v60  ;;  %3222 = vmatpush.bf16.msrb.mxu1 %v5895_v17  ;;  %v6948_v60 = vld [vmem:[%s7662_s6 + $0x59c] sm:$0xf0]  ;;  %v6184_v13 = vor.u32 %v6932_v52, %v6183_v31 }
 0x2f8   : > { %v6248_v0 = vor.u32 %v6948_v60, %v6247_v50  ;;  %v7004_v36 = vld [vmem:[%s7662_s6 + $0x75c] sm:$0xf0] }
 0x2f9   : > { %3236 = vmatpush.bf16.msrb.mxu2 %v5835_v40  ;;  %v6883_v40 = vld [vmem:[%s7654_s14 + $0x194] sm:$0xf0]  ;;  %v6407_v50 = vld [vmem:[%s7662_s6 + $0x6c0] sm:$0xf] }
 0x2fa   : > { %v5871_v43 = vor.u32 %v6883_v40, %v5870_v39  ;;  %v6473_v39 = vld [vmem:[%s7662_s6 + $0x760] sm:$0xf0] }
 0x2fb   : > { %3223 = vmatpush.bf16.msrb.mxu1 %v5887_v28 }
 0x2fc   : > { %2979 = vmatmul.bf16.vlgmr.msra.gmra.mxu2 %v2493_v6  ;;  %v6890_v6 = vld [vmem:[%s7654_s14 + $0x1d4] sm:$0xf] }
 0x2fd   : > { %3237 = vmatpush.bf16.msrb.mxu2 %v5827_v7  ;;  %v5907_v8 = vor.u32 %v6890_v6, %v5904_v3  ;;  %v6537_v6 = vld [vmem:[%s7662_s6 + $0x7e0] sm:$0xf0] }
 0x2ff   : > { %3249 = vmatpush.bf16.msrb.mxu3 %v5907_v8  ;;  %3224 = vmatpush.bf16.msrb.mxu1 %v5879_v35  ;;  %v6252_v8 = vor.u32 %v6944_v62, %v6249_v30  ;;  %v6471_v35 = vld [vmem:[%s7662_s6 + $0x740] sm:$0xf]  ;;  %v6984_v62 = vld [vmem:[%s7662_s6 + $0x6c4] sm:$0xf] }
 0x300   : > { %v6472_v42 = vor.u32 %v7004_v36, %v6471_v35  ;;  %v6409_v30 = vld [vmem:[%s7662_s6 + $0x6e0] sm:$0xf0] }
 0x301   : > { %3238 = vmatpush.bf16.msrb.mxu2 %v5819_v59  ;;  %v6280_v59 = vor.u32 %v6956_v55, %v6279_v14  ;;  %v2564_v14 = vperm.slane %v8584_v47, 1  ;;  %v6119_v47 = vld [vmem:[%s7662_s6 + $0x480] sm:$0xf] }
 0x302   : > { %2993 = vmatmul.bf16.vlgmr.msra.gmra.mxu3 %v2494_v12  ;;  %v5799_v12 = vor.u32 %v6865_v11, %v5798_v10  ;;  %v6536_v10 = vor.u32 %v7020_v4, %v6535_v63 }
 0x303   : > { %3250 = vmatpush.bf16.msrb.mxu3 %v5899_v22  ;;  %3225 = vmatpush.bf16.msrb.mxu1 %v5871_v43  ;;  %v7008_v22 = vld [vmem:[%s7662_s6 + $0x784] sm:$0xf] }
 0x304   : > { %3212 = vmatpush.bf16.msrb.mxu0 %v5799_v12  ;;  %v6940_v12 = vld [vmem:[%s7662_s6 + $0x55c] sm:$0xf0]  ;;  %v6508_v28 = vor.u32 %v7008_v22, %v6505_v24  ;;  %v6185_v43 = vld [vmem:[%s7662_s6 + $0x520] sm:$0xf0] }
 0x305   : > { %3239 = vmatpush.bf16.msrb.mxu2 %v5811_v5  ;;  %v7016_v5 = vld [vmem:[%s7662_s6 + $0x7c4] sm:$0xf]  ;;  %v6216_v25 = vor.u32 %v6940_v12, %v6215_v1  ;;  %v6188_v55 = vor.u32 %v6928_v41, %v6185_v43  ;;  %v6900_v41 = vld [vmem:[%s7662_s6 + $0x41c] sm:$0xf0] }
 0x306   : > { %v6540_v11 = vor.u32 %v7016_v5, %v6537_v6  ;;  %v6912_v6 = vld [vmem:[%s7662_s6 + $0x484] sm:$0xf] }
 0x307   : > { %3251 = vmatpush.bf16.msrb.mxu3 %v5891_v23  ;;  %3226 = vmatpush.bf16.msrb.mxu1 %v5863_v51  ;;  %v6996_v51 = vld [vmem:[%s7662_s6 + $0x71c] sm:$0xf0]  ;;  %v6896_v43 = vld [vmem:[%s7662_s6 + $0x404] sm:$0xf] }
 0x308   : > { %4055 = vmatpush.bf16.msra.mxu0 %v6280_v59 }
 0x309   : > { %3240 = vmatpush.bf16.msrb.mxu2 %v5803_v19 }
 0x30b   : > { %3252 = vmatpush.bf16.msrb.mxu3 %v5883_v38  ;;  %4069 = vmatpush.bf16.msra.mxu1 %v6536_v10  ;;  %v7000_v38 = vld [vmem:[%s7662_s6 + $0x744] sm:$0xf]  ;;  %v6412_v10 = vor.u32 %v6984_v62, %v6409_v30 }
 0x30c   : > { %4056 = vmatpush.bf16.msra.mxu0 %v6248_v0 }
 0x30d   : > { %4083 = vmatpush.bf16.msra.mxu2 %v6284_v61  ;;  %v6988_v61 = vld [vmem:[%s7662_s6 + $0x6dc] sm:$0xf0] }
 0x30f   : > { %3253 = vmatpush.bf16.msrb.mxu3 %v5875_v46  ;;  %4070 = vmatpush.bf16.msra.mxu1 %v6504_v27  ;;  %v6476_v46 = vor.u32 %v7000_v38, %v6473_v39  ;;  %v6904_v27 = vld [vmem:[%s7662_s6 + $0x444] sm:$0xf] }
 0x310   : > { %4057 = vmatpush.bf16.msra.mxu0 %v6216_v25 }
 0x311   : > { %4084 = vmatpush.bf16.msra.mxu2 %v6252_v8  ;;  %v6408_v8 = vor.u32 %v6988_v61, %v6407_v50  ;;  %v6257_v50 = vld [vmem:[%s7662_s6 + $0x5a8] sm:$0xf0]  ;;  %v6964_v61 = vld [vmem:[%s7662_s6 + $0x61c] sm:$0xf0] }
 0x313   : > { %3254 = vmatpush.bf16.msrb.mxu3 %v5867_v32  ;;  %4071 = vmatpush.bf16.msra.mxu1 %v6472_v42 }
 0x314   : > { %4058 = vmatpush.bf16.msra.mxu0 %v6184_v13 }
 0x315   : > { %4085 = vmatpush.bf16.msra.mxu2 %v6220_v34 }
 0x317   : > { %4097 = vmatpush.bf16.msra.mxu3 %v6540_v11  ;;  %v6375_v11 = vld [vmem:[%s7662_s6 + $0x680] sm:$0xf] }
 0x318   : > { %v6376_v31 = vor.u32 %v6980_v15, %v6375_v11  ;;  %v6937_v11 = vld [vmem:[%s7662_s6 + $0x54c] sm:$0xf] }
 0x319   : > { %4086 = vmatpush.bf16.msra.mxu2 %v6188_v55 }
 0x31b   : > { %4098 = vmatpush.bf16.msra.mxu3 %v6508_v28  ;;  %v6089_v28 = vld [vmem:[%s7662_s6 + $0x460] sm:$0xf0] }
 0x31c   : > { %v6092_v35 = vor.u32 %v6904_v27, %v6089_v28  ;;  %v6193_v28 = vld [vmem:[%s7662_s6 + $0x528] sm:$0xf0] }
 0x31f   : > { %4099 = vmatpush.bf16.msra.mxu3 %v6476_v46  ;;  %v6057_v46 = vld [vmem:[%s7662_s6 + $0x420] sm:$0xf0] }
 0x320   : > { %v6060_v13 = vor.u32 %v6896_v43, %v6057_v46  ;;  %v6447_v43 = vld [vmem:[%s7662_s6 + $0x708] sm:$0xf]  ;;  %v6993_v46 = vld [vmem:[%s7662_s6 + $0x70c] sm:$0xf] }
 0x349   : > { %v2896_v29 = vpop.f32.mrf.mxu0 }
 0x34a   : > { %v2897_v57 = vadd.f32 %v2896_v29, %v2563_v53 }
 0x34f   : > { %v2910_v37 = vpop.f32.mrf.mxu1 }
 0x350   : > { %v2911_v45 = vadd.f32 %v2910_v37, %v2897_v57  ;;  %v6920_v57 = vld [vmem:[%s7662_s6 + $0x4c4] sm:$0xf] }
 0x351   : > { %v2898_v9 = vpop.f32.mrf.mxu0 }
 0x352   : > { %v2899_v3 = vadd.f32 %v2898_v9, %v2563_v53  ;;  %v6924_v53 = vld [vmem:[%s7662_s6 + $0x4dc] sm:$0xf0] }
 0x353   : > { %v6152_v60 = vor.u32 %v6924_v53, %v6151_v44  ;;  %v6287_v44 = vld [vmem:[%s7662_s6 + $0x5c8] sm:$0xf]  ;;  %v6972_v53 = vld [vmem:[%s7662_s6 + $0x65c] sm:$0xf0] }
 0x355   : > { %4059 = vmatpush.bf16.msra.mxu0 %v6152_v60  ;;  %v6311_v60 = vld [vmem:[%s7662_s6 + $0x600] sm:$0xf] }
 0x356   : > { %v6312_v30 = vor.u32 %v6964_v61, %v6311_v60  ;;  %v6097_v61 = vld [vmem:[%s7662_s6 + $0x468] sm:$0xf0] }
 0x357   : > { %v2912_v54 = vpop.f32.mrf.mxu1 }
 0x358   : > { %v2913_v17 = vadd.f32 %v2912_v54, %v2899_v3  ;;  %v6441_v54 = vld [vmem:[%s7662_s6 + $0x720] sm:$0xf0] }
 0x359   : > { %v8608_v19 = vpop.f32.mrf.mxu0  ;;  %v6444_v48 = vor.u32 %v6992_v18, %v6441_v54  ;;  %v6121_v3 = vld [vmem:[%s7662_s6 + $0x4a0] sm:$0xf0]  ;;  %v6289_v18 = vld [vmem:[%s7662_s6 + $0x5e8] sm:$0xf0] }
 0x35a   : > { %v2953_v4 = vadd.f32 %v8608_v19, %v2564_v14  ;;  %v6087_v19 = vld [vmem:[%s7662_s6 + $0x440] sm:$0xf]  ;;  %v6124_v24 = vor.u32 %v6912_v6, %v6121_v3  ;;  %v6968_v54 = vld [vmem:[%s7662_s6 + $0x644] sm:$0xf] }
 0x35b   : > { %4100 = vmatpush.bf16.msra.mxu3 %v6444_v48 }
 0x35f   : > { %v8614_v23 = vpop.f32.mrf.mxu1  ;;  %4101 = vmatpush.bf16.msra.mxu3 %v6412_v10  ;;  %v6941_v10 = vld [vmem:[%s7662_s6 + $0x564] sm:$0xf0] }
 0x361   : > { %v2954_v63 = vpop.f32.mrf.mxu0 }
 0x362   : > { %v2955_v1 = vadd.f32 %v2954_v63, %v2564_v14  ;;  %v6345_v14 = vld [vmem:[%s7662_s6 + $0x660] sm:$0xf0] }
 0x363   : > { %v6960_v63 = vld [vmem:[%s7662_s6 + $0x604] sm:$0xf] }
 0x367   : > { %v2968_v5 = vpop.f32.mrf.mxu1 }
 0x368   : > { %v2969_v21 = vadd.f32 %v2968_v5, %v2955_v1  ;;  %v6545_v5 = vld [vmem:[%s7662_s6 + $0x7e8] sm:$0xf0] }
 0x36f   : > { %v2924_v7 = vpop.f32.mrf.mxu2 }
 0x370   : > { %v2925_v20 = vadd.f32 %v2924_v7, %v2911_v45  ;;  %v6439_v7 = vld [vmem:[%s7662_s6 + $0x700] sm:$0xf] }
 0x371   : > { %v6440_v59 = vor.u32 %v6996_v51, %v6439_v7  ;;  %v6916_v45 = vld [vmem:[%s7662_s6 + $0x49c] sm:$0xf0]  ;;  %v6953_v51 = vld [vmem:[%s7662_s6 + $0x5cc] sm:$0xf] }
 0x372   : > { %v6120_v12 = vor.u32 %v6916_v45, %v6119_v47  ;;  %v6313_v47 = vld [vmem:[%s7662_s6 + $0x620] sm:$0xf0]  ;;  %v6543_v45 = vld [vmem:[%s7662_s6 + $0x7c8] sm:$0xf] }
 0x373   : > { %4072 = vmatpush.bf16.msra.mxu1 %v6440_v59  ;;  %v6945_v59 = vld [vmem:[%s7662_s6 + $0x58c] sm:$0xf] }
 0x374   : > { %4060 = vmatpush.bf16.msra.mxu0 %v6120_v12  ;;  %v6260_v62 = vor.u32 %v6945_v59, %v6257_v50  ;;  %v6225_v12 = vld [vmem:[%s7662_s6 + $0x568] sm:$0xf0]  ;;  %v6095_v59 = vld [vmem:[%s7662_s6 + $0x448] sm:$0xf] }
 0x375   : > { %v2938_v58 = vpop.f32.mrf.mxu3  ;;  %v6228_v15 = vor.u32 %v6937_v11, %v6225_v12  ;;  %v6905_v50 = vld [vmem:[%s7662_s6 + $0x44c] sm:$0xf]  ;;  %v6351_v11 = vld [vmem:[%s7662_s6 + $0x648] sm:$0xf] }
 0x376   : > { %v2939_v29 = vadd.f32 %v2938_v58, %v2925_v20  ;;  %v6153_v58 = vld [vmem:[%s7662_s6 + $0x4e0] sm:$0xf0]  ;;  %v6908_v20 = vld [vmem:[%s7662_s6 + $0x45c] sm:$0xf0]  ;;  %v6969_v12 = vld [vmem:[%s7662_s6 + $0x64c] sm:$0xf] }
 0x377   : > { %v2926_v2 = vpop.f32.mrf.mxu2  ;;  %v6156_v0 = vor.u32 %v6920_v57, %v6153_v58  ;;  %4073 = vmatpush.bf16.msra.mxu1 %v6408_v8  ;;  %v6255_v57 = vld [vmem:[%s7662_s6 + $0x588] sm:$0xf] }
 0x378   : > { %v2927_v33 = vadd.f32 %v2926_v2, %v2913_v17  ;;  %v2999_v9 = vmax.f32 %v2939_v29, 0.0  ;;  %v2967_v17 = vadd.f32 %v8614_v23, %v2953_v4  ;;  %v6380_v29 = vor.u32 %v6976_v16, %v6377_v26  ;;  %v6949_v58 = vld [vmem:[%s7662_s6 + $0x5a4] sm:$0xf0]  ;;  %v7017_v4 = vld [vmem:[%s7662_s6 + $0x7cc] sm:$0xf] }
 0x379   : > { %4087 = vmatpush.bf16.msra.mxu2 %v6156_v0  ;;  %v6256_v48 = vor.u32 %v6949_v58, %v6255_v57  ;;  %v7021_v0 = vld [vmem:[%s7662_s6 + $0x7e4] sm:$0xf0]  ;;  %v6548_v3 = vor.u32 %v7017_v4, %v6545_v5  ;;  %v6417_v57 = vld [vmem:[%s7662_s6 + $0x6e8] sm:$0xf0] }
 0x37a   : > { %4102 = vmatpush.bf16.msra.mxu3 %v6380_v29  ;;  %v6544_v6 = vor.u32 %v7021_v0, %v6543_v45  ;;  %v6223_v8 = vld [vmem:[%s7662_s6 + $0x548] sm:$0xf] }
 0x37b   : > { %4074 = vmatpush.bf16.msra.mxu1 %v6376_v31  ;;  %v6224_v1 = vor.u32 %v6941_v10, %v6223_v8  ;;  %v6511_v16 = vld [vmem:[%s7662_s6 + $0x788] sm:$0xf]  ;;  %v6065_v8 = vld [vmem:[%s7662_s6 + $0x428] sm:$0xf0] }
 0x37c   : > { %v7013_v26 = vld [vmem:[%s7662_s6 + $0x7a4] sm:$0xf0] }
 0x37d   : > { %v2940_v37 = vpop.f32.mrf.mxu3  ;;  %4088 = vmatpush.bf16.msra.mxu2 %v6124_v24  ;;  %v6933_v24 = vld [vmem:[%s7662_s6 + $0x524] sm:$0xf0] }
 0x37e   : > { %v2941_v40 = vadd.f32 %v2940_v37, %v2927_v33  ;;  %v6088_v33 = vor.u32 %v6908_v20, %v6087_v19  ;;  %v6512_v19 = vor.u32 %v7013_v26, %v6511_v16  ;;  %v6513_v20 = vld [vmem:[%s7662_s6 + $0x7a8] sm:$0xf0]  ;;  %v6479_v29 = vld [vmem:[%s7662_s6 + $0x748] sm:$0xf] }
 0x37f   : > { %v2980_v49 = vpop.f32.mrf.mxu2  ;;  %v6063_v4 = vld [vmem:[%s7662_s6 + $0x408] sm:$0xf]  ;;  %v6353_v16 = vld [vmem:[%s7662_s6 + $0x668] sm:$0xf0] }
 0x380   : > { %v3001_v32 = vmax.f32 %v2941_v40, 0.0  ;;  %v2981_v25 = vadd.f32 %v2980_v49, %v2967_v17  ;;  %4061 = vmatpush.bf16.msra.mxu0 %v6088_v33  ;;  %v6055_v40 = vld [vmem:[%s7662_s6 + $0x400] sm:$0xf]  ;;  %v6957_v49 = vld [vmem:[%s7662_s6 + $0x5e4] sm:$0xf0]  ;;  %v6356_v26 = vor.u32 %v6969_v12, %v6353_v16 }
 0x381   : > { %4089 = vmatpush.bf16.msra.mxu2 %v6092_v35  ;;  %v6056_v42 = vor.u32 %v6900_v41, %v6055_v40  ;;  %v6288_v7 = vor.u32 %v6957_v49, %v6287_v44  ;;  %v7009_v17 = vld [vmem:[%s7662_s6 + $0x78c] sm:$0xf]  ;;  %v7005_v33 = vld [vmem:[%s7662_s6 + $0x764] sm:$0xf0]  ;;  %v6934_v12 = vld [vmem:[%s7662_s6 + $0x52c] sm:$0xf0] }
 0x382   : > { %v3003_v56 = vpack.c.bf16 %v3001_v32, %v2999_v9  ;;  %v6343_v9 = vld [vmem:[%s7662_s6 + $0x640] sm:$0xf]  ;;  %v6292_v32 = vor.u32 %v6953_v51, %v6289_v18  ;;  %v6161_v40 = vld [vmem:[%s7662_s6 + $0x4e8] sm:$0xf0]  ;;  %v6917_v51 = vld [vmem:[%s7662_s6 + $0x4a4] sm:$0xf0] }
 0x383   : > { %v6344_v55 = vor.u32 %v6972_v53, %v6343_v9  ;;  %v6449_v49 = vld [vmem:[%s7662_s6 + $0x728] sm:$0xf0]  ;;  %v6901_v5 = vld [vmem:[%s7662_s6 + $0x424] sm:$0xf0]  ;;  %v6201_v16 = vld [vmem:[%s7662_s6 + $0x530] sm:$0xf0] }
 0x384   : > { %3213 = vmatmul.bf16.vlgmr.msrb.gmra.mxu0 %v3003_v56  ;;  %3241 = vmatmul.bf16.vlgmr.msrb.gmra.mxu2 %v3003_v56  ;;  %v6348_v56 = vor.u32 %v6968_v54, %v6345_v14  ;;  %v6913_v18 = vld [vmem:[%s7662_s6 + $0x48c] sm:$0xf]  ;;  %v6415_v54 = vld [vmem:[%s7662_s6 + $0x6c8] sm:$0xf] }
 0x385   : > { %v2994_v2 = vpop.f32.mrf.mxu3  ;;  %4062 = vmatpush.bf16.msra.mxu0 %v6056_v42  ;;  %4090 = vmatpush.bf16.msra.mxu2 %v6060_v13  ;;  %v6997_v42 = vld [vmem:[%s7662_s6 + $0x724] sm:$0xf0]  ;;  %v6452_v13 = vor.u32 %v6993_v46, %v6449_v49 }
 0x386   : > { %v2995_v34 = vadd.f32 %v2994_v2, %v2981_v25  ;;  %4075 = vmatpush.bf16.msra.mxu1 %v6344_v55  ;;  %4103 = vmatpush.bf16.msra.mxu3 %v6348_v56  ;;  %v6316_v2 = vor.u32 %v6960_v63, %v6313_v47  ;;  %v6929_v25 = vld [vmem:[%s7662_s6 + $0x50c] sm:$0xf]  ;;  %v6448_v44 = vor.u32 %v6997_v42, %v6447_v43  ;;  %v6989_v14 = vld [vmem:[%s7662_s6 + $0x6e4] sm:$0xf0]  ;;  %v6297_v43 = vld [vmem:[%s7662_s6 + $0x5f0] sm:$0xf0] }
 0x387   : > { %v2982_v22 = vpop.f32.mrf.mxu2  ;;  %v6196_v31 = vor.u32 %v6929_v25, %v6193_v28  ;;  %v6985_v55 = vld [vmem:[%s7662_s6 + $0x6cc] sm:$0xf]  ;;  %v6416_v56 = vor.u32 %v6989_v14, %v6415_v54  ;;  %v6981_v63 = vld [vmem:[%s7662_s6 + $0x6a4] sm:$0xf0]  ;;  %v6946_v54 = vld [vmem:[%s7662_s6 + $0x594] sm:$0xf] }
 0x388   : > { %v2983_v52 = vadd.f32 %v2982_v22, %v2969_v21  ;;  %v3000_v37 = vmax.f32 %v2995_v34, 0.0  ;;  %v6516_v21 = vor.u32 %v7009_v17, %v6513_v20  ;;  %v6191_v22 = vld [vmem:[%s7662_s6 + $0x508] sm:$0xf]  ;;  %v7001_v34 = vld [vmem:[%s7662_s6 + $0x74c] sm:$0xf]  ;;  %v6420_v58 = vor.u32 %v6985_v55, %v6417_v57 }
 0x389   : > { %4111 = vmatpush.bf16.msrb.mxu0 %v6288_v7  ;;  %4139 = vmatpush.bf16.msrb.mxu2 %v6292_v32  ;;  %v6192_v27 = vor.u32 %v6933_v24, %v6191_v22  ;;  %v6127_v7 = vld [vmem:[%s7662_s6 + $0x488] sm:$0xf]  ;;  %v6129_v32 = vld [vmem:[%s7662_s6 + $0x4a8] sm:$0xf0]  ;;  %v6265_v14 = vld [vmem:[%s7662_s6 + $0x5b0] sm:$0xf0] }
 0x38a   : > { %4076 = vmatpush.bf16.msra.mxu1 %v6312_v30  ;;  %4104 = vmatpush.bf16.msra.mxu3 %v6316_v2  ;;  %v6128_v9 = vor.u32 %v6917_v51, %v6127_v7  ;;  %v6132_v53 = vor.u32 %v6913_v18, %v6129_v32  ;;  %v6383_v30 = vld [vmem:[%s7662_s6 + $0x688] sm:$0xf]  ;;  %v6977_v47 = vld [vmem:[%s7662_s6 + $0x68c] sm:$0xf]  ;;  %v6263_v51 = vld [vmem:[%s7662_s6 + $0x590] sm:$0xf] }
 0x38b   : > { %v6384_v45 = vor.u32 %v6981_v63, %v6383_v30  ;;  %v6385_v2 = vld [vmem:[%s7662_s6 + $0x6a8] sm:$0xf0]  ;;  %v6319_v17 = vld [vmem:[%s7662_s6 + $0x608] sm:$0xf] }
 0x38c   : > { %v6388_v0 = vor.u32 %v6977_v47, %v6385_v2  ;;  %v6321_v22 = vld [vmem:[%s7662_s6 + $0x628] sm:$0xf0]  ;;  %v6938_v47 = vld [vmem:[%s7662_s6 + $0x554] sm:$0xf] }
 0x38d   : > { %v2996_v23 = vpop.f32.mrf.mxu3  ;;  %4112 = vmatpush.bf16.msrb.mxu0 %v6256_v48  ;;  %4140 = vmatpush.bf16.msrb.mxu2 %v6260_v62  ;;  %v6909_v48 = vld [vmem:[%s7662_s6 + $0x464] sm:$0xf0]  ;;  %v6100_v62 = vor.u32 %v6905_v50, %v6097_v61  ;;  %v6231_v61 = vld [vmem:[%s7662_s6 + $0x550] sm:$0xf] }
 0x38e   : > { %v2997_v36 = vadd.f32 %v2996_v23, %v2983_v52  ;;  %v6480_v52 = vor.u32 %v7005_v33, %v6479_v29  ;;  %v6481_v23 = vld [vmem:[%s7662_s6 + $0x768] sm:$0xf0]  ;;  %v6096_v60 = vor.u32 %v6909_v48, %v6095_v59  ;;  %v7018_v59 = vld [vmem:[%s7662_s6 + $0x7d4] sm:$0xf] }
 0x38f   : > { %v6484_v35 = vor.u32 %v7001_v34, %v6481_v23  ;;  %v6553_v48 = vld [vmem:[%s7662_s6 + $0x7f0] sm:$0xf0] }
 0x390   : > { %v3002_v38 = vmax.f32 %v2997_v36, 0.0  ;;  %v6159_v36 = vld [vmem:[%s7662_s6 + $0x4c8] sm:$0xf] }
 0x391   : > { %4113 = vmatpush.bf16.msrb.mxu0 %v6224_v1  ;;  %4141 = vmatpush.bf16.msrb.mxu2 %v6228_v15  ;;  %v6973_v1 = vld [vmem:[%s7662_s6 + $0x664] sm:$0xf0] }
 0x392   : > { %v3004_v39 = vpack.c.bf16 %v3002_v38, %v3000_v37  ;;  %v6925_v37 = vld [vmem:[%s7662_s6 + $0x4e4] sm:$0xf0]  ;;  %v6921_v38 = vld [vmem:[%s7662_s6 + $0x4cc] sm:$0xf]  ;;  %v6352_v15 = vor.u32 %v6973_v1, %v6351_v11  ;;  %v6199_v1 = vld [vmem:[%s7662_s6 + $0x510] sm:$0xf] }
 0x393   : > { %v6164_v41 = vor.u32 %v6921_v38, %v6161_v40  ;;  %v6295_v38 = vld [vmem:[%s7662_s6 + $0x5d0] sm:$0xf] }
 0x394   : > { %3227 = vmatmul.bf16.vlgmr.msrb.gmra.mxu1 %v3004_v39  ;;  %3255 = vmatmul.bf16.vlgmr.msrb.gmra.mxu3 %v3004_v39  ;;  %v6160_v39 = vor.u32 %v6925_v37, %v6159_v36  ;;  %v6958_v40 = vld [vmem:[%s7662_s6 + $0x5ec] sm:$0xf0] }
 0x395   : > { %4125 = vmatpush.bf16.msrb.mxu1 %v6544_v6  ;;  %4153 = vmatpush.bf16.msrb.mxu3 %v6548_v3  ;;  %v6897_v6 = vld [vmem:[%s7662_s6 + $0x40c] sm:$0xf]  ;;  %v6064_v3 = vor.u32 %v6901_v5, %v6063_v4  ;;  %v6519_v4 = vld [vmem:[%s7662_s6 + $0x790] sm:$0xf] }
 0x396   : > { %4114 = vmatpush.bf16.msrb.mxu0 %v6192_v27  ;;  %4142 = vmatpush.bf16.msrb.mxu2 %v6196_v31  ;;  %v6068_v10 = vor.u32 %v6897_v6, %v6065_v8  ;;  %v5795_v27 = vld [vmem:[%s7656_s0 + $0x2] sm:$0x3]  ;;  %v7014_v6 = vld [vmem:[%s7662_s6 + $0x7ac] sm:$0xf0]  ;;  %v6521_v8 = vld [vmem:[%s7662_s6 + $0x7b0] sm:$0xf0] }
 0x397   : > { %v3041_v29 = vperm.slane %v5795_v27, 0  ;;  %v3042_v23 = vperm.slane %v5795_v27, 1  ;;  %v6167_v27 = vld [vmem:[%s7662_s6 + $0x4d0] sm:$0xf] }
 0x399   : > { %4126 = vmatpush.bf16.msrb.mxu1 %v6512_v19  ;;  %4154 = vmatpush.bf16.msrb.mxu3 %v6516_v21  ;;  %v6965_v19 = vld [vmem:[%s7662_s6 + $0x624] sm:$0xf0]  ;;  %v6961_v21 = vld [vmem:[%s7662_s6 + $0x60c] sm:$0xf] }
 0x39a   : > { %4115 = vmatpush.bf16.msrb.mxu0 %v6160_v39  ;;  %4143 = vmatpush.bf16.msrb.mxu2 %v6164_v41  ;;  %v6320_v20 = vor.u32 %v6965_v19, %v6319_v17  ;;  %v6324_v24 = vor.u32 %v6961_v21, %v6321_v22  ;;  %v6954_v41 = vld [vmem:[%s7662_s6 + $0x5d4] sm:$0xf]  ;;  %v6487_v19 = vld [vmem:[%s7662_s6 + $0x750] sm:$0xf] }
 0x39b   : > { %v6300_v7 = vor.u32 %v6954_v41, %v6297_v43  ;;  %v7002_v21 = vld [vmem:[%s7662_s6 + $0x754] sm:$0xf] }
 0x39c   : > { %v6489_v22 = vld [vmem:[%s7662_s6 + $0x770] sm:$0xf0] }
 0x39d   : > { %4127 = vmatpush.bf16.msrb.mxu1 %v6480_v52  ;;  %4155 = vmatpush.bf16.msrb.mxu3 %v6484_v35  ;;  %v6914_v41 = vld [vmem:[%s7662_s6 + $0x494] sm:$0xf] }
 0x39e   : > { %4116 = vmatpush.bf16.msrb.mxu0 %v6128_v9  ;;  %4144 = vmatpush.bf16.msrb.mxu2 %v6132_v53  ;;  %v6950_v53 = vld [vmem:[%s7662_s6 + $0x5ac] sm:$0xf0]  ;;  %v6137_v43 = vld [vmem:[%s7662_s6 + $0x4b0] sm:$0xf0] }
 0x39f   : > { %v6264_v50 = vor.u32 %v6950_v53, %v6263_v51  ;;  %v6910_v53 = vld [vmem:[%s7662_s6 + $0x46c] sm:$0xf0] }
 0x3a1   : > { %4128 = vmatpush.bf16.msrb.mxu1 %v6448_v44  ;;  %4156 = vmatpush.bf16.msrb.mxu3 %v6452_v13  ;;  %v6296_v13 = vor.u32 %v6958_v40, %v6295_v38  ;;  %v6918_v40 = vld [vmem:[%s7662_s6 + $0x4ac] sm:$0xf0] }
 0x3a2   : > { %4117 = vmatpush.bf16.msrb.mxu0 %v6096_v60  ;;  %4145 = vmatpush.bf16.msrb.mxu2 %v6100_v62  ;;  %v6268_v60 = vor.u32 %v6946_v54, %v6265_v14  ;;  %v6942_v62 = vld [vmem:[%s7662_s6 + $0x56c] sm:$0xf0]  ;;  %v6906_v54 = vld [vmem:[%s7662_s6 + $0x454] sm:$0xf] }
 0x3a3   : > { %v6105_v14 = vld [vmem:[%s7662_s6 + $0x470] sm:$0xf0] }
 0x3a5   : > { %4129 = vmatpush.bf16.msrb.mxu1 %v6416_v56  ;;  %4157 = vmatpush.bf16.msrb.mxu3 %v6420_v58  ;;  %v6551_v56 = vld [vmem:[%s7662_s6 + $0x7d0] sm:$0xf] }
 0x3a6   : > { %4118 = vmatpush.bf16.msrb.mxu0 %v6064_v3  ;;  %4146 = vmatpush.bf16.msrb.mxu2 %v6068_v10  ;;  %v7022_v58 = vld [vmem:[%s7662_s6 + $0x7ec] sm:$0xf0]  ;;  %v7010_v3 = vld [vmem:[%s7662_s6 + $0x794] sm:$0xf]  ;;  %v6232_v10 = vor.u32 %v6942_v62, %v6231_v61 }
 0x3a7   : > { %v6552_v2 = vor.u32 %v7022_v58, %v6551_v56  ;;  %v6524_v17 = vor.u32 %v7010_v3, %v6521_v8  ;;  %v6982_v58 = vld [vmem:[%s7662_s6 + $0x6ac] sm:$0xf0] }
 0x3a8   : > { %v6071_v61 = vld [vmem:[%s7662_s6 + $0x410] sm:$0xf] }
 0x3a9   : > { %4130 = vmatpush.bf16.msrb.mxu1 %v6384_v45  ;;  %4158 = vmatpush.bf16.msrb.mxu3 %v6388_v0  ;;  %v6233_v45 = vld [vmem:[%s7662_s6 + $0x570] sm:$0xf0]  ;;  %v6556_v0 = vor.u32 %v7018_v59, %v6553_v48  ;;  %v6902_v62 = vld [vmem:[%s7662_s6 + $0x42c] sm:$0xf0] }
 0x3aa   : > { %v6236_v11 = vor.u32 %v6938_v47, %v6233_v45  ;;  %v6978_v59 = vld [vmem:[%s7662_s6 + $0x694] sm:$0xf]  ;;  %v6303_v47 = vld [vmem:[%s7662_s6 + $0x5d8] sm:$0xf]  ;;  %v6359_v3 = vld [vmem:[%s7662_s6 + $0x650] sm:$0xf] }
 0x3ab   : > { %v6393_v48 = vld [vmem:[%s7662_s6 + $0x6b0] sm:$0xf0]  ;;  %v6959_v45 = vld [vmem:[%s7662_s6 + $0x5f4] sm:$0xf0]  ;;  %v6974_v8 = vld [vmem:[%s7662_s6 + $0x66c] sm:$0xf0] }
 0x3ad   : > { %4131 = vmatpush.bf16.msrb.mxu1 %v6352_v15  ;;  %4159 = vmatpush.bf16.msrb.mxu3 %v6356_v26  ;;  %v6930_v15 = vld [vmem:[%s7662_s6 + $0x514] sm:$0xf]  ;;  %v6520_v26 = vor.u32 %v7014_v6, %v6519_v4  ;;  %v6955_v4 = vld [vmem:[%s7662_s6 + $0x5dc] sm:$0xf] }
 0x3ae   : > { %v6305_v6 = vld [vmem:[%s7662_s6 + $0x5f8] sm:$0xf0] }
 0x3b1   : > { %4132 = vmatpush.bf16.msrb.mxu1 %v6320_v20  ;;  %4160 = vmatpush.bf16.msrb.mxu3 %v6324_v24  ;;  %v7006_v20 = vld [vmem:[%s7662_s6 + $0x76c] sm:$0xf0]  ;;  %v6200_v24 = vor.u32 %v6934_v12, %v6199_v1  ;;  %v6072_v1 = vor.u32 %v6902_v62, %v6071_v61  ;;  %v6923_v61 = vld [vmem:[%s7662_s6 + $0x4dc] sm:$0xf] }
 0x3b2   : > { %v6177_v62 = vld [vmem:[%s7662_s6 + $0x4f8] sm:$0xf0] }
 0x401   : > { %v3214_v25 = vpop.f32.mrf.mxu0 }
 0x402   : > { %v3215_v34 = vadd.f32 %v3214_v25, %v3041_v29  ;;  %v6204_v25 = vor.u32 %v6930_v15, %v6201_v16  ;;  %v6304_v15 = vor.u32 %v6959_v45, %v6303_v47  ;;  %v6308_v16 = vor.u32 %v6955_v4, %v6305_v6  ;;  %v6463_v47 = vld [vmem:[%s7662_s6 + $0x718] sm:$0xf] }
 0x403   : > { %v6999_v45 = vld [vmem:[%s7662_s6 + $0x734] sm:$0xf0]  ;;  %v6180_v6 = vor.u32 %v6923_v61, %v6177_v62 }
 0x407   : > { %v3242_v28 = vpop.f32.mrf.mxu2 }
 0x408   : > { %v3243_v46 = vadd.f32 %v3242_v28, %v3042_v23  ;;  %v6926_v28 = vld [vmem:[%s7662_s6 + $0x4ec] sm:$0xf0] }
 0x409   : > { %v3216_v33 = vpop.f32.mrf.mxu0 }
 0x40a   : > { %v3217_v35 = vadd.f32 %v3216_v33, %v3041_v29  ;;  %v6169_v29 = vld [vmem:[%s7662_s6 + $0x4f0] sm:$0xf0]  ;;  %v6488_v33 = vor.u32 %v7006_v20, %v6487_v19  ;;  %v6947_v19 = vld [vmem:[%s7662_s6 + $0x59c] sm:$0xf]  ;;  %v6360_v20 = vor.u32 %v6974_v8, %v6359_v3  ;;  %v6143_v3 = vld [vmem:[%s7662_s6 + $0x498] sm:$0xf] }
 0x40b   : > { %v6919_v8 = vld [vmem:[%s7662_s6 + $0x4b4] sm:$0xf0] }
 0x40f   : > { %v3244_v42 = vpop.f32.mrf.mxu2 }
 0x410   : > { %v3245_v18 = vadd.f32 %v3244_v42, %v3042_v23  ;;  %v6998_v23 = vld [vmem:[%s7662_s6 + $0x72c] sm:$0xf0] }
 0x411   : > { %v3228_v31 = vpop.f32.mrf.mxu1 }
 0x412   : > { %v3229_v36 = vadd.f32 %v3228_v31, %v3215_v34  ;;  %v6922_v31 = vld [vmem:[%s7662_s6 + $0x4d4] sm:$0xf]  ;;  %v6492_v34 = vor.u32 %v7002_v21, %v6489_v22  ;;  %v6273_v22 = vld [vmem:[%s7662_s6 + $0x5b8] sm:$0xf0] }
 0x413   : > { %v6172_v38 = vor.u32 %v6922_v31, %v6169_v29  ;;  %v6559_v31 = vld [vmem:[%s7662_s6 + $0x7d8] sm:$0xf] }
 0x414   : > { %v3261_v44 = vmax.f32 %v3229_v36, 0.0  ;;  %v6457_v36 = vld [vmem:[%s7662_s6 + $0x730] sm:$0xf0]  ;;  %v7023_v29 = vld [vmem:[%s7662_s6 + $0x7f4] sm:$0xf0] }
 0x417   : > { %v3256_v52 = vpop.f32.mrf.mxu3 }
 0x418   : > { %v3257_v9 = vadd.f32 %v3256_v52, %v3243_v46  ;;  %v6455_v52 = vld [vmem:[%s7662_s6 + $0x710] sm:$0xf] }
 0x419   : > { %v3230_v37 = vpop.f32.mrf.mxu1  ;;  %v6456_v42 = vor.u32 %v6998_v23, %v6455_v52  ;;  %v6276_v23 = vor.u32 %v6947_v19, %v6273_v22  ;;  %v6144_v19 = vor.u32 %v6919_v8, %v6143_v3  ;;  %v6911_v22 = vld [vmem:[%s7662_s6 + $0x474] sm:$0xf0] }
 0x41a   : > { %v3231_v39 = vadd.f32 %v3230_v37, %v3217_v35  ;;  %v3262_v30 = vmax.f32 %v3257_v9, 0.0  ;;  %v6994_v35 = vld [vmem:[%s7662_s6 + $0x714] sm:$0xf]  ;;  %v6168_v37 = vor.u32 %v6926_v28, %v6167_v27  ;;  %v6103_v9 = vld [vmem:[%s7662_s6 + $0x450] sm:$0xf] }
 0x41b   : > { %v6460_v46 = vor.u32 %v6994_v35, %v6457_v36  ;;  %v6962_v27 = vld [vmem:[%s7662_s6 + $0x614] sm:$0xf]  ;;  %v6239_v35 = vld [vmem:[%s7662_s6 + $0x558] sm:$0xf] }
 0x41c   : > { %v3263_v49 = vmax.f32 %v3231_v39, 0.0  ;;  %v6135_v39 = vld [vmem:[%s7662_s6 + $0x490] sm:$0xf]  ;;  %v6329_v28 = vld [vmem:[%s7662_s6 + $0x630] sm:$0xf0] }
 0x41d   : > { %v6136_v51 = vor.u32 %v6918_v40, %v6135_v39  ;;  %v6939_v39 = vld [vmem:[%s7662_s6 + $0x55c] sm:$0xf] }
 0x41e   : > { %v8732_v32 = vpack.c.bf16 %v3263_v49, %v3261_v44  ;;  %v6423_v44 = vld [vmem:[%s7662_s6 + $0x6d0] sm:$0xf]  ;;  %v6241_v40 = vld [vmem:[%s7662_s6 + $0x578] sm:$0xf0] }
 0x41f   : > { %v3258_v55 = vpop.f32.mrf.mxu3  ;;  %v6990_v49 = vld [vmem:[%s7662_s6 + $0x6ec] sm:$0xf0] }
 0x420   : > { %v3259_v57 = vadd.f32 %v3258_v55, %v3245_v18  ;;  %4063 = vmatmul.bf16.vlgmr.msra.gmra.mxu0 %v8732_v32  ;;  %4091 = vmatmul.bf16.vlgmr.msra.gmra.mxu2 %v8732_v32  ;;  %v6140_v18 = vor.u32 %v6914_v41, %v6137_v43  ;;  %v6424_v55 = vor.u32 %v6990_v49, %v6423_v44  ;;  %v7011_v44 = vld [vmem:[%s7662_s6 + $0x79c] sm:$0xf] }
 0x421   : > { %4167 = vmatpush.bf16.msra.mxu0 %v6296_v13  ;;  %4195 = vmatpush.bf16.msra.mxu2 %v6300_v7  ;;  %v6986_v13 = vld [vmem:[%s7662_s6 + $0x6d4] sm:$0xf]  ;;  %v6560_v41 = vor.u32 %v7023_v29, %v6559_v31  ;;  %v6529_v49 = vld [vmem:[%s7662_s6 + $0x7b8] sm:$0xf0]  ;;  %v6399_v31 = vld [vmem:[%s7662_s6 + $0x698] sm:$0xf] }
 0x422   : > { %v3264_v63 = vmax.f32 %v3259_v57, 0.0  ;;  %v6425_v7 = vld [vmem:[%s7662_s6 + $0x6f0] sm:$0xf0]  ;;  %v6391_v57 = vld [vmem:[%s7662_s6 + $0x690] sm:$0xf] }
 0x423   : > { %v6428_v56 = vor.u32 %v6986_v13, %v6425_v7  ;;  %v6244_v7 = vor.u32 %v6939_v39, %v6241_v40  ;;  %v6983_v29 = vld [vmem:[%s7662_s6 + $0x6b4] sm:$0xf0] }
 0x424   : > { %v8748_v5 = vpack.c.bf16 %v3264_v63, %v3262_v30  ;;  %v6898_v30 = vld [vmem:[%s7662_s6 + $0x414] sm:$0xf]  ;;  %v6400_v39 = vor.u32 %v6983_v29, %v6399_v31 }
 0x425   : > { %4168 = vmatpush.bf16.msra.mxu0 %v6264_v50  ;;  %4196 = vmatpush.bf16.msra.mxu2 %v6268_v60  ;;  %v6104_v50 = vor.u32 %v6910_v53, %v6103_v9  ;;  %v6108_v60 = vor.u32 %v6906_v54, %v6105_v14  ;;  %v6073_v63 = vld [vmem:[%s7662_s6 + $0x430] sm:$0xf0]  ;;  %v6931_v9 = vld [vmem:[%s7662_s6 + $0x51c] sm:$0xf]  ;;  %v6532_v14 = vor.u32 %v7011_v44, %v6529_v49 }
 0x426   : > { %4077 = vmatmul.bf16.vlgmr.msra.gmra.mxu1 %v8748_v5  ;;  %4105 = vmatmul.bf16.vlgmr.msra.gmra.mxu3 %v8748_v5  ;;  %v6076_v12 = vor.u32 %v6898_v30, %v6073_v63  ;;  %v6209_v53 = vld [vmem:[%s7662_s6 + $0x538] sm:$0xf0] }
 0x427   : > { %4181 = vmatpush.bf16.msra.mxu1 %v6552_v2  ;;  %4209 = vmatpush.bf16.msra.mxu3 %v6556_v0  ;;  %v6392_v2 = vor.u32 %v6982_v58, %v6391_v57  ;;  %v6396_v0 = vor.u32 %v6978_v59, %v6393_v48  ;;  %v7003_v57 = vld [vmem:[%s7662_s6 + $0x75c] sm:$0xf]  ;;  %v6212_v48 = vor.u32 %v6931_v9, %v6209_v53 }
 0x428   : > { %v6497_v58 = vld [vmem:[%s7662_s6 + $0x778] sm:$0xf0] }
 0x429   : > { %4169 = vmatpush.bf16.msra.mxu0 %v6232_v10  ;;  %4197 = vmatpush.bf16.msra.mxu2 %v6236_v11  ;;  %v6970_v10 = vld [vmem:[%s7662_s6 + $0x654] sm:$0xf]  ;;  %v6500_v63 = vor.u32 %v7003_v57, %v6497_v58  ;;  %v6963_v9 = vld [vmem:[%s7662_s6 + $0x61c] sm:$0xf] }
 0x42a   : > { %v6361_v11 = vld [vmem:[%s7662_s6 + $0x670] sm:$0xf0]  ;;  %v6337_v53 = vld [vmem:[%s7662_s6 + $0x638] sm:$0xf0] }
 0x42b   : > { %4182 = vmatpush.bf16.msra.mxu1 %v6520_v26  ;;  %4210 = vmatpush.bf16.msra.mxu3 %v6524_v17  ;;  %v6271_v26 = vld [vmem:[%s7662_s6 + $0x598] sm:$0xf]  ;;  %v6364_v21 = vor.u32 %v6970_v10, %v6361_v11  ;;  %v6915_v10 = vld [vmem:[%s7662_s6 + $0x49c] sm:$0xf] }
 0x42c   : > { %v6951_v17 = vld [vmem:[%s7662_s6 + $0x5b4] sm:$0xf0]  ;;  %v6145_v11 = vld [vmem:[%s7662_s6 + $0x4b8] sm:$0xf0] }
 0x42d   : > { %4170 = vmatpush.bf16.msra.mxu0 %v6200_v24  ;;  %4198 = vmatpush.bf16.msra.mxu2 %v6204_v25  ;;  %v6327_v24 = vld [vmem:[%s7662_s6 + $0x610] sm:$0xf]  ;;  %v6272_v52 = vor.u32 %v6951_v17, %v6271_v26  ;;  %v6987_v26 = vld [vmem:[%s7662_s6 + $0x6dc] sm:$0xf] }
 0x42e   : > { %v6966_v25 = vld [vmem:[%s7662_s6 + $0x62c] sm:$0xf0]  ;;  %v6433_v17 = vld [vmem:[%s7662_s6 + $0x6f8] sm:$0xf0] }
 0x42f   : > { %4183 = vmatpush.bf16.msra.mxu1 %v6488_v33  ;;  %4211 = vmatpush.bf16.msra.mxu3 %v6492_v34  ;;  %v7019_v33 = vld [vmem:[%s7662_s6 + $0x7dc] sm:$0xf]  ;;  %v6328_v36 = vor.u32 %v6966_v25, %v6327_v24 }
 0x430   : > { %4119 = vmatmul.bf16.vlgmr.msrb.gmra.mxu0 %v8732_v32  ;;  %4147 = vmatmul.bf16.vlgmr.msrb.gmra.mxu2 %v8732_v32  ;;  %v6561_v34 = vld [vmem:[%s7662_s6 + $0x7f8] sm:$0xf0] }
 0x431   : > { %4171 = vmatpush.bf16.msra.mxu0 %v6168_v37  ;;  %4199 = vmatpush.bf16.msra.mxu2 %v6172_v38  ;;  %v6332_v37 = vor.u32 %v6962_v27, %v6329_v28  ;;  %v6943_v38 = vld [vmem:[%s7662_s6 + $0x574] sm:$0xf0]  ;;  %v6564_v43 = vor.u32 %v7019_v33, %v6561_v34  ;;  %v6907_v24 = vld [vmem:[%s7662_s6 + $0x45c] sm:$0xf]  ;;  %v6436_v28 = vor.u32 %v6987_v26, %v6433_v17 }
 0x432   : > { %v6240_v13 = vor.u32 %v6943_v38, %v6239_v35  ;;  %v6113_v25 = vld [vmem:[%s7662_s6 + $0x478] sm:$0xf0]  ;;  %v6079_v35 = vld [vmem:[%s7662_s6 + $0x418] sm:$0xf] }
 0x433   : > { %4184 = vmatpush.bf16.msra.mxu1 %v6456_v42  ;;  %4212 = vmatpush.bf16.msra.mxu3 %v6460_v46  ;;  %v6527_v42 = vld [vmem:[%s7662_s6 + $0x798] sm:$0xf]  ;;  %v6979_v33 = vld [vmem:[%s7662_s6 + $0x69c] sm:$0xf] }
 0x434   : > { %v7015_v46 = vld [vmem:[%s7662_s6 + $0x7b4] sm:$0xf0]  ;;  %v6401_v34 = vld [vmem:[%s7662_s6 + $0x6b8] sm:$0xf0] }
 0x435   : > { %4172 = vmatpush.bf16.msra.mxu0 %v6136_v51  ;;  %4200 = vmatpush.bf16.msra.mxu2 %v6140_v18  ;;  %v6207_v51 = vld [vmem:[%s7662_s6 + $0x518] sm:$0xf]  ;;  %v6528_v54 = vor.u32 %v7015_v46, %v6527_v42  ;;  %v6081_v38 = vld [vmem:[%s7662_s6 + $0x438] sm:$0xf0]  ;;  %v6404_v40 = vor.u32 %v6979_v33, %v6401_v34 }
 0x436   : > { %4133 = vmatmul.bf16.vlgmr.msrb.gmra.mxu1 %v8748_v5  ;;  %4161 = vmatmul.bf16.vlgmr.msrb.gmra.mxu3 %v8748_v5  ;;  %v6935_v18 = vld [vmem:[%s7662_s6 + $0x534] sm:$0xf0]  ;;  %v6971_v42 = vld [vmem:[%s7662_s6 + $0x65c] sm:$0xf] }
 0x437   : > { %4185 = vmatpush.bf16.msra.mxu1 %v6424_v55  ;;  %4213 = vmatpush.bf16.msra.mxu3 %v6428_v56  ;;  %v6495_v55 = vld [vmem:[%s7662_s6 + $0x758] sm:$0xf]  ;;  %v6208_v59 = vor.u32 %v6935_v18, %v6207_v51  ;;  %v6369_v46 = vld [vmem:[%s7662_s6 + $0x678] sm:$0xf0] }
 0x438   : > { %v7007_v56 = vld [vmem:[%s7662_s6 + $0x774] sm:$0xf0] }
 0x439   : > { %4173 = vmatpush.bf16.msra.mxu0 %v6104_v50  ;;  %4201 = vmatpush.bf16.msra.mxu2 %v6108_v60  ;;  %v6175_v50 = vld [vmem:[%s7662_s6 + $0x4d8] sm:$0xf]  ;;  %v6496_v30 = vor.u32 %v7007_v56, %v6495_v55 }
 0x43a   : > { %v6927_v60 = vld [vmem:[%s7662_s6 + $0x4f4] sm:$0xf0] }
 0x43b   : > { %4186 = vmatpush.bf16.msra.mxu1 %v6392_v2  ;;  %4214 = vmatpush.bf16.msra.mxu3 %v6396_v0  ;;  %v6995_v2 = vld [vmem:[%s7662_s6 + $0x71c] sm:$0xf]  ;;  %v6176_v4 = vor.u32 %v6927_v60, %v6175_v50  ;;  %v6335_v51 = vld [vmem:[%s7662_s6 + $0x618] sm:$0xf] }
 0x43c   : > { %v6465_v0 = vld [vmem:[%s7662_s6 + $0x738] sm:$0xf0]  ;;  %v6967_v18 = vld [vmem:[%s7662_s6 + $0x634] sm:$0xf0] }
 0x43d   : > { %4174 = vmatpush.bf16.msra.mxu0 %v6072_v1  ;;  %4202 = vmatpush.bf16.msra.mxu2 %v6076_v12  ;;  %v6464_v1 = vor.u32 %v6999_v45, %v6463_v47  ;;  %v6468_v12 = vor.u32 %v6995_v2, %v6465_v0  ;;  %v8876_v56 = vld [vmem:[%s7664_s23 + $0x8] sm:$0xff] }
 0x43e   : > { %v3400_v62 = vperm.slane %v8876_v56, 1  ;;  %v3401_v47 = vperm.slane %v8876_v56, 2 }
 0x43f   : > { %4187 = vmatpush.bf16.msra.mxu1 %v6360_v20  ;;  %4215 = vmatpush.bf16.msra.mxu3 %v6364_v21  ;;  %v6148_v20 = vor.u32 %v6915_v10, %v6145_v11  ;;  %v6111_v21 = vld [vmem:[%s7662_s6 + $0x458] sm:$0xf] }
 0x440   : > { %4175 = vmatmul.bf16.vlgmr.msra.gmra.mxu0 %v8732_v32  ;;  %4203 = vmatmul.bf16.vlgmr.msra.gmra.mxu2 %v8732_v32 }
 0x441   : > { %4223 = vmatpush.bf16.msrb.mxu0 %v6304_v15  ;;  %4251 = vmatpush.bf16.msrb.mxu2 %v6308_v16  ;;  %v6431_v15 = vld [vmem:[%s7662_s6 + $0x6d8] sm:$0xf] }
 0x442   : > { %v6991_v16 = vld [vmem:[%s7662_s6 + $0x6f4] sm:$0xf0] }
 0x443   : > { %4188 = vmatpush.bf16.msra.mxu1 %v6328_v36  ;;  %4216 = vmatpush.bf16.msra.mxu3 %v6332_v37  ;;  %v6432_v27 = vor.u32 %v6991_v16, %v6431_v15  ;;  %v6903_v36 = vld [vmem:[%s7662_s6 + $0x434] sm:$0xf0]  ;;  %v6899_v37 = vld [vmem:[%s7662_s6 + $0x41c] sm:$0xf] }
 0x444   : > { %v6080_v44 = vor.u32 %v6903_v36, %v6079_v35  ;;  %v6084_v49 = vor.u32 %v6899_v37, %v6081_v38 }
 0x445   : > { %4224 = vmatpush.bf16.msrb.mxu0 %v6272_v52  ;;  %4252 = vmatpush.bf16.msrb.mxu2 %v6276_v23  ;;  %v6112_v52 = vor.u32 %v6911_v22, %v6111_v21  ;;  %v6116_v23 = vor.u32 %v6907_v24, %v6113_v25 }
 0x446   : > { %4189 = vmatmul.bf16.vlgmr.msra.gmra.mxu1 %v8748_v5  ;;  %4217 = vmatmul.bf16.vlgmr.msra.gmra.mxu3 %v8748_v5 }
 0x447   : > { %4237 = vmatpush.bf16.msrb.mxu1 %v6560_v41  ;;  %4265 = vmatpush.bf16.msrb.mxu3 %v6564_v43  ;;  %v6367_v41 = vld [vmem:[%s7662_s6 + $0x658] sm:$0xf] }
 0x448   : > { %v6975_v43 = vld [vmem:[%s7662_s6 + $0x674] sm:$0xf0] }
 0x449   : > { %4225 = vmatpush.bf16.msrb.mxu0 %v6240_v13  ;;  %4253 = vmatpush.bf16.msrb.mxu2 %v6244_v7  ;;  %v6368_v13 = vor.u32 %v6975_v43, %v6367_v41  ;;  %v6372_v7 = vor.u32 %v6971_v42, %v6369_v46 }
 0x44b   : > { %4238 = vmatpush.bf16.msrb.mxu1 %v6528_v54  ;;  %4266 = vmatpush.bf16.msrb.mxu3 %v6532_v14  ;;  %v6336_v54 = vor.u32 %v6967_v18, %v6335_v51  ;;  %v6340_v14 = vor.u32 %v6963_v9, %v6337_v53  ;;  %v3404_v51 = vperm.slane %v8876_v56, 5 }
 0x44d   : > { %4226 = vmatpush.bf16.msrb.mxu0 %v6208_v59  ;;  %4254 = vmatpush.bf16.msrb.mxu2 %v6212_v48  ;;  %v3399_v59 = vperm.slane %v8876_v56, 0 }
 0x44f   : > { %4239 = vmatpush.bf16.msrb.mxu1 %v6496_v30  ;;  %4267 = vmatpush.bf16.msrb.mxu3 %v6500_v63 }
 0x451   : > { %4227 = vmatpush.bf16.msrb.mxu0 %v6176_v4  ;;  %4255 = vmatpush.bf16.msrb.mxu2 %v6180_v6 }
 0x453   : > { %4240 = vmatpush.bf16.msrb.mxu1 %v6464_v1  ;;  %4268 = vmatpush.bf16.msrb.mxu3 %v6468_v12  ;;  %v3402_v1 = vperm.slane %v8876_v56, 3 }
 0x455   : > { %4228 = vmatpush.bf16.msrb.mxu0 %v6144_v19  ;;  %4256 = vmatpush.bf16.msrb.mxu2 %v6148_v20 }
 0x457   : > { %4241 = vmatpush.bf16.msrb.mxu1 %v6432_v27  ;;  %4269 = vmatpush.bf16.msrb.mxu3 %v6436_v28 }
 0x459   : > { %4229 = vmatpush.bf16.msrb.mxu0 %v6112_v52  ;;  %4257 = vmatpush.bf16.msrb.mxu2 %v6116_v23  ;;  %v3403_v52 = vperm.slane %v8876_v56, 4 }
 0x45b   : > { %4242 = vmatpush.bf16.msrb.mxu1 %v6400_v39  ;;  %4270 = vmatpush.bf16.msrb.mxu3 %v6404_v40 }
 0x45d   : > { %4230 = vmatpush.bf16.msrb.mxu0 %v6080_v44  ;;  %4258 = vmatpush.bf16.msrb.mxu2 %v6084_v49 }
 0x45f   : > { %4243 = vmatpush.bf16.msrb.mxu1 %v6368_v13  ;;  %4271 = vmatpush.bf16.msrb.mxu3 %v6372_v7  ;;  %v7157_v13 = vld [vmem:[%s9015_s10] sm:$0xff] }
 0x460   : > { %4231 = vmatmul.bf16.vlgmr.msrb.gmra.mxu0 %v8732_v32  ;;  %4259 = vmatmul.bf16.vlgmr.msrb.gmra.mxu2 %v8732_v32 }
 0x463   : > { %4244 = vmatpush.bf16.msrb.mxu1 %v6336_v54  ;;  %4272 = vmatpush.bf16.msrb.mxu3 %v6340_v14 }
 0x466   : > { %4245 = vmatmul.bf16.vlgmr.msrb.gmra.mxu1 %v8748_v5  ;;  %4273 = vmatmul.bf16.vlgmr.msrb.gmra.mxu3 %v8748_v5 }
 0x49d   : > { %v4064_v55 = vpop.f32.mrf.mxu0 }
 0x49e   : > { %v4065_v50 = vadd.f32 %v4064_v55, %v3399_v59 }
 0x4a3   : > { %v4078_v57 = vpop.f32.mrf.mxu1  ;;  %v4092_v58 = vpop.f32.mrf.mxu2 }
 0x4a4   : > { %v4079_v61 = vadd.f32 %v4078_v57, %v4065_v50  ;;  %v4093_v5 = vadd.f32 %v4092_v58, %v3400_v62 }
 0x4a5   : > { %v4066_v48 = vpop.f32.mrf.mxu0 }
 0x4a6   : > { %7125 = vtanh.f32 %v4079_v61  ;;  %v4067_v45 = vadd.f32 %v4066_v48, %v3399_v59 }
 0x4a9   : > { %v4106_v60 = vpop.f32.mrf.mxu3 }
 0x4aa   : > { %v4107_v2 = vadd.f32 %v4106_v60, %v4093_v5 }
 0x4ab   : > { %v4080_v32 = vpop.f32.mrf.mxu1  ;;  %v4094_v30 = vpop.f32.mrf.mxu2 }
 0x4ac   : > { %v4081_v4 = vadd.f32 %v4080_v32, %v4067_v45  ;;  %v7126_v10 = vpop.eup %7125  ;;  %7127 = vtanh.f32 %v4107_v2  ;;  %v4095_v16 = vadd.f32 %v4094_v30, %v3400_v62  ;;  %v7158_v62 = vld [vmem:[%s9015_s10 + $0x8] sm:$0xff]  ;;  %v7159_v45 = vld [vmem:[%s9015_s10 + $0x20] sm:$0xff] }
 0x4ad   : > { %v4120_v63 = vpop.f32.mrf.mxu0  ;;  %v4287_v15 = vmul.f32 1.442695, %v7126_v10 }
 0x4ae   : > { %v4121_v6 = vadd.f32 %v4120_v63, %v3401_v47  ;;  %7129 = vtanh.f32 %v4081_v4 }
 0x4b1   : > { %v4108_v0 = vpop.f32.mrf.mxu3 }
 0x4b2   : > { %v4109_v17 = vadd.f32 %v4108_v0, %v4095_v16  ;;  %v7128_v22 = vpop.eup %7127 }
 0x4b3   : > { %v4134_v3 = vpop.f32.mrf.mxu1  ;;  %v4148_v8 = vpop.f32.mrf.mxu2  ;;  %v4289_v29 = vmul.f32 1.442695, %v7128_v22  ;;  %v4319_v23 = vadd.f32 %v7128_v22, %v7126_v10 }
 0x4b4   : > { %v4135_v11 = vadd.f32 %v4134_v3, %v4121_v6  ;;  %v4149_v26 = vadd.f32 %v4148_v8, %v3402_v1  ;;  %v7130_v27 = vpop.eup %7129 }
 0x4b5   : > { %v4122_v12 = vpop.f32.mrf.mxu0  ;;  %v4295_v34 = vmul.f32 1.442695, %v7130_v27 }
 0x4b6   : > { %7131 = vtanh.f32 %v4135_v11  ;;  %v4123_v20 = vadd.f32 %v4122_v12, %v3401_v47  ;;  %v7160_v11 = vld [vmem:[%s9015_s10 + $0x28] sm:$0xff] }
 0x4b7   : > { %7133 = vpow2.f32 %v4287_v15 }
 0x4b9   : > { %v4162_v19 = vpop.f32.mrf.mxu3 }
 0x4ba   : > { %v4163_v21 = vadd.f32 %v4162_v19, %v4149_v26 }
 0x4bb   : > { %v4136_v24 = vpop.f32.mrf.mxu1  ;;  %v4150_v25 = vpop.f32.mrf.mxu2 }
 0x4bc   : > { %7135 = vtanh.f32 %v4163_v21  ;;  %v4137_v28 = vadd.f32 %v4136_v24, %v4123_v20  ;;  %v7132_v31 = vpop.eup %7131  ;;  %v4151_v35 = vadd.f32 %v4150_v25, %v3402_v1 }
 0x4bd   : > { %7137 = vtanh.f32 %v4109_v17  ;;  %v4176_v33 = vpop.f32.mrf.mxu0  ;;  %v7134_v36 = vpop.eup %7133  ;;  %v4320_v38 = vadd.f32 %v7132_v31, %v4319_v23  ;;  %v4291_v12 = vmul.f32 1.442695, %v7132_v31  ;;  %v3405_v17 = vperm.slane %v8876_v56, 6 }
 0x4be   : > { %7139 = vtanh.f32 %v4137_v28  ;;  %v4177_v43 = vadd.f32 %v4176_v33, %v3403_v52  ;;  %v4303_v7 = vmul.f32 %v7157_v13, %v7134_v36  ;;  %v3406_v31 = vperm.slane %v8876_v56, 7 }
 0x4bf   : > { %7141 = vpow2.f32 %v4289_v29 }
 0x4c0   : > { %7143 = vpow2.f32 %v4295_v34 }
 0x4c1   : > { %v4164_v37 = vpop.f32.mrf.mxu3 }
 0x4c2   : > { %v7136_v39 = vpop.eup %7135  ;;  %v4165_v40 = vadd.f32 %v4164_v37, %v4151_v35 }
 0x4c3   : > { %v7138_v41 = vpop.eup %7137  ;;  %v4321_v42 = vadd.f32 %v7136_v39, %v4320_v38  ;;  %v4190_v46 = vpop.f32.mrf.mxu1  ;;  %v4293_v16 = vmul.f32 1.442695, %v7136_v39  ;;  %v7162_v39 = vld [vmem:[%s9015_s10 + $0x18] sm:$0xff] }
 0x4c4   : > { %7145 = vtanh.f32 %v4165_v40  ;;  %v4204_v44 = vpop.f32.mrf.mxu2  ;;  %v4191_v49 = vadd.f32 %v4190_v46, %v4177_v43  ;;  %v7140_v18 = vpop.eup %7139  ;;  %v4297_v9 = vmul.f32 1.442695, %v7138_v41  ;;  %v4324_v54 = vadd.f32 %v7138_v41, %v7130_v27  ;;  %v7161_v27 = vld [vmem:[%s9015_s10 + $0x10] sm:$0xff] }
 0x4c5   : > { %4322 = vadd.xlane.f32.xlu1 %v4321_v42  ;;  %v7142_v14 = vpop.eup %7141  ;;  %v4178_v55 = vpop.f32.mrf.mxu0  ;;  %v4205_v58 = vadd.f32 %v4204_v44, %v3404_v51  ;;  %v4299_v19 = vmul.f32 1.442695, %v7140_v18  ;;  %v7163_v42 = vld [vmem:[%s9015_s10 + $0x30] sm:$0xff] }
 0x4c6   : > { %v4311_v53 = vadd.f32 %v4303_v7, %v4191_v49  ;;  %v7144_v57 = vpop.eup %7143  ;;  %v4325_v59 = vadd.f32 %v7140_v18, %v4324_v54  ;;  %7147 = vpow2.f32 %v4297_v9  ;;  %v4179_v60 = vadd.f32 %v4178_v55, %v3403_v52  ;;  %v7164_v9 = vld [vmem:[%s9015_s10 + $0x38] sm:$0xff]  ;;  %v4345_v55 = vld [vmem:[%s9017_s15] sm:$0xff] }
 0x4c7   : > { %v4304_v32 = vmul.f32 %v7158_v62, %v7142_v14  ;;  %v4307_v2 = vmul.f32 %v7159_v45, %v7144_v57  ;;  %7149 = vpow2.f32 %v4291_v12  ;;  %v2485_v14 = vpop.xlane.xlu0 %2484 }
 0x4c8   : > { %4329 = vst [vmem:[%s9015_s10] sm:$0xff] %v4311_v53  ;;  %7151 = vpow2.f32 %v4293_v16  ;;  %v4347_v57 = vadd.f32 %v4345_v55, %v2485_v14 }
 0x4c9   : > { %v4218_v50 = vpop.f32.mrf.mxu3  ;;  %7153 = vpow2.f32 %v4299_v19 }
 0x4ca   : > { %v7146_v48 = vpop.eup %7145  ;;  %v4219_v61 = vadd.f32 %v4218_v50, %v4205_v58 }
 0x4cb   : > { %v4326_v30 = vadd.f32 %v7146_v48, %v4325_v59  ;;  %v4192_v63 = vpop.f32.mrf.mxu1  ;;  %v4301_v29 = vmul.f32 1.442695, %v7146_v48  ;;  %v4346_v48 = vld [vmem:[%s9017_s15 + $0x8] sm:$0xff] }
 0x4cc   : > { %v4312_v47 = vadd.f32 %v4304_v32, %v4219_v61  ;;  %v4193_v5 = vadd.f32 %v4192_v63, %v4179_v60  ;;  %v4206_v0 = vpop.f32.mrf.mxu2  ;;  %v7148_v6 = vpop.eup %7147 }
 0x4cd   : > { %4327 = vadd.xlane.f32.xlu1 %v4326_v30  ;;  %v4207_v3 = vadd.f32 %v4206_v0, %v3404_v51  ;;  %v4308_v1 = vmul.f32 %v7160_v11, %v7148_v6  ;;  %v7150_v20 = vpop.eup %7149  ;;  %7155 = vpow2.f32 %v4301_v29 }
 0x4ce   : > { %4330 = vst [vmem:[%s9015_s10 + $0x8] sm:$0xff] %v4312_v47  ;;  %v4315_v4 = vadd.f32 %v4307_v2, %v4193_v5  ;;  %v4305_v28 = vmul.f32 %v7161_v27, %v7150_v20  ;;  %v7152_v34 = vpop.eup %7151 }
 0x4cf   : > { %v7154_v35 = vpop.eup %7153  ;;  %v4306_v40 = vmul.f32 %v7162_v39, %v7152_v34  ;;  %v2490_v50 = vpop.xlane.xlu0 %2489 }
 0x4d0   : > { %4333 = vst [vmem:[%s9015_s10 + $0x20] sm:$0xff] %v4315_v4  ;;  %v4309_v46 = vmul.f32 %v7163_v42, %v7154_v35  ;;  %v4348_v60 = vadd.f32 %v4346_v48, %v2490_v50 }
 0x4d1   : > { %v4220_v8 = vpop.f32.mrf.mxu3 }
 0x4d2   : > { %v4221_v10 = vadd.f32 %v4220_v8, %v4207_v3 }
 0x4d3   : > { %v7156_v13 = vpop.eup %7155 }
 0x4d4   : > { %v4316_v15 = vadd.f32 %v4308_v1, %v4221_v10  ;;  %v4310_v53 = vmul.f32 %v7164_v9, %v7156_v13 }
 0x4d6   : > { %4334 = vst [vmem:[%s9015_s10 + $0x28] sm:$0xff] %v4316_v15 }
 0x4dd   : > { %v4232_v26 = vpop.f32.mrf.mxu0 }
 0x4de   : > { %v4233_v21 = vadd.f32 %v4232_v26, %v3405_v17 }
 0x4e3   : > { %v4246_v22 = vpop.f32.mrf.mxu1  ;;  %v4260_v24 = vpop.f32.mrf.mxu2 }
 0x4e4   : > { %v4247_v25 = vadd.f32 %v4246_v22, %v4233_v21  ;;  %v4261_v23 = vadd.f32 %v4260_v24, %v3406_v31 }
 0x4e5   : > { %v4234_v52 = vpop.f32.mrf.mxu0 }
 0x4e6   : > { %v4313_v33 = vadd.f32 %v4305_v28, %v4247_v25  ;;  %v4235_v37 = vadd.f32 %v4234_v52, %v3405_v17 }
 0x4e8   : > { %4331 = vst [vmem:[%s9015_s10 + $0x10] sm:$0xff] %v4313_v33 }
 0x4e9   : > { %v4274_v36 = vpop.f32.mrf.mxu3 }
 0x4ea   : > { %v4275_v38 = vadd.f32 %v4274_v36, %v4261_v23 }
 0x4eb   : > { %v4248_v56 = vpop.f32.mrf.mxu1  ;;  %v4262_v44 = vpop.f32.mrf.mxu2 }
 0x4ec   : > { %v4314_v41 = vadd.f32 %v4306_v40, %v4275_v38  ;;  %v4249_v43 = vadd.f32 %v4248_v56, %v4235_v37  ;;  %v4263_v7 = vadd.f32 %v4262_v44, %v3406_v31 }
 0x4ee   : > { %4332 = vst [vmem:[%s9015_s10 + $0x18] sm:$0xff] %v4314_v41  ;;  %v4317_v49 = vadd.f32 %v4309_v46, %v4249_v43 }
 0x4f0   : > { %4335 = vst [vmem:[%s9015_s10 + $0x30] sm:$0xff] %v4317_v49 }
 0x4f1   : > { %v4276_v51 = vpop.f32.mrf.mxu3 }
 0x4f2   : > { %v4277_v18 = vadd.f32 %v4276_v51, %v4263_v7 }
 0x4f4   : > { %v4318_v54 = vadd.f32 %v4310_v53, %v4277_v18 }
 0x4f6   : > { %4336 = vst [vmem:[%s9015_s10 + $0x38] sm:$0xff] %v4318_v54 }
 0x538   : > { %v4323_v58 = vpop.xlane.xlu1 %4322 }
 0x539   : > { %v4349_v59 = vadd.f32 %v4347_v57, %v4323_v58 }
 0x53b   : > { %4352 = vst.msk [vmem:[%s9017_s15] sm:$0xff] %vm4351_vm1, %v4349_v59 }
 0x540   : > { %v4328_v61 = vpop.xlane.xlu1 %4327 }
 0x541   : > { %v4350_v62 = vadd.f32 %v4348_v60, %v4328_v61 }
 0x543   : > { %4353 = vst.msk [vmem:[%s9017_s15 + $0x8] sm:$0xff] %vm4351_vm1, %v4350_v62 }
 0x544 PF: > { %s9018_s20 = sld [smem:[#allocation17_spill]]  ;;  %s9021_s17 = smov %s7383_s18 }
 0x545   : > { %s9019_s13 = sld [smem:[#allocation16_spill]] }
 0x546   : > { %s9020_s19 = sld [smem:[#allocation18_spill]] }
 0x54a   : > { %p31_p7 = scmp.ge.s32.totalorder %s9018_s20, 6  }
 0x54b   : > { %s9022_s18 = smov %s9019_s13 }
 0x54c   :  { %33 = sbr.rel (!%p31_p7) target bundleno = 19 (0x13), region = 179 }
 0x551   :  { %4377 = vsyncpa [#allocation3], 1 }
 0x552   :  { %4379 = vsyncpa [#allocation3 + $0x1], 1 }
 0x553   :  { %4380 = vsyncpa [#allocation5], 1 }
 0x554   :  { %4382 = vsyncpa [#allocation5 + $0x1], 1 }
 0x555   :  { %4383 = vsyncpa [#allocation8], 1 }
 0x556   :  { %4385 = vsyncpa [#allocation8 + $0x1], 1 }
 0x557   :  { %4386 = vsyncpa [#allocation11], 1 }
 0x558   :  { %4388 = vsyncpa [#allocation11 + $0x1], 1 }

</bundles_post_ra>
